<compile_context>
chip_gen: v7x
topology: tpu7x:2x2x1
jax: 0.10.0
libtpu: 0.0.40
codegen_flags: <defaults>
</compile_context>

<pallas_src>
import functools

import jax
import jax.numpy as jnp
from jax.experimental import pallas as pl
from jax.experimental.pallas import tpu as pltpu


# ----------------------------------------------------------------------------
# In-kernel helpers (all f32 elementwise)
# ----------------------------------------------------------------------------
def _layernorm(x, gamma, beta, eps=1e-5):
    mu = jnp.mean(x, axis=-1, keepdims=True)
    var = jnp.mean((x - mu) ** 2, axis=-1, keepdims=True)
    return (x - mu) * jax.lax.rsqrt(var + eps) * gamma + beta


def _erf_approx(x):
    # Abramowitz & Stegun 7.1.26, |err| < 1.5e-7 — fp32-exact for our purposes,
    # matching PyTorch's exact-erf GELU far better than the tanh approximation,
    # while using only ops guaranteed to lower on Mosaic (abs/exp/where/mul/add).
    a1, a2, a3, a4, a5 = (0.254829592, -0.284496736, 1.421413741,
                          -1.453152027, 1.061405429)
    p = 0.3275911
    ax = jnp.abs(x)
    t = 1.0 / (1.0 + p * ax)
    poly = ((((a5 * t + a4) * t + a3) * t + a2) * t + a1) * t
    y = 1.0 - poly * jnp.exp(-ax * ax)
    return jnp.where(x >= 0, y, -y)


def _gelu_exact(x):
    return 0.5 * x * (1.0 + _erf_approx(x * 0.7071067811865476))


# ----------------------------------------------------------------------------
# Fused kernel: full encoder stack + logits head, one batch element per step
# ----------------------------------------------------------------------------
def fontogen_stack_kernel(
        tgt_ref, mask_ref,
        ln1g_ref, ln1b_ref, wqkv_ref, bqkv_ref, wo_ref, bo_ref,
        ln2g_ref, ln2b_ref, w1_ref, b1_ref, w2_ref, b2_ref,
        lnfg_ref, lnfb_ref, wout_ref,
        logits_ref,
        *, nhead, num_layers):
    x = tgt_ref[0]                                  # (S, D) f32 residual stream
    S, D = x.shape
    dh = D // nhead
    scale = 1.0 / jnp.sqrt(jnp.float32(dh))
    mask = mask_ref[...]                            # (S, S) additive f32, once

    for l in range(num_layers):                     # static unroll, weights in VMEM
        # ---- pre-LN + causal multi-head self-attention + residual ----------
        xn = _layernorm(x, ln1g_ref[l], ln1b_ref[l])
        qkv = jnp.dot(xn.astype(jnp.bfloat16), wqkv_ref[l],
                      preferred_element_type=jnp.float32) + bqkv_ref[l]  # (S,3D)
        q = qkv[:, 0 * D:1 * D] * scale             # fold 1/sqrt(dh) into q once
        k = qkv[:, 1 * D:2 * D]
        v = qkv[:, 2 * D:3 * D]

        # head-major (nhead, S, dh) via leading-dim stack (no major-dim transpose)
        qh = jnp.stack([q[:, h * dh:(h + 1) * dh] for h in range(nhead)], axis=0)
        kh = jnp.stack([k[:, h * dh:(h + 1) * dh] for h in range(nhead)], axis=0)
        vh = jnp.stack([v[:, h * dh:(h + 1) * dh] for h in range(nhead)], axis=0)

        sc = jnp.einsum('hqd,hkd->hqk',
                        qh.astype(jnp.bfloat16), kh.astype(jnp.bfloat16),
                        preferred_element_type=jnp.float32)             # (h,S,S)
        sc = sc + mask                               # mask applied to fp32 scores
        m = jnp.max(sc, axis=-1, keepdims=True)
        p = jnp.exp(sc - m)
        p = p * pl.reciprocal(jnp.sum(p, axis=-1, keepdims=True), approx=True)

        av = jnp.einsum('hqk,hkd->hqd',
                        p.astype(jnp.bfloat16), vh.astype(jnp.bfloat16),
                        preferred_element_type=jnp.float32)             # (h,S,dh)
        heads = jnp.concatenate([av[h] for h in range(nhead)], axis=1)  # (S, D)
        attn = jnp.dot(heads.astype(jnp.bfloat16), wo_ref[l],
                       preferred_element_type=jnp.float32) + bo_ref[l]
        x = x + attn

        # ---- pre-LN + MLP (4x, exact-erf GELU) + residual -------------------
        xn = _layernorm(x, ln2g_ref[l], ln2b_ref[l])
        hmid = jnp.dot(xn.astype(jnp.bfloat16), w1_ref[l],
                       preferred_element_type=jnp.float32) + b1_ref[l]
        hmid = _gelu_exact(hmid)                     # f32 elementwise
        y = jnp.dot(hmid.astype(jnp.bfloat16), w2_ref[l],
                    preferred_element_type=jnp.float32) + b2_ref[l]
        x = x + y

    # ---- to_logits: LayerNorm + Linear(D -> V, no bias) ---------------------
    xn = _layernorm(x, lnfg_ref[...], lnfb_ref[...])
    logits_ref[0] = jnp.dot(xn.astype(jnp.bfloat16), wout_ref[...],
                            preferred_element_type=jnp.float32)


# ----------------------------------------------------------------------------
# Wrapper: builds tgt + causal mask bias and launches the fused kernel
# ----------------------------------------------------------------------------
def fontogen_forward(params, text_embeddings, font_embeddings, *,
                     nhead, max_text_len):
    B, _, D = text_embeddings.shape
    sos_token = jnp.full((B, 1, D), 0.42, dtype=text_embeddings.dtype)
    tgt = jnp.concatenate(
        [sos_token, text_embeddings, font_embeddings[:, :-1, :]], axis=1)
    S = tgt.shape[1]

    L = params["wqkv"].shape[0]
    H = params["w1"].shape[2]
    V = params["w_out"].shape[1]

    # Causal additive mask, built once on the host (hoisted out of the kernel).
    row = jax.lax.broadcasted_iota(jnp.int32, (S, S), 0)
    col = jax.lax.broadcasted_iota(jnp.int32, (S, S), 1)
    mask = jnp.where(col <= row, 0.0, -1e30).astype(jnp.float32)

    kern = functools.partial(fontogen_stack_kernel, nhead=nhead, num_layers=L)

    logits = pl.pallas_call(
        kern,
        out_shape=jax.ShapeDtypeStruct((B, S, V), jnp.float32),
        grid=(B,),
        in_specs=[
            pl.BlockSpec((1, S, D), lambda b: (b, 0, 0)),        # tgt
            pl.BlockSpec((S, S), lambda b: (0, 0)),              # causal mask
            pl.BlockSpec((L, 1, D), lambda b: (0, 0, 0)),        # ln1_g
            pl.BlockSpec((L, 1, D), lambda b: (0, 0, 0)),        # ln1_b
            pl.BlockSpec((L, D, 3 * D), lambda b: (0, 0, 0)),    # wqkv (bf16)
            pl.BlockSpec((L, 1, 3 * D), lambda b: (0, 0, 0)),    # bqkv
            pl.BlockSpec((L, D, D), lambda b: (0, 0, 0)),        # wo (bf16)
            pl.BlockSpec((L, 1, D), lambda b: (0, 0, 0)),        # bo
            pl.BlockSpec((L, 1, D), lambda b: (0, 0, 0)),        # ln2_g
            pl.BlockSpec((L, 1, D), lambda b: (0, 0, 0)),        # ln2_b
            pl.BlockSpec((L, D, H), lambda b: (0, 0, 0)),        # w1 (bf16)
            pl.BlockSpec((L, 1, H), lambda b: (0, 0, 0)),        # b1
            pl.BlockSpec((L, H, D), lambda b: (0, 0, 0)),        # w2 (bf16)
            pl.BlockSpec((L, 1, D), lambda b: (0, 0, 0)),        # b2
            pl.BlockSpec((1, D), lambda b: (0, 0)),              # lnf_g
            pl.BlockSpec((1, D), lambda b: (0, 0)),              # lnf_b
            pl.BlockSpec((D, V), lambda b: (0, 0)),              # w_out (bf16)
        ],
        out_specs=pl.BlockSpec((1, S, V), lambda b: (b, 0, 0)),
        compiler_params=pltpu.CompilerParams(
            dimension_semantics=("parallel",),          # megacore over batch
            vmem_limit_bytes=32 * 1024 * 1024),          # explicit for v7x 64MiB
    )(tgt, mask,
      params["ln1_g"], params["ln1_b"], params["wqkv"], params["bqkv"],
      params["wo"], params["bo"], params["ln2_g"], params["ln2_b"],
      params["w1"], params["b1"], params["w2"], params["b2"],
      params["lnf_g"], params["lnf_b"], params["w_out"])

    text_probabilities = logits[:, :max_text_len, :]
    svg_probabilities = logits[:, max_text_len:, :]
    return text_probabilities, svg_probabilities


# ----------------------------------------------------------------------------
# Parameter init (deterministic, synthetic). Matmul weights stored in bf16,
# stored as (in_features, out_features) so projections are x @ W + b.
# ----------------------------------------------------------------------------
def init_params(key, d_model, num_layers, font_vocab_size, hidden_mult=4):
    D, L, V = d_model, num_layers, font_vocab_size
    H = hidden_mult * d_model
    ks = jax.random.split(key, 5)

    def w(kk, shape):
        return (0.02 * jax.random.normal(kk, shape, jnp.float32)).astype(jnp.bfloat16)

    return dict(
        ln1_g=jnp.ones((L, 1, D), jnp.float32),
        ln1_b=jnp.zeros((L, 1, D), jnp.float32),
        wqkv=w(ks[0], (L, D, 3 * D)),
        bqkv=jnp.zeros((L, 1, 3 * D), jnp.float32),
        wo=w(ks[1], (L, D, D)),
        bo=jnp.zeros((L, 1, D), jnp.float32),
        ln2_g=jnp.ones((L, 1, D), jnp.float32),
        ln2_b=jnp.zeros((L, 1, D), jnp.float32),
        w1=w(ks[2], (L, D, H)),
        b1=jnp.zeros((L, 1, H), jnp.float32),
        w2=w(ks[3], (L, H, D)),
        b2=jnp.zeros((L, 1, D), jnp.float32),
        lnf_g=jnp.ones((1, D), jnp.float32),
        lnf_b=jnp.zeros((1, D), jnp.float32),
        w_out=w(ks[4], (D, V)),
    )


if __name__ == "__main__":
    # Small, module-consistent config: block_size == max_text_tokens == 16,
    # d_model a multiple of 128 so every tile is lane-dense, even batch so both
    # v7x TensorCores get a grid step.
    d_model = 128
    nhead = 4                   # head dim 32
    num_layers = 2
    font_vocab_size = 256
    max_text_tokens = 16
    max_font_tokens = 16
    batch = 2

    key = jax.random.PRNGKey(0)
    kp, kt, kf = jax.random.split(key, 3)
    params = init_params(kp, d_model, num_layers, font_vocab_size)

    text_embeddings = jax.random.normal(
        kt, (batch, max_text_tokens, d_model), jnp.float32)
    font_embeddings = jax.random.normal(
        kf, (batch, max_font_tokens, d_model), jnp.float32)

    fwd = jax.jit(functools.partial(
        fontogen_forward, nhead=nhead, max_text_len=max_text_tokens))
    text_probs, svg_probs = fwd(params, text_embeddings, font_embeddings)
    jax.block_until_ready((text_probs, svg_probs))

    assert text_probs.shape == (batch, max_text_tokens, font_vocab_size)
    assert svg_probs.shape == (batch, max_font_tokens, font_vocab_size)
    assert bool(jnp.all(jnp.isfinite(text_probs)))
    assert bool(jnp.all(jnp.isfinite(svg_probs)))
    print("KERNEL_OK")
</pallas_src>

<mosaic_0001>
module attributes {stable_mosaic.version = 11 : i64} {
  func.func @fontogen_stack_kernel(%arg0: i32, %arg1: memref<1x32x128xf32, #tpu.memory_space<vmem>>, %arg2: memref<32x32xf32, #tpu.memory_space<vmem>>, %arg3: memref<2x1x128xf32, #tpu.memory_space<vmem>>, %arg4: memref<2x1x128xf32, #tpu.memory_space<vmem>>, %arg5: memref<2x128x384xbf16, #tpu.memory_space<vmem>>, %arg6: memref<2x1x384xf32, #tpu.memory_space<vmem>>, %arg7: memref<2x128x128xbf16, #tpu.memory_space<vmem>>, %arg8: memref<2x1x128xf32, #tpu.memory_space<vmem>>, %arg9: memref<2x1x128xf32, #tpu.memory_space<vmem>>, %arg10: memref<2x1x128xf32, #tpu.memory_space<vmem>>, %arg11: memref<2x128x512xbf16, #tpu.memory_space<vmem>>, %arg12: memref<2x1x512xf32, #tpu.memory_space<vmem>>, %arg13: memref<2x512x128xbf16, #tpu.memory_space<vmem>>, %arg14: memref<2x1x128xf32, #tpu.memory_space<vmem>>, %arg15: memref<1x128xf32, #tpu.memory_space<vmem>>, %arg16: memref<1x128xf32, #tpu.memory_space<vmem>>, %arg17: memref<128x256xbf16, #tpu.memory_space<vmem>>, %arg18: memref<1x32x256xf32, #tpu.memory_space<vmem>>) attributes {dimension_semantics = [#tpu.dimension_semantics<parallel>], iteration_bounds = array<i64: 2>, scalar_prefetch = 0 : i64, scratch_operands = 0 : i64, tpu.core_type = #tpu.core_type<tc>, window_params = [{transform_indices = @transform_0, window_bounds = array<i64: 1, 32, 128>}, {pipeline_mode = #tpu.pipeline_mode<synchronous>, transform_indices = @transform_1, window_bounds = array<i64: 32, 32>}, {pipeline_mode = #tpu.pipeline_mode<synchronous>, transform_indices = @transform_2, window_bounds = array<i64: 2, 1, 128>}, {pipeline_mode = #tpu.pipeline_mode<synchronous>, transform_indices = @transform_3, window_bounds = array<i64: 2, 1, 128>}, {pipeline_mode = #tpu.pipeline_mode<synchronous>, transform_indices = @transform_4, window_bounds = array<i64: 2, 128, 384>}, {pipeline_mode = #tpu.pipeline_mode<synchronous>, transform_indices = @transform_5, window_bounds = array<i64: 2, 1, 384>}, {pipeline_mode = #tpu.pipeline_mode<synchronous>, transform_indices = @transform_6, window_bounds = array<i64: 2, 128, 128>}, {pipeline_mode = #tpu.pipeline_mode<synchronous>, transform_indices = @transform_7, window_bounds = array<i64: 2, 1, 128>}, {pipeline_mode = #tpu.pipeline_mode<synchronous>, transform_indices = @transform_8, window_bounds = array<i64: 2, 1, 128>}, {pipeline_mode = #tpu.pipeline_mode<synchronous>, transform_indices = @transform_9, window_bounds = array<i64: 2, 1, 128>}, {pipeline_mode = #tpu.pipeline_mode<synchronous>, transform_indices = @transform_10, window_bounds = array<i64: 2, 128, 512>}, {pipeline_mode = #tpu.pipeline_mode<synchronous>, transform_indices = @transform_11, window_bounds = array<i64: 2, 1, 512>}, {pipeline_mode = #tpu.pipeline_mode<synchronous>, transform_indices = @transform_12, window_bounds = array<i64: 2, 512, 128>}, {pipeline_mode = #tpu.pipeline_mode<synchronous>, transform_indices = @transform_13, window_bounds = array<i64: 2, 1, 128>}, {pipeline_mode = #tpu.pipeline_mode<synchronous>, transform_indices = @transform_14, window_bounds = array<i64: 1, 128>}, {pipeline_mode = #tpu.pipeline_mode<synchronous>, transform_indices = @transform_15, window_bounds = array<i64: 1, 128>}, {pipeline_mode = #tpu.pipeline_mode<synchronous>, transform_indices = @transform_16, window_bounds = array<i64: 128, 256>}, {transform_indices = @transform_17, window_bounds = array<i64: 1, 32, 256>}]} {
    %c0 = arith.constant 0 : index
    %c0_0 = arith.constant 0 : index
    %c0_1 = arith.constant 0 : index
    %0 = vector.load %arg1[%c0, %c0_0, %c0_1] : memref<1x32x128xf32, #tpu.memory_space<vmem>>, vector<1x32x128xf32>
    %1 = vector.shape_cast %0 : vector<1x32x128xf32> to vector<32x128xf32>
    %cst = arith.constant 3.200000e+01 : f32
    %2 = math.sqrt %cst : f32
    %cst_2 = arith.constant 1.000000e+00 : f32
    %3 = arith.divf %cst_2, %2 : f32
    %c0_3 = arith.constant 0 : index
    %c0_4 = arith.constant 0 : index
    %4 = vector.load %arg2[%c0_3, %c0_4] : memref<32x32xf32, #tpu.memory_space<vmem>>, vector<32x32xf32>
    %c0_5 = arith.constant 0 : index
    %c0_6 = arith.constant 0 : index
    %c0_7 = arith.constant 0 : index
    %5 = vector.load %arg3[%c0_5, %c0_6, %c0_7] : memref<2x1x128xf32, #tpu.memory_space<vmem>>, vector<1x1x128xf32>
    %6 = vector.shape_cast %5 : vector<1x1x128xf32> to vector<1x128xf32>
    %c0_8 = arith.constant 0 : index
    %c0_9 = arith.constant 0 : index
    %c0_10 = arith.constant 0 : index
    %7 = vector.load %arg4[%c0_8, %c0_9, %c0_10] : memref<2x1x128xf32, #tpu.memory_space<vmem>>, vector<1x1x128xf32>
    %8 = vector.shape_cast %7 : vector<1x1x128xf32> to vector<1x128xf32>
    %cst_11 = arith.constant dense<0.000000e+00> : vector<32xf32>
    %9 = vector.multi_reduction <add>, %1, %cst_11 [1] : vector<32x128xf32> to vector<32xf32>
    %10 = vector.shape_cast %9 : vector<32xf32> to vector<32x1xf32>
    %cst_12 = arith.constant 1.280000e+02 : f32
    %11 = vector.broadcast %cst_12 : f32 to vector<32x1xf32>
    %12 = arith.divf %10, %11 : vector<32x1xf32>
    %13 = vector.broadcast %12 : vector<32x1xf32> to vector<32x128xf32>
    %14 = arith.subf %1, %13 : vector<32x128xf32>
    %15 = arith.mulf %14, %14 : vector<32x128xf32>
    %cst_13 = arith.constant dense<0.000000e+00> : vector<32xf32>
    %16 = vector.multi_reduction <add>, %15, %cst_13 [1] : vector<32x128xf32> to vector<32xf32>
    %17 = vector.shape_cast %16 : vector<32xf32> to vector<32x1xf32>
    %cst_14 = arith.constant 1.280000e+02 : f32
    %18 = vector.broadcast %cst_14 : f32 to vector<32x1xf32>
    %19 = arith.divf %17, %18 : vector<32x1xf32>
    %20 = vector.broadcast %12 : vector<32x1xf32> to vector<32x128xf32>
    %21 = arith.subf %1, %20 : vector<32x128xf32>
    %cst_15 = arith.constant 9.99999974E-6 : f32
    %22 = vector.broadcast %cst_15 : f32 to vector<32x1xf32>
    %23 = arith.addf %19, %22 : vector<32x1xf32>
    %24 = math.rsqrt %23 : vector<32x1xf32>
    %25 = vector.broadcast %24 : vector<32x1xf32> to vector<32x128xf32>
    %26 = arith.mulf %21, %25 : vector<32x128xf32>
    %27 = vector.broadcast %6 : vector<1x128xf32> to vector<32x128xf32>
    %28 = arith.mulf %26, %27 : vector<32x128xf32>
    %29 = vector.broadcast %8 : vector<1x128xf32> to vector<32x128xf32>
    %30 = arith.addf %28, %29 : vector<32x128xf32>
    %31 = arith.truncf %30 : vector<32x128xf32> to vector<32x128xbf16>
    %c0_16 = arith.constant 0 : index
    %c0_17 = arith.constant 0 : index
    %c0_18 = arith.constant 0 : index
    %32 = vector.load %arg5[%c0_16, %c0_17, %c0_18] : memref<2x128x384xbf16, #tpu.memory_space<vmem>>, vector<1x128x384xbf16>
    %33 = vector.shape_cast %32 : vector<1x128x384xbf16> to vector<128x384xbf16>
    %cst_19 = arith.constant dense<0.000000e+00> : vector<32x384xf32>
    %34 = tpu.matmul %31, %33, %cst_19 {dimension_numbers = #tpu.dot_dimension_numbers<[1], [0], [0], [1], [0, 0, 1, 1], [], []>} : vector<32x128xbf16>, vector<128x384xbf16>, vector<32x384xf32> -> vector<32x384xf32>
    %c0_20 = arith.constant 0 : index
    %c0_21 = arith.constant 0 : index
    %c0_22 = arith.constant 0 : index
    %35 = vector.load %arg6[%c0_20, %c0_21, %c0_22] : memref<2x1x384xf32, #tpu.memory_space<vmem>>, vector<1x1x384xf32>
    %36 = vector.shape_cast %35 : vector<1x1x384xf32> to vector<1x384xf32>
    %37 = vector.broadcast %36 : vector<1x384xf32> to vector<32x384xf32>
    %38 = arith.addf %34, %37 : vector<32x384xf32>
    %39 = vector.extract_strided_slice %38 {offsets = [0, 0], sizes = [32, 128], strides = [1, 1]} : vector<32x384xf32> to vector<32x128xf32>
    %40 = vector.broadcast %3 : f32 to vector<32x128xf32>
    %41 = arith.mulf %39, %40 : vector<32x128xf32>
    %42 = vector.extract_strided_slice %38 {offsets = [0, 128], sizes = [32, 128], strides = [1, 1]} : vector<32x384xf32> to vector<32x128xf32>
    %43 = vector.extract_strided_slice %38 {offsets = [0, 256], sizes = [32, 128], strides = [1, 1]} : vector<32x384xf32> to vector<32x128xf32>
    %44 = vector.extract_strided_slice %41 {offsets = [0, 0], sizes = [32, 32], strides = [1, 1]} : vector<32x128xf32> to vector<32x32xf32>
    %45 = vector.extract_strided_slice %41 {offsets = [0, 32], sizes = [32, 32], strides = [1, 1]} : vector<32x128xf32> to vector<32x32xf32>
    %46 = vector.extract_strided_slice %41 {offsets = [0, 64], sizes = [32, 32], strides = [1, 1]} : vector<32x128xf32> to vector<32x32xf32>
    %47 = vector.extract_strided_slice %41 {offsets = [0, 96], sizes = [32, 32], strides = [1, 1]} : vector<32x128xf32> to vector<32x32xf32>
    %48 = vector.shape_cast %44 : vector<32x32xf32> to vector<1x32x32xf32>
    %49 = vector.shape_cast %45 : vector<32x32xf32> to vector<1x32x32xf32>
    %50 = vector.shape_cast %46 : vector<32x32xf32> to vector<1x32x32xf32>
    %51 = vector.shape_cast %47 : vector<32x32xf32> to vector<1x32x32xf32>
    %52 = tpu.concatenate %48, %49, %50, %51 in 0 : vector<1x32x32xf32>, vector<1x32x32xf32>, vector<1x32x32xf32>, vector<1x32x32xf32> -> vector<4x32x32xf32>
    %53 = vector.extract_strided_slice %42 {offsets = [0, 0], sizes = [32, 32], strides = [1, 1]} : vector<32x128xf32> to vector<32x32xf32>
    %54 = vector.extract_strided_slice %42 {offsets = [0, 32], sizes = [32, 32], strides = [1, 1]} : vector<32x128xf32> to vector<32x32xf32>
    %55 = vector.extract_strided_slice %42 {offsets = [0, 64], sizes = [32, 32], strides = [1, 1]} : vector<32x128xf32> to vector<32x32xf32>
    %56 = vector.extract_strided_slice %42 {offsets = [0, 96], sizes = [32, 32], strides = [1, 1]} : vector<32x128xf32> to vector<32x32xf32>
    %57 = vector.shape_cast %53 : vector<32x32xf32> to vector<1x32x32xf32>
    %58 = vector.shape_cast %54 : vector<32x32xf32> to vector<1x32x32xf32>
    %59 = vector.shape_cast %55 : vector<32x32xf32> to vector<1x32x32xf32>
    %60 = vector.shape_cast %56 : vector<32x32xf32> to vector<1x32x32xf32>
    %61 = tpu.concatenate %57, %58, %59, %60 in 0 : vector<1x32x32xf32>, vector<1x32x32xf32>, vector<1x32x32xf32>, vector<1x32x32xf32> -> vector<4x32x32xf32>
    %62 = vector.extract_strided_slice %43 {offsets = [0, 0], sizes = [32, 32], strides = [1, 1]} : vector<32x128xf32> to vector<32x32xf32>
    %63 = vector.extract_strided_slice %43 {offsets = [0, 32], sizes = [32, 32], strides = [1, 1]} : vector<32x128xf32> to vector<32x32xf32>
    %64 = vector.extract_strided_slice %43 {offsets = [0, 64], sizes = [32, 32], strides = [1, 1]} : vector<32x128xf32> to vector<32x32xf32>
    %65 = vector.extract_strided_slice %43 {offsets = [0, 96], sizes = [32, 32], strides = [1, 1]} : vector<32x128xf32> to vector<32x32xf32>
    %66 = vector.shape_cast %62 : vector<32x32xf32> to vector<1x32x32xf32>
    %67 = vector.shape_cast %63 : vector<32x32xf32> to vector<1x32x32xf32>
    %68 = vector.shape_cast %64 : vector<32x32xf32> to vector<1x32x32xf32>
    %69 = vector.shape_cast %65 : vector<32x32xf32> to vector<1x32x32xf32>
    %70 = tpu.concatenate %66, %67, %68, %69 in 0 : vector<1x32x32xf32>, vector<1x32x32xf32>, vector<1x32x32xf32>, vector<1x32x32xf32> -> vector<4x32x32xf32>
    %71 = arith.truncf %52 : vector<4x32x32xf32> to vector<4x32x32xbf16>
    %72 = arith.truncf %61 : vector<4x32x32xf32> to vector<4x32x32xbf16>
    "tpu.trace_start"() <{level = 10 : i32, message = "hqd,hkd->hqk"}> : () -> ()
    %cst_23 = arith.constant dense<0.000000e+00> : vector<4x32x32xf32>
    %73 = tpu.matmul %71, %72, %cst_23 {dimension_numbers = #tpu.dot_dimension_numbers<[2], [2], [1], [1], [0, 0, 0, 1, 1, 1], [0], [0]>} : vector<4x32x32xbf16>, vector<4x32x32xbf16>, vector<4x32x32xf32> -> vector<4x32x32xf32>
    "tpu.trace_stop"() : () -> ()
    %74 = vector.shape_cast %4 : vector<32x32xf32> to vector<1x32x32xf32>
    %75 = vector.broadcast %74 : vector<1x32x32xf32> to vector<4x32x32xf32>
    %76 = arith.addf %73, %75 : vector<4x32x32xf32>
    %cst_24 = arith.constant dense<0xFF800000> : vector<4x32xf32>
    %77 = vector.multi_reduction <maximumf>, %76, %cst_24 [2] : vector<4x32x32xf32> to vector<4x32xf32>
    %78 = vector.shape_cast %77 : vector<4x32xf32> to vector<4x32x1xf32>
    %79 = vector.broadcast %78 : vector<4x32x1xf32> to vector<4x32x32xf32>
    %80 = arith.subf %76, %79 : vector<4x32x32xf32>
    %81 = math.exp %80 : vector<4x32x32xf32>
    %cst_25 = arith.constant dense<0.000000e+00> : vector<4x32xf32>
    %82 = vector.multi_reduction <add>, %81, %cst_25 [2] : vector<4x32x32xf32> to vector<4x32xf32>
    %83 = vector.shape_cast %82 : vector<4x32xf32> to vector<4x32x1xf32>
    %84 = tpu.reciprocal %83 {approx = true} : vector<4x32x1xf32> -> vector<4x32x1xf32>
    %85 = vector.broadcast %84 : vector<4x32x1xf32> to vector<4x32x32xf32>
    %86 = arith.mulf %81, %85 : vector<4x32x32xf32>
    %87 = arith.truncf %86 : vector<4x32x32xf32> to vector<4x32x32xbf16>
    %88 = arith.truncf %70 : vector<4x32x32xf32> to vector<4x32x32xbf16>
    "tpu.trace_start"() <{level = 10 : i32, message = "hqk,hkd->hqd"}> : () -> ()
    %cst_26 = arith.constant dense<0.000000e+00> : vector<4x32x32xf32>
    %89 = tpu.matmul %87, %88, %cst_26 {dimension_numbers = #tpu.dot_dimension_numbers<[2], [1], [1], [2], [0, 0, 0, 1, 1, 2], [0], [0]>} : vector<4x32x32xbf16>, vector<4x32x32xbf16>, vector<4x32x32xf32> -> vector<4x32x32xf32>
    "tpu.trace_stop"() : () -> ()
    %90 = vector.extract_strided_slice %89 {offsets = [0, 0, 0], sizes = [1, 32, 32], strides = [1, 1, 1]} : vector<4x32x32xf32> to vector<1x32x32xf32>
    %91 = vector.shape_cast %90 : vector<1x32x32xf32> to vector<32x32xf32>
    %92 = vector.extract_strided_slice %89 {offsets = [1, 0, 0], sizes = [1, 32, 32], strides = [1, 1, 1]} : vector<4x32x32xf32> to vector<1x32x32xf32>
    %93 = vector.shape_cast %92 : vector<1x32x32xf32> to vector<32x32xf32>
    %94 = vector.extract_strided_slice %89 {offsets = [2, 0, 0], sizes = [1, 32, 32], strides = [1, 1, 1]} : vector<4x32x32xf32> to vector<1x32x32xf32>
    %95 = vector.shape_cast %94 : vector<1x32x32xf32> to vector<32x32xf32>
    %96 = vector.extract_strided_slice %89 {offsets = [3, 0, 0], sizes = [1, 32, 32], strides = [1, 1, 1]} : vector<4x32x32xf32> to vector<1x32x32xf32>
    %97 = vector.shape_cast %96 : vector<1x32x32xf32> to vector<32x32xf32>
    %98 = tpu.concatenate %91, %93, %95, %97 in 1 : vector<32x32xf32>, vector<32x32xf32>, vector<32x32xf32>, vector<32x32xf32> -> vector<32x128xf32>
    %99 = arith.truncf %98 : vector<32x128xf32> to vector<32x128xbf16>
    %c0_27 = arith.constant 0 : index
    %c0_28 = arith.constant 0 : index
    %c0_29 = arith.constant 0 : index
    %100 = vector.load %arg7[%c0_27, %c0_28, %c0_29] : memref<2x128x128xbf16, #tpu.memory_space<vmem>>, vector<1x128x128xbf16>
    %101 = vector.shape_cast %100 : vector<1x128x128xbf16> to vector<128x128xbf16>
    %cst_30 = arith.constant dense<0.000000e+00> : vector<32x128xf32>
    %102 = tpu.matmul %99, %101, %cst_30 {dimension_numbers = #tpu.dot_dimension_numbers<[1], [0], [0], [1], [0, 0, 1, 1], [], []>} : vector<32x128xbf16>, vector<128x128xbf16>, vector<32x128xf32> -> vector<32x128xf32>
    %c0_31 = arith.constant 0 : index
    %c0_32 = arith.constant 0 : index
    %c0_33 = arith.constant 0 : index
    %103 = vector.load %arg8[%c0_31, %c0_32, %c0_33] : memref<2x1x128xf32, #tpu.memory_space<vmem>>, vector<1x1x128xf32>
    %104 = vector.shape_cast %103 : vector<1x1x128xf32> to vector<1x128xf32>
    %105 = vector.broadcast %104 : vector<1x128xf32> to vector<32x128xf32>
    %106 = arith.addf %102, %105 : vector<32x128xf32>
    %107 = arith.addf %1, %106 : vector<32x128xf32>
    %c0_34 = arith.constant 0 : index
    %c0_35 = arith.constant 0 : index
    %c0_36 = arith.constant 0 : index
    %108 = vector.load %arg9[%c0_34, %c0_35, %c0_36] : memref<2x1x128xf32, #tpu.memory_space<vmem>>, vector<1x1x128xf32>
    %109 = vector.shape_cast %108 : vector<1x1x128xf32> to vector<1x128xf32>
    %c0_37 = arith.constant 0 : index
    %c0_38 = arith.constant 0 : index
    %c0_39 = arith.constant 0 : index
    %110 = vector.load %arg10[%c0_37, %c0_38, %c0_39] : memref<2x1x128xf32, #tpu.memory_space<vmem>>, vector<1x1x128xf32>
    %111 = vector.shape_cast %110 : vector<1x1x128xf32> to vector<1x128xf32>
    %cst_40 = arith.constant dense<0.000000e+00> : vector<32xf32>
    %112 = vector.multi_reduction <add>, %107, %cst_40 [1] : vector<32x128xf32> to vector<32xf32>
    %113 = vector.shape_cast %112 : vector<32xf32> to vector<32x1xf32>
    %cst_41 = arith.constant 1.280000e+02 : f32
    %114 = vector.broadcast %cst_41 : f32 to vector<32x1xf32>
    %115 = arith.divf %113, %114 : vector<32x1xf32>
    %116 = vector.broadcast %115 : vector<32x1xf32> to vector<32x128xf32>
    %117 = arith.subf %107, %116 : vector<32x128xf32>
    %118 = arith.mulf %117, %117 : vector<32x128xf32>
    %cst_42 = arith.constant dense<0.000000e+00> : vector<32xf32>
    %119 = vector.multi_reduction <add>, %118, %cst_42 [1] : vector<32x128xf32> to vector<32xf32>
    %120 = vector.shape_cast %119 : vector<32xf32> to vector<32x1xf32>
    %cst_43 = arith.constant 1.280000e+02 : f32
    %121 = vector.broadcast %cst_43 : f32 to vector<32x1xf32>
    %122 = arith.divf %120, %121 : vector<32x1xf32>
    %123 = vector.broadcast %115 : vector<32x1xf32> to vector<32x128xf32>
    %124 = arith.subf %107, %123 : vector<32x128xf32>
    %cst_44 = arith.constant 9.99999974E-6 : f32
    %125 = vector.broadcast %cst_44 : f32 to vector<32x1xf32>
    %126 = arith.addf %122, %125 : vector<32x1xf32>
    %127 = math.rsqrt %126 : vector<32x1xf32>
    %128 = vector.broadcast %127 : vector<32x1xf32> to vector<32x128xf32>
    %129 = arith.mulf %124, %128 : vector<32x128xf32>
    %130 = vector.broadcast %109 : vector<1x128xf32> to vector<32x128xf32>
    %131 = arith.mulf %129, %130 : vector<32x128xf32>
    %132 = vector.broadcast %111 : vector<1x128xf32> to vector<32x128xf32>
    %133 = arith.addf %131, %132 : vector<32x128xf32>
    %134 = arith.truncf %133 : vector<32x128xf32> to vector<32x128xbf16>
    %c0_45 = arith.constant 0 : index
    %c0_46 = arith.constant 0 : index
    %c0_47 = arith.constant 0 : index
    %135 = vector.load %arg11[%c0_45, %c0_46, %c0_47] : memref<2x128x512xbf16, #tpu.memory_space<vmem>>, vector<1x128x512xbf16>
    %136 = vector.shape_cast %135 : vector<1x128x512xbf16> to vector<128x512xbf16>
    %cst_48 = arith.constant dense<0.000000e+00> : vector<32x512xf32>
    %137 = tpu.matmul %134, %136, %cst_48 {dimension_numbers = #tpu.dot_dimension_numbers<[1], [0], [0], [1], [0, 0, 1, 1], [], []>} : vector<32x128xbf16>, vector<128x512xbf16>, vector<32x512xf32> -> vector<32x512xf32>
    %c0_49 = arith.constant 0 : index
    %c0_50 = arith.constant 0 : index
    %c0_51 = arith.constant 0 : index
    %138 = vector.load %arg12[%c0_49, %c0_50, %c0_51] : memref<2x1x512xf32, #tpu.memory_space<vmem>>, vector<1x1x512xf32>
    %139 = vector.shape_cast %138 : vector<1x1x512xf32> to vector<1x512xf32>
    %140 = vector.broadcast %139 : vector<1x512xf32> to vector<32x512xf32>
    %141 = arith.addf %137, %140 : vector<32x512xf32>
    %cst_52 = arith.constant 5.000000e-01 : f32
    %142 = vector.broadcast %cst_52 : f32 to vector<32x512xf32>
    %143 = arith.mulf %142, %141 : vector<32x512xf32>
    %cst_53 = arith.constant 0.707106769 : f32
    %144 = vector.broadcast %cst_53 : f32 to vector<32x512xf32>
    %145 = arith.mulf %141, %144 : vector<32x512xf32>
    %146 = math.absf %145 : vector<32x512xf32>
    %cst_54 = arith.constant 0.327591091 : f32
    %147 = vector.broadcast %cst_54 : f32 to vector<32x512xf32>
    %148 = arith.mulf %147, %146 : vector<32x512xf32>
    %cst_55 = arith.constant 1.000000e+00 : f32
    %149 = vector.broadcast %cst_55 : f32 to vector<32x512xf32>
    %150 = arith.addf %149, %148 : vector<32x512xf32>
    %cst_56 = arith.constant 1.000000e+00 : f32
    %151 = vector.broadcast %cst_56 : f32 to vector<32x512xf32>
    %152 = arith.divf %151, %150 : vector<32x512xf32>
    %cst_57 = arith.constant 1.06140542 : f32
    %153 = vector.broadcast %cst_57 : f32 to vector<32x512xf32>
    %154 = arith.mulf %153, %152 : vector<32x512xf32>
    %cst_58 = arith.constant -1.45315206 : f32
    %155 = vector.broadcast %cst_58 : f32 to vector<32x512xf32>
    %156 = arith.addf %154, %155 : vector<32x512xf32>
    %157 = arith.mulf %156, %152 : vector<32x512xf32>
    %cst_59 = arith.constant 1.42141378 : f32
    %158 = vector.broadcast %cst_59 : f32 to vector<32x512xf32>
    %159 = arith.addf %157, %158 : vector<32x512xf32>
    %160 = arith.mulf %159, %152 : vector<32x512xf32>
    %cst_60 = arith.constant -0.284496725 : f32
    %161 = vector.broadcast %cst_60 : f32 to vector<32x512xf32>
    %162 = arith.addf %160, %161 : vector<32x512xf32>
    %163 = arith.mulf %162, %152 : vector<32x512xf32>
    %cst_61 = arith.constant 0.254829586 : f32
    %164 = vector.broadcast %cst_61 : f32 to vector<32x512xf32>
    %165 = arith.addf %163, %164 : vector<32x512xf32>
    %166 = arith.mulf %165, %152 : vector<32x512xf32>
    %cst_62 = arith.constant 0.000000e+00 : f32
    %167 = vector.broadcast %cst_62 : f32 to vector<32x512xf32>
    %168 = arith.subf %167, %146 : vector<32x512xf32>
    %169 = arith.mulf %168, %146 : vector<32x512xf32>
    %170 = math.exp %169 : vector<32x512xf32>
    %171 = arith.mulf %166, %170 : vector<32x512xf32>
    %cst_63 = arith.constant 1.000000e+00 : f32
    %172 = vector.broadcast %cst_63 : f32 to vector<32x512xf32>
    %173 = arith.subf %172, %171 : vector<32x512xf32>
    %cst_64 = arith.constant 0.000000e+00 : f32
    %174 = vector.broadcast %cst_64 : f32 to vector<32x512xf32>
    %175 = arith.cmpf oge, %145, %174 : vector<32x512xf32>
    %cst_65 = arith.constant 0.000000e+00 : f32
    %176 = vector.broadcast %cst_65 : f32 to vector<32x512xf32>
    %177 = arith.subf %176, %173 : vector<32x512xf32>
    %178 = arith.select %175, %173, %177 : vector<32x512xi1>, vector<32x512xf32>
    %cst_66 = arith.constant 1.000000e+00 : f32
    %179 = vector.broadcast %cst_66 : f32 to vector<32x512xf32>
    %180 = arith.addf %179, %178 : vector<32x512xf32>
    %181 = arith.mulf %143, %180 : vector<32x512xf32>
    %182 = arith.truncf %181 : vector<32x512xf32> to vector<32x512xbf16>
    %c0_67 = arith.constant 0 : index
    %c0_68 = arith.constant 0 : index
    %c0_69 = arith.constant 0 : index
    %183 = vector.load %arg13[%c0_67, %c0_68, %c0_69] : memref<2x512x128xbf16, #tpu.memory_space<vmem>>, vector<1x512x128xbf16>
    %184 = vector.shape_cast %183 : vector<1x512x128xbf16> to vector<512x128xbf16>
    %cst_70 = arith.constant dense<0.000000e+00> : vector<32x128xf32>
    %185 = tpu.matmul %182, %184, %cst_70 {dimension_numbers = #tpu.dot_dimension_numbers<[1], [0], [0], [1], [0, 0, 1, 1], [], []>} : vector<32x512xbf16>, vector<512x128xbf16>, vector<32x128xf32> -> vector<32x128xf32>
    %c0_71 = arith.constant 0 : index
    %c0_72 = arith.constant 0 : index
    %c0_73 = arith.constant 0 : index
    %186 = vector.load %arg14[%c0_71, %c0_72, %c0_73] : memref<2x1x128xf32, #tpu.memory_space<vmem>>, vector<1x1x128xf32>
    %187 = vector.shape_cast %186 : vector<1x1x128xf32> to vector<1x128xf32>
    %188 = vector.broadcast %187 : vector<1x128xf32> to vector<32x128xf32>
    %189 = arith.addf %185, %188 : vector<32x128xf32>
    %190 = arith.addf %107, %189 : vector<32x128xf32>
    %c1 = arith.constant 1 : index
    %c0_74 = arith.constant 0 : index
    %c0_75 = arith.constant 0 : index
    %191 = vector.load %arg3[%c1, %c0_74, %c0_75] : memref<2x1x128xf32, #tpu.memory_space<vmem>>, vector<1x1x128xf32>
    %192 = vector.shape_cast %191 : vector<1x1x128xf32> to vector<1x128xf32>
    %c1_76 = arith.constant 1 : index
    %c0_77 = arith.constant 0 : index
    %c0_78 = arith.constant 0 : index
    %193 = vector.load %arg4[%c1_76, %c0_77, %c0_78] : memref<2x1x128xf32, #tpu.memory_space<vmem>>, vector<1x1x128xf32>
    %194 = vector.shape_cast %193 : vector<1x1x128xf32> to vector<1x128xf32>
    %cst_79 = arith.constant dense<0.000000e+00> : vector<32xf32>
    %195 = vector.multi_reduction <add>, %190, %cst_79 [1] : vector<32x128xf32> to vector<32xf32>
    %196 = vector.shape_cast %195 : vector<32xf32> to vector<32x1xf32>
    %cst_80 = arith.constant 1.280000e+02 : f32
    %197 = vector.broadcast %cst_80 : f32 to vector<32x1xf32>
    %198 = arith.divf %196, %197 : vector<32x1xf32>
    %199 = vector.broadcast %198 : vector<32x1xf32> to vector<32x128xf32>
    %200 = arith.subf %190, %199 : vector<32x128xf32>
    %201 = arith.mulf %200, %200 : vector<32x128xf32>
    %cst_81 = arith.constant dense<0.000000e+00> : vector<32xf32>
    %202 = vector.multi_reduction <add>, %201, %cst_81 [1] : vector<32x128xf32> to vector<32xf32>
    %203 = vector.shape_cast %202 : vector<32xf32> to vector<32x1xf32>
    %cst_82 = arith.constant 1.280000e+02 : f32
    %204 = vector.broadcast %cst_82 : f32 to vector<32x1xf32>
    %205 = arith.divf %203, %204 : vector<32x1xf32>
    %206 = vector.broadcast %198 : vector<32x1xf32> to vector<32x128xf32>
    %207 = arith.subf %190, %206 : vector<32x128xf32>
    %cst_83 = arith.constant 9.99999974E-6 : f32
    %208 = vector.broadcast %cst_83 : f32 to vector<32x1xf32>
    %209 = arith.addf %205, %208 : vector<32x1xf32>
    %210 = math.rsqrt %209 : vector<32x1xf32>
    %211 = vector.broadcast %210 : vector<32x1xf32> to vector<32x128xf32>
    %212 = arith.mulf %207, %211 : vector<32x128xf32>
    %213 = vector.broadcast %192 : vector<1x128xf32> to vector<32x128xf32>
    %214 = arith.mulf %212, %213 : vector<32x128xf32>
    %215 = vector.broadcast %194 : vector<1x128xf32> to vector<32x128xf32>
    %216 = arith.addf %214, %215 : vector<32x128xf32>
    %217 = arith.truncf %216 : vector<32x128xf32> to vector<32x128xbf16>
    %c1_84 = arith.constant 1 : index
    %c0_85 = arith.constant 0 : index
    %c0_86 = arith.constant 0 : index
    %218 = vector.load %arg5[%c1_84, %c0_85, %c0_86] : memref<2x128x384xbf16, #tpu.memory_space<vmem>>, vector<1x128x384xbf16>
    %219 = vector.shape_cast %218 : vector<1x128x384xbf16> to vector<128x384xbf16>
    %cst_87 = arith.constant dense<0.000000e+00> : vector<32x384xf32>
    %220 = tpu.matmul %217, %219, %cst_87 {dimension_numbers = #tpu.dot_dimension_numbers<[1], [0], [0], [1], [0, 0, 1, 1], [], []>} : vector<32x128xbf16>, vector<128x384xbf16>, vector<32x384xf32> -> vector<32x384xf32>
    %c1_88 = arith.constant 1 : index
    %c0_89 = arith.constant 0 : index
    %c0_90 = arith.constant 0 : index
    %221 = vector.load %arg6[%c1_88, %c0_89, %c0_90] : memref<2x1x384xf32, #tpu.memory_space<vmem>>, vector<1x1x384xf32>
    %222 = vector.shape_cast %221 : vector<1x1x384xf32> to vector<1x384xf32>
    %223 = vector.broadcast %222 : vector<1x384xf32> to vector<32x384xf32>
    %224 = arith.addf %220, %223 : vector<32x384xf32>
    %225 = vector.extract_strided_slice %224 {offsets = [0, 0], sizes = [32, 128], strides = [1, 1]} : vector<32x384xf32> to vector<32x128xf32>
    %226 = vector.broadcast %3 : f32 to vector<32x128xf32>
    %227 = arith.mulf %225, %226 : vector<32x128xf32>
    %228 = vector.extract_strided_slice %224 {offsets = [0, 128], sizes = [32, 128], strides = [1, 1]} : vector<32x384xf32> to vector<32x128xf32>
    %229 = vector.extract_strided_slice %224 {offsets = [0, 256], sizes = [32, 128], strides = [1, 1]} : vector<32x384xf32> to vector<32x128xf32>
    %230 = vector.extract_strided_slice %227 {offsets = [0, 0], sizes = [32, 32], strides = [1, 1]} : vector<32x128xf32> to vector<32x32xf32>
    %231 = vector.extract_strided_slice %227 {offsets = [0, 32], sizes = [32, 32], strides = [1, 1]} : vector<32x128xf32> to vector<32x32xf32>
    %232 = vector.extract_strided_slice %227 {offsets = [0, 64], sizes = [32, 32], strides = [1, 1]} : vector<32x128xf32> to vector<32x32xf32>
    %233 = vector.extract_strided_slice %227 {offsets = [0, 96], sizes = [32, 32], strides = [1, 1]} : vector<32x128xf32> to vector<32x32xf32>
    %234 = vector.shape_cast %230 : vector<32x32xf32> to vector<1x32x32xf32>
    %235 = vector.shape_cast %231 : vector<32x32xf32> to vector<1x32x32xf32>
    %236 = vector.shape_cast %232 : vector<32x32xf32> to vector<1x32x32xf32>
    %237 = vector.shape_cast %233 : vector<32x32xf32> to vector<1x32x32xf32>
    %238 = tpu.concatenate %234, %235, %236, %237 in 0 : vector<1x32x32xf32>, vector<1x32x32xf32>, vector<1x32x32xf32>, vector<1x32x32xf32> -> vector<4x32x32xf32>
    %239 = vector.extract_strided_slice %228 {offsets = [0, 0], sizes = [32, 32], strides = [1, 1]} : vector<32x128xf32> to vector<32x32xf32>
    %240 = vector.extract_strided_slice %228 {offsets = [0, 32], sizes = [32, 32], strides = [1, 1]} : vector<32x128xf32> to vector<32x32xf32>
    %241 = vector.extract_strided_slice %228 {offsets = [0, 64], sizes = [32, 32], strides = [1, 1]} : vector<32x128xf32> to vector<32x32xf32>
    %242 = vector.extract_strided_slice %228 {offsets = [0, 96], sizes = [32, 32], strides = [1, 1]} : vector<32x128xf32> to vector<32x32xf32>
    %243 = vector.shape_cast %239 : vector<32x32xf32> to vector<1x32x32xf32>
    %244 = vector.shape_cast %240 : vector<32x32xf32> to vector<1x32x32xf32>
    %245 = vector.shape_cast %241 : vector<32x32xf32> to vector<1x32x32xf32>
    %246 = vector.shape_cast %242 : vector<32x32xf32> to vector<1x32x32xf32>
    %247 = tpu.concatenate %243, %244, %245, %246 in 0 : vector<1x32x32xf32>, vector<1x32x32xf32>, vector<1x32x32xf32>, vector<1x32x32xf32> -> vector<4x32x32xf32>
    %248 = vector.extract_strided_slice %229 {offsets = [0, 0], sizes = [32, 32], strides = [1, 1]} : vector<32x128xf32> to vector<32x32xf32>
    %249 = vector.extract_strided_slice %229 {offsets = [0, 32], sizes = [32, 32], strides = [1, 1]} : vector<32x128xf32> to vector<32x32xf32>
    %250 = vector.extract_strided_slice %229 {offsets = [0, 64], sizes = [32, 32], strides = [1, 1]} : vector<32x128xf32> to vector<32x32xf32>
    %251 = vector.extract_strided_slice %229 {offsets = [0, 96], sizes = [32, 32], strides = [1, 1]} : vector<32x128xf32> to vector<32x32xf32>
    %252 = vector.shape_cast %248 : vector<32x32xf32> to vector<1x32x32xf32>
    %253 = vector.shape_cast %249 : vector<32x32xf32> to vector<1x32x32xf32>
    %254 = vector.shape_cast %250 : vector<32x32xf32> to vector<1x32x32xf32>
    %255 = vector.shape_cast %251 : vector<32x32xf32> to vector<1x32x32xf32>
    %256 = tpu.concatenate %252, %253, %254, %255 in 0 : vector<1x32x32xf32>, vector<1x32x32xf32>, vector<1x32x32xf32>, vector<1x32x32xf32> -> vector<4x32x32xf32>
    %257 = arith.truncf %238 : vector<4x32x32xf32> to vector<4x32x32xbf16>
    %258 = arith.truncf %247 : vector<4x32x32xf32> to vector<4x32x32xbf16>
    "tpu.trace_start"() <{level = 10 : i32, message = "hqd,hkd->hqk"}> : () -> ()
    %cst_91 = arith.constant dense<0.000000e+00> : vector<4x32x32xf32>
    %259 = tpu.matmul %257, %258, %cst_91 {dimension_numbers = #tpu.dot_dimension_numbers<[2], [2], [1], [1], [0, 0, 0, 1, 1, 1], [0], [0]>} : vector<4x32x32xbf16>, vector<4x32x32xbf16>, vector<4x32x32xf32> -> vector<4x32x32xf32>
    "tpu.trace_stop"() : () -> ()
    %260 = vector.shape_cast %4 : vector<32x32xf32> to vector<1x32x32xf32>
    %261 = vector.broadcast %260 : vector<1x32x32xf32> to vector<4x32x32xf32>
    %262 = arith.addf %259, %261 : vector<4x32x32xf32>
    %cst_92 = arith.constant dense<0xFF800000> : vector<4x32xf32>
    %263 = vector.multi_reduction <maximumf>, %262, %cst_92 [2] : vector<4x32x32xf32> to vector<4x32xf32>
    %264 = vector.shape_cast %263 : vector<4x32xf32> to vector<4x32x1xf32>
    %265 = vector.broadcast %264 : vector<4x32x1xf32> to vector<4x32x32xf32>
    %266 = arith.subf %262, %265 : vector<4x32x32xf32>
    %267 = math.exp %266 : vector<4x32x32xf32>
    %cst_93 = arith.constant dense<0.000000e+00> : vector<4x32xf32>
    %268 = vector.multi_reduction <add>, %267, %cst_93 [2] : vector<4x32x32xf32> to vector<4x32xf32>
    %269 = vector.shape_cast %268 : vector<4x32xf32> to vector<4x32x1xf32>
    %270 = tpu.reciprocal %269 {approx = true} : vector<4x32x1xf32> -> vector<4x32x1xf32>
    %271 = vector.broadcast %270 : vector<4x32x1xf32> to vector<4x32x32xf32>
    %272 = arith.mulf %267, %271 : vector<4x32x32xf32>
    %273 = arith.truncf %272 : vector<4x32x32xf32> to vector<4x32x32xbf16>
    %274 = arith.truncf %256 : vector<4x32x32xf32> to vector<4x32x32xbf16>
    "tpu.trace_start"() <{level = 10 : i32, message = "hqk,hkd->hqd"}> : () -> ()
    %cst_94 = arith.constant dense<0.000000e+00> : vector<4x32x32xf32>
    %275 = tpu.matmul %273, %274, %cst_94 {dimension_numbers = #tpu.dot_dimension_numbers<[2], [1], [1], [2], [0, 0, 0, 1, 1, 2], [0], [0]>} : vector<4x32x32xbf16>, vector<4x32x32xbf16>, vector<4x32x32xf32> -> vector<4x32x32xf32>
    "tpu.trace_stop"() : () -> ()
    %276 = vector.extract_strided_slice %275 {offsets = [0, 0, 0], sizes = [1, 32, 32], strides = [1, 1, 1]} : vector<4x32x32xf32> to vector<1x32x32xf32>
    %277 = vector.shape_cast %276 : vector<1x32x32xf32> to vector<32x32xf32>
    %278 = vector.extract_strided_slice %275 {offsets = [1, 0, 0], sizes = [1, 32, 32], strides = [1, 1, 1]} : vector<4x32x32xf32> to vector<1x32x32xf32>
    %279 = vector.shape_cast %278 : vector<1x32x32xf32> to vector<32x32xf32>
    %280 = vector.extract_strided_slice %275 {offsets = [2, 0, 0], sizes = [1, 32, 32], strides = [1, 1, 1]} : vector<4x32x32xf32> to vector<1x32x32xf32>
    %281 = vector.shape_cast %280 : vector<1x32x32xf32> to vector<32x32xf32>
    %282 = vector.extract_strided_slice %275 {offsets = [3, 0, 0], sizes = [1, 32, 32], strides = [1, 1, 1]} : vector<4x32x32xf32> to vector<1x32x32xf32>
    %283 = vector.shape_cast %282 : vector<1x32x32xf32> to vector<32x32xf32>
    %284 = tpu.concatenate %277, %279, %281, %283 in 1 : vector<32x32xf32>, vector<32x32xf32>, vector<32x32xf32>, vector<32x32xf32> -> vector<32x128xf32>
    %285 = arith.truncf %284 : vector<32x128xf32> to vector<32x128xbf16>
    %c1_95 = arith.constant 1 : index
    %c0_96 = arith.constant 0 : index
    %c0_97 = arith.constant 0 : index
    %286 = vector.load %arg7[%c1_95, %c0_96, %c0_97] : memref<2x128x128xbf16, #tpu.memory_space<vmem>>, vector<1x128x128xbf16>
    %287 = vector.shape_cast %286 : vector<1x128x128xbf16> to vector<128x128xbf16>
    %cst_98 = arith.constant dense<0.000000e+00> : vector<32x128xf32>
    %288 = tpu.matmul %285, %287, %cst_98 {dimension_numbers = #tpu.dot_dimension_numbers<[1], [0], [0], [1], [0, 0, 1, 1], [], []>} : vector<32x128xbf16>, vector<128x128xbf16>, vector<32x128xf32> -> vector<32x128xf32>
    %c1_99 = arith.constant 1 : index
    %c0_100 = arith.constant 0 : index
    %c0_101 = arith.constant 0 : index
    %289 = vector.load %arg8[%c1_99, %c0_100, %c0_101] : memref<2x1x128xf32, #tpu.memory_space<vmem>>, vector<1x1x128xf32>
    %290 = vector.shape_cast %289 : vector<1x1x128xf32> to vector<1x128xf32>
    %291 = vector.broadcast %290 : vector<1x128xf32> to vector<32x128xf32>
    %292 = arith.addf %288, %291 : vector<32x128xf32>
    %293 = arith.addf %190, %292 : vector<32x128xf32>
    %c1_102 = arith.constant 1 : index
    %c0_103 = arith.constant 0 : index
    %c0_104 = arith.constant 0 : index
    %294 = vector.load %arg9[%c1_102, %c0_103, %c0_104] : memref<2x1x128xf32, #tpu.memory_space<vmem>>, vector<1x1x128xf32>
    %295 = vector.shape_cast %294 : vector<1x1x128xf32> to vector<1x128xf32>
    %c1_105 = arith.constant 1 : index
    %c0_106 = arith.constant 0 : index
    %c0_107 = arith.constant 0 : index
    %296 = vector.load %arg10[%c1_105, %c0_106, %c0_107] : memref<2x1x128xf32, #tpu.memory_space<vmem>>, vector<1x1x128xf32>
    %297 = vector.shape_cast %296 : vector<1x1x128xf32> to vector<1x128xf32>
    %cst_108 = arith.constant dense<0.000000e+00> : vector<32xf32>
    %298 = vector.multi_reduction <add>, %293, %cst_108 [1] : vector<32x128xf32> to vector<32xf32>
    %299 = vector.shape_cast %298 : vector<32xf32> to vector<32x1xf32>
    %cst_109 = arith.constant 1.280000e+02 : f32
    %300 = vector.broadcast %cst_109 : f32 to vector<32x1xf32>
    %301 = arith.divf %299, %300 : vector<32x1xf32>
    %302 = vector.broadcast %301 : vector<32x1xf32> to vector<32x128xf32>
    %303 = arith.subf %293, %302 : vector<32x128xf32>
    %304 = arith.mulf %303, %303 : vector<32x128xf32>
    %cst_110 = arith.constant dense<0.000000e+00> : vector<32xf32>
    %305 = vector.multi_reduction <add>, %304, %cst_110 [1] : vector<32x128xf32> to vector<32xf32>
    %306 = vector.shape_cast %305 : vector<32xf32> to vector<32x1xf32>
    %cst_111 = arith.constant 1.280000e+02 : f32
    %307 = vector.broadcast %cst_111 : f32 to vector<32x1xf32>
    %308 = arith.divf %306, %307 : vector<32x1xf32>
    %309 = vector.broadcast %301 : vector<32x1xf32> to vector<32x128xf32>
    %310 = arith.subf %293, %309 : vector<32x128xf32>
    %cst_112 = arith.constant 9.99999974E-6 : f32
    %311 = vector.broadcast %cst_112 : f32 to vector<32x1xf32>
    %312 = arith.addf %308, %311 : vector<32x1xf32>
    %313 = math.rsqrt %312 : vector<32x1xf32>
    %314 = vector.broadcast %313 : vector<32x1xf32> to vector<32x128xf32>
    %315 = arith.mulf %310, %314 : vector<32x128xf32>
    %316 = vector.broadcast %295 : vector<1x128xf32> to vector<32x128xf32>
    %317 = arith.mulf %315, %316 : vector<32x128xf32>
    %318 = vector.broadcast %297 : vector<1x128xf32> to vector<32x128xf32>
    %319 = arith.addf %317, %318 : vector<32x128xf32>
    %320 = arith.truncf %319 : vector<32x128xf32> to vector<32x128xbf16>
    %c1_113 = arith.constant 1 : index
    %c0_114 = arith.constant 0 : index
    %c0_115 = arith.constant 0 : index
    %321 = vector.load %arg11[%c1_113, %c0_114, %c0_115] : memref<2x128x512xbf16, #tpu.memory_space<vmem>>, vector<1x128x512xbf16>
    %322 = vector.shape_cast %321 : vector<1x128x512xbf16> to vector<128x512xbf16>
    %cst_116 = arith.constant dense<0.000000e+00> : vector<32x512xf32>
    %323 = tpu.matmul %320, %322, %cst_116 {dimension_numbers = #tpu.dot_dimension_numbers<[1], [0], [0], [1], [0, 0, 1, 1], [], []>} : vector<32x128xbf16>, vector<128x512xbf16>, vector<32x512xf32> -> vector<32x512xf32>
    %c1_117 = arith.constant 1 : index
    %c0_118 = arith.constant 0 : index
    %c0_119 = arith.constant 0 : index
    %324 = vector.load %arg12[%c1_117, %c0_118, %c0_119] : memref<2x1x512xf32, #tpu.memory_space<vmem>>, vector<1x1x512xf32>
    %325 = vector.shape_cast %324 : vector<1x1x512xf32> to vector<1x512xf32>
    %326 = vector.broadcast %325 : vector<1x512xf32> to vector<32x512xf32>
    %327 = arith.addf %323, %326 : vector<32x512xf32>
    %cst_120 = arith.constant 5.000000e-01 : f32
    %328 = vector.broadcast %cst_120 : f32 to vector<32x512xf32>
    %329 = arith.mulf %328, %327 : vector<32x512xf32>
    %cst_121 = arith.constant 0.707106769 : f32
    %330 = vector.broadcast %cst_121 : f32 to vector<32x512xf32>
    %331 = arith.mulf %327, %330 : vector<32x512xf32>
    %332 = math.absf %331 : vector<32x512xf32>
    %cst_122 = arith.constant 0.327591091 : f32
    %333 = vector.broadcast %cst_122 : f32 to vector<32x512xf32>
    %334 = arith.mulf %333, %332 : vector<32x512xf32>
    %cst_123 = arith.constant 1.000000e+00 : f32
    %335 = vector.broadcast %cst_123 : f32 to vector<32x512xf32>
    %336 = arith.addf %335, %334 : vector<32x512xf32>
    %cst_124 = arith.constant 1.000000e+00 : f32
    %337 = vector.broadcast %cst_124 : f32 to vector<32x512xf32>
    %338 = arith.divf %337, %336 : vector<32x512xf32>
    %cst_125 = arith.constant 1.06140542 : f32
    %339 = vector.broadcast %cst_125 : f32 to vector<32x512xf32>
    %340 = arith.mulf %339, %338 : vector<32x512xf32>
    %cst_126 = arith.constant -1.45315206 : f32
    %341 = vector.broadcast %cst_126 : f32 to vector<32x512xf32>
    %342 = arith.addf %340, %341 : vector<32x512xf32>
    %343 = arith.mulf %342, %338 : vector<32x512xf32>
    %cst_127 = arith.constant 1.42141378 : f32
    %344 = vector.broadcast %cst_127 : f32 to vector<32x512xf32>
    %345 = arith.addf %343, %344 : vector<32x512xf32>
    %346 = arith.mulf %345, %338 : vector<32x512xf32>
    %cst_128 = arith.constant -0.284496725 : f32
    %347 = vector.broadcast %cst_128 : f32 to vector<32x512xf32>
    %348 = arith.addf %346, %347 : vector<32x512xf32>
    %349 = arith.mulf %348, %338 : vector<32x512xf32>
    %cst_129 = arith.constant 0.254829586 : f32
    %350 = vector.broadcast %cst_129 : f32 to vector<32x512xf32>
    %351 = arith.addf %349, %350 : vector<32x512xf32>
    %352 = arith.mulf %351, %338 : vector<32x512xf32>
    %cst_130 = arith.constant 0.000000e+00 : f32
    %353 = vector.broadcast %cst_130 : f32 to vector<32x512xf32>
    %354 = arith.subf %353, %332 : vector<32x512xf32>
    %355 = arith.mulf %354, %332 : vector<32x512xf32>
    %356 = math.exp %355 : vector<32x512xf32>
    %357 = arith.mulf %352, %356 : vector<32x512xf32>
    %cst_131 = arith.constant 1.000000e+00 : f32
    %358 = vector.broadcast %cst_131 : f32 to vector<32x512xf32>
    %359 = arith.subf %358, %357 : vector<32x512xf32>
    %cst_132 = arith.constant 0.000000e+00 : f32
    %360 = vector.broadcast %cst_132 : f32 to vector<32x512xf32>
    %361 = arith.cmpf oge, %331, %360 : vector<32x512xf32>
    %cst_133 = arith.constant 0.000000e+00 : f32
    %362 = vector.broadcast %cst_133 : f32 to vector<32x512xf32>
    %363 = arith.subf %362, %359 : vector<32x512xf32>
    %364 = arith.select %361, %359, %363 : vector<32x512xi1>, vector<32x512xf32>
    %cst_134 = arith.constant 1.000000e+00 : f32
    %365 = vector.broadcast %cst_134 : f32 to vector<32x512xf32>
    %366 = arith.addf %365, %364 : vector<32x512xf32>
    %367 = arith.mulf %329, %366 : vector<32x512xf32>
    %368 = arith.truncf %367 : vector<32x512xf32> to vector<32x512xbf16>
    %c1_135 = arith.constant 1 : index
    %c0_136 = arith.constant 0 : index
    %c0_137 = arith.constant 0 : index
    %369 = vector.load %arg13[%c1_135, %c0_136, %c0_137] : memref<2x512x128xbf16, #tpu.memory_space<vmem>>, vector<1x512x128xbf16>
    %370 = vector.shape_cast %369 : vector<1x512x128xbf16> to vector<512x128xbf16>
    %cst_138 = arith.constant dense<0.000000e+00> : vector<32x128xf32>
    %371 = tpu.matmul %368, %370, %cst_138 {dimension_numbers = #tpu.dot_dimension_numbers<[1], [0], [0], [1], [0, 0, 1, 1], [], []>} : vector<32x512xbf16>, vector<512x128xbf16>, vector<32x128xf32> -> vector<32x128xf32>
    %c1_139 = arith.constant 1 : index
    %c0_140 = arith.constant 0 : index
    %c0_141 = arith.constant 0 : index
    %372 = vector.load %arg14[%c1_139, %c0_140, %c0_141] : memref<2x1x128xf32, #tpu.memory_space<vmem>>, vector<1x1x128xf32>
    %373 = vector.shape_cast %372 : vector<1x1x128xf32> to vector<1x128xf32>
    %374 = vector.broadcast %373 : vector<1x128xf32> to vector<32x128xf32>
    %375 = arith.addf %371, %374 : vector<32x128xf32>
    %376 = arith.addf %293, %375 : vector<32x128xf32>
    %c0_142 = arith.constant 0 : index
    %c0_143 = arith.constant 0 : index
    %377 = vector.load %arg15[%c0_142, %c0_143] : memref<1x128xf32, #tpu.memory_space<vmem>>, vector<1x128xf32>
    %c0_144 = arith.constant 0 : index
    %c0_145 = arith.constant 0 : index
    %378 = vector.load %arg16[%c0_144, %c0_145] : memref<1x128xf32, #tpu.memory_space<vmem>>, vector<1x128xf32>
    %cst_146 = arith.constant dense<0.000000e+00> : vector<32xf32>
    %379 = vector.multi_reduction <add>, %376, %cst_146 [1] : vector<32x128xf32> to vector<32xf32>
    %380 = vector.shape_cast %379 : vector<32xf32> to vector<32x1xf32>
    %cst_147 = arith.constant 1.280000e+02 : f32
    %381 = vector.broadcast %cst_147 : f32 to vector<32x1xf32>
    %382 = arith.divf %380, %381 : vector<32x1xf32>
    %383 = vector.broadcast %382 : vector<32x1xf32> to vector<32x128xf32>
    %384 = arith.subf %376, %383 : vector<32x128xf32>
    %385 = arith.mulf %384, %384 : vector<32x128xf32>
    %cst_148 = arith.constant dense<0.000000e+00> : vector<32xf32>
    %386 = vector.multi_reduction <add>, %385, %cst_148 [1] : vector<32x128xf32> to vector<32xf32>
    %387 = vector.shape_cast %386 : vector<32xf32> to vector<32x1xf32>
    %cst_149 = arith.constant 1.280000e+02 : f32
    %388 = vector.broadcast %cst_149 : f32 to vector<32x1xf32>
    %389 = arith.divf %387, %388 : vector<32x1xf32>
    %390 = vector.broadcast %382 : vector<32x1xf32> to vector<32x128xf32>
    %391 = arith.subf %376, %390 : vector<32x128xf32>
    %cst_150 = arith.constant 9.99999974E-6 : f32
    %392 = vector.broadcast %cst_150 : f32 to vector<32x1xf32>
    %393 = arith.addf %389, %392 : vector<32x1xf32>
    %394 = math.rsqrt %393 : vector<32x1xf32>
    %395 = vector.broadcast %394 : vector<32x1xf32> to vector<32x128xf32>
    %396 = arith.mulf %391, %395 : vector<32x128xf32>
    %397 = vector.broadcast %377 : vector<1x128xf32> to vector<32x128xf32>
    %398 = arith.mulf %396, %397 : vector<32x128xf32>
    %399 = vector.broadcast %378 : vector<1x128xf32> to vector<32x128xf32>
    %400 = arith.addf %398, %399 : vector<32x128xf32>
    %401 = arith.truncf %400 : vector<32x128xf32> to vector<32x128xbf16>
    %c0_151 = arith.constant 0 : index
    %c0_152 = arith.constant 0 : index
    %402 = vector.load %arg17[%c0_151, %c0_152] : memref<128x256xbf16, #tpu.memory_space<vmem>>, vector<128x256xbf16>
    %cst_153 = arith.constant dense<0.000000e+00> : vector<32x256xf32>
    %403 = tpu.matmul %401, %402, %cst_153 {dimension_numbers = #tpu.dot_dimension_numbers<[1], [0], [0], [1], [0, 0, 1, 1], [], []>} : vector<32x128xbf16>, vector<128x256xbf16>, vector<32x256xf32> -> vector<32x256xf32>
    %c0_154 = arith.constant 0 : index
    %c0_155 = arith.constant 0 : index
    %c0_156 = arith.constant 0 : index
    %404 = vector.load %arg18[%c0_154, %c0_155, %c0_156] : memref<1x32x256xf32, #tpu.memory_space<vmem>>, vector<1x32x256xf32>
    %405 = vector.shape_cast %404 : vector<1x32x256xf32> to vector<32x256xf32>
    %406 = vector.shape_cast %403 : vector<32x256xf32> to vector<1x32x256xf32>
    tpu.vector_store %arg18[%c0_154, %c0_155, %c0_156], %406 {strides = array<i32>} : memref<1x32x256xf32, #tpu.memory_space<vmem>>, vector<1x32x256xf32>,
    return
  }
  func.func @transform_0(%arg0: i32) -> (i32, i32, i32) {
    %c0_i32 = arith.constant 0 : i32
    %c0_i32_0 = arith.constant 0 : i32
    %c0_i32_1 = arith.constant 0 : i32
    return %arg0, %c0_i32, %c0_i32_0 : i32, i32, i32
  }
  func.func @transform_1(%arg0: i32) -> (i32, i32) {
    %c0_i32 = arith.constant 0 : i32
    %c0_i32_0 = arith.constant 0 : i32
    %c0_i32_1 = arith.constant 0 : i32
    return %c0_i32, %c0_i32_0 : i32, i32
  }
  func.func @transform_2(%arg0: i32) -> (i32, i32, i32) {
    %c0_i32 = arith.constant 0 : i32
    %c0_i32_0 = arith.constant 0 : i32
    %c0_i32_1 = arith.constant 0 : i32
    %c0_i32_2 = arith.constant 0 : i32
    return %c0_i32, %c0_i32_0, %c0_i32_1 : i32, i32, i32
  }
  func.func @transform_3(%arg0: i32) -> (i32, i32, i32) {
    %c0_i32 = arith.constant 0 : i32
    %c0_i32_0 = arith.constant 0 : i32
    %c0_i32_1 = arith.constant 0 : i32
    %c0_i32_2 = arith.constant 0 : i32
    return %c0_i32, %c0_i32_0, %c0_i32_1 : i32, i32, i32
  }
  func.func @transform_4(%arg0: i32) -> (i32, i32, i32) {
    %c0_i32 = arith.constant 0 : i32
    %c0_i32_0 = arith.constant 0 : i32
    %c0_i32_1 = arith.constant 0 : i32
    %c0_i32_2 = arith.constant 0 : i32
    return %c0_i32, %c0_i32_0, %c0_i32_1 : i32, i32, i32
  }
  func.func @transform_5(%arg0: i32) -> (i32, i32, i32) {
    %c0_i32 = arith.constant 0 : i32
    %c0_i32_0 = arith.constant 0 : i32
    %c0_i32_1 = arith.constant 0 : i32
    %c0_i32_2 = arith.constant 0 : i32
    return %c0_i32, %c0_i32_0, %c0_i32_1 : i32, i32, i32
  }
  func.func @transform_6(%arg0: i32) -> (i32, i32, i32) {
    %c0_i32 = arith.constant 0 : i32
    %c0_i32_0 = arith.constant 0 : i32
    %c0_i32_1 = arith.constant 0 : i32
    %c0_i32_2 = arith.constant 0 : i32
    return %c0_i32, %c0_i32_0, %c0_i32_1 : i32, i32, i32
  }
  func.func @transform_7(%arg0: i32) -> (i32, i32, i32) {
    %c0_i32 = arith.constant 0 : i32
    %c0_i32_0 = arith.constant 0 : i32
    %c0_i32_1 = arith.constant 0 : i32
    %c0_i32_2 = arith.constant 0 : i32
    return %c0_i32, %c0_i32_0, %c0_i32_1 : i32, i32, i32
  }
  func.func @transform_8(%arg0: i32) -> (i32, i32, i32) {
    %c0_i32 = arith.constant 0 : i32
    %c0_i32_0 = arith.constant 0 : i32
    %c0_i32_1 = arith.constant 0 : i32
    %c0_i32_2 = arith.constant 0 : i32
    return %c0_i32, %c0_i32_0, %c0_i32_1 : i32, i32, i32
  }
  func.func @transform_9(%arg0: i32) -> (i32, i32, i32) {
    %c0_i32 = arith.constant 0 : i32
    %c0_i32_0 = arith.constant 0 : i32
    %c0_i32_1 = arith.constant 0 : i32
    %c0_i32_2 = arith.constant 0 : i32
    return %c0_i32, %c0_i32_0, %c0_i32_1 : i32, i32, i32
  }
  func.func @transform_10(%arg0: i32) -> (i32, i32, i32) {
    %c0_i32 = arith.constant 0 : i32
    %c0_i32_0 = arith.constant 0 : i32
    %c0_i32_1 = arith.constant 0 : i32
    %c0_i32_2 = arith.constant 0 : i32
    return %c0_i32, %c0_i32_0, %c0_i32_1 : i32, i32, i32
  }
  func.func @transform_11(%arg0: i32) -> (i32, i32, i32) {
    %c0_i32 = arith.constant 0 : i32
    %c0_i32_0 = arith.constant 0 : i32
    %c0_i32_1 = arith.constant 0 : i32
    %c0_i32_2 = arith.constant 0 : i32
    return %c0_i32, %c0_i32_0, %c0_i32_1 : i32, i32, i32
  }
  func.func @transform_12(%arg0: i32) -> (i32, i32, i32) {
    %c0_i32 = arith.constant 0 : i32
    %c0_i32_0 = arith.constant 0 : i32
    %c0_i32_1 = arith.constant 0 : i32
    %c0_i32_2 = arith.constant 0 : i32
    return %c0_i32, %c0_i32_0, %c0_i32_1 : i32, i32, i32
  }
  func.func @transform_13(%arg0: i32) -> (i32, i32, i32) {
    %c0_i32 = arith.constant 0 : i32
    %c0_i32_0 = arith.constant 0 : i32
    %c0_i32_1 = arith.constant 0 : i32
    %c0_i32_2 = arith.constant 0 : i32
    return %c0_i32, %c0_i32_0, %c0_i32_1 : i32, i32, i32
  }
  func.func @transform_14(%arg0: i32) -> (i32, i32) {
    %c0_i32 = arith.constant 0 : i32
    %c0_i32_0 = arith.constant 0 : i32
    %c0_i32_1 = arith.constant 0 : i32
    return %c0_i32, %c0_i32_0 : i32, i32
  }
  func.func @transform_15(%arg0: i32) -> (i32, i32) {
    %c0_i32 = arith.constant 0 : i32
    %c0_i32_0 = arith.constant 0 : i32
    %c0_i32_1 = arith.constant 0 : i32
    return %c0_i32, %c0_i32_0 : i32, i32
  }
  func.func @transform_16(%arg0: i32) -> (i32, i32) {
    %c0_i32 = arith.constant 0 : i32
    %c0_i32_0 = arith.constant 0 : i32
    %c0_i32_1 = arith.constant 0 : i32
    return %c0_i32, %c0_i32_0 : i32, i32
  }
  func.func @transform_17(%arg0: i32) -> (i32, i32, i32) {
    %c0_i32 = arith.constant 0 : i32
    %c0_i32_0 = arith.constant 0 : i32
    %c0_i32_1 = arith.constant 0 : i32
    return %arg0, %c0_i32, %c0_i32_0 : i32, i32, i32
  }
}

</mosaic_0001>

<bundles_post_ra>
// kernel: fontogen_forward.1
= control target key start
LH: loop header
LB: loop body
LE: loop exit
PB: predicated region body
PF: predicated region fallthrough
CT: control target
= control target key end

     0   :  { %s9599_s0 = inlined_call_operand.vmem [shape: f32[2,32,128], index: 0, kind: input, shape index: {}]   ;;  %s9600_s1 = inlined_call_operand.vmem [shape: f32[32,32], index: 1, kind: input, shape index: {}]   ;;  %s9601_s2 = inlined_call_operand.vmem [shape: f32[2,1,128], index: 2, kind: input, shape index: {}]   ;;  %s9602_s3 = inlined_call_operand.vmem [shape: f32[2,1,128], index: 3, kind: input, shape index: {}]   ;;  %s9603_s4 = inlined_call_operand.hbm [shape: bf16[2,128,384], index: 4, kind: input, shape index: {}]   ;;  %s9604_s5 = inlined_call_operand.vmem [shape: f32[2,1,384], index: 5, kind: input, shape index: {}]   ;;  %s9605_s6 = inlined_call_operand.vmem [shape: bf16[2,128,128], index: 6, kind: input, shape index: {}]   ;;  %s9606_s7 = inlined_call_operand.vmem [shape: f32[2,1,128], index: 7, kind: input, shape index: {}]   ;;  %s9607_s8 = inlined_call_operand.vmem [shape: f32[2,1,128], index: 8, kind: input, shape index: {}]   ;;  %s9608_s9 = inlined_call_operand.vmem [shape: f32[2,1,128], index: 9, kind: input, shape index: {}]   ;;  %s9609_s10 = inlined_call_operand.hbm [shape: bf16[2,128,512], index: 10, kind: input, shape index: {}]   ;;  %s9610_s11 = inlined_call_operand.vmem [shape: f32[2,1,512], index: 11, kind: input, shape index: {}]   ;;  %s9611_s12 = inlined_call_operand.hbm [shape: bf16[2,512,128], index: 12, kind: input, shape index: {}]   ;;  %s9612_s13 = inlined_call_operand.vmem [shape: f32[2,1,128], index: 13, kind: input, shape index: {}]   ;;  %s9613_s14 = inlined_call_operand.vmem [shape: f32[1,128], index: 14, kind: input, shape index: {}]   ;;  %s9614_s15 = inlined_call_operand.vmem [shape: f32[1,128], index: 15, kind: input, shape index: {}]   ;;  %s9615_s16 = inlined_call_operand.hbm [shape: bf16[128,256], index: 16, kind: input, shape index: {}]   ;;  %s9616_s17 = inlined_call_operand.vmem [shape: f32[2,32,256], index: 17, kind: output, shape index: {}]  }
   0x1   :  { %9644 = sst [smem:[#allocation23_spill]] %s9599_s0 }
   0x2   :  { %9645 = sst [smem:[#allocation24_spill]] %s9600_s1 }
   0x3   :  { %9646 = sst [smem:[#allocation25_spill]] %s9613_s14 }
   0x4   :  { %9647 = sst [smem:[#allocation26_spill]] %s9614_s15 }
   0x5   :  { %9648 = sst [smem:[#allocation27_spill]] %s9616_s17 }
   0x6   :  { %22 = vsyncpa [#allocation3], 0 }
   0x7   :  { %23 = vsyncpa [#allocation5], 0 }
   0x8   :  { %24 = vsyncpa [#allocation8], 0  ;;  %s7844_s24 = smov 0  }
   0x9 LB: > { %9649 = sst [smem:[#allocation12_spill]] %s7736_s24  ;;  %s7738_s25 = smov [#allocation4]   ;;  %s7736_s24 = sphi %s7844_s24, %s30_s24  }
   0xa   : > { %s472_s26 = sshll.u32 %s7738_s25, 4  ;;  %s7850_s27 = sadd.s32 4294967295, %s7736_s24   ;;  %s7855_s26 = int_to_ptr.vmem [resolvable:$true] %s472_s26 }
   0xb   : > { %p6000_p0 = scmp.ge.s32.totalorder %s7736_s24, 1  ;;  %p423_p1 = scmp.lt.s32.totalorder %s7736_s24, 3 }
   0xc   : > { %p9619_p2 = scmp.eq.s32.totalorder %s7850_s27, 0  ;;  %s7739_s29 = smov [#allocation2]  }
   0xd   : > { %p7857_p3 = pnand %p6000_p0, %p423_p1  ;;  %s444_s0 = sshll.u32 %s7739_s29, 4  ;;  %s7863_s0 = int_to_ptr.vmem [resolvable:$true] %s444_s0 }
   0xe   : > { %s7740_s18 = smov [#allocation6]   ;;  %s7606_s21 = scalar_lea.hbm %s9609_s10, 8192 }
   0xf   : > { %s9650_s28 = scalar_select %p7857_p3, 1, 0 }
  0x10   : > { %p6753_p4 = pneg %p7857_p3  ;;  %s7871_s19 = sshll.u32 %s7740_s18, 4  ;;  %s489_s19 = int_to_ptr.vmem [resolvable:$true] %s7871_s19 }
  0x11   : > { %p7607_p6 = scmp.ne.s32.totalorder %s9609_s10, %s7606_s21  ;;  %p7613_p10 = scmp.lt.u32.totalorder %s7606_s21, %s9609_s10 }
  0x12   : > { %p7867_p5 = pnand %p9619_p2, %p6753_p4 }
  0x14   : > { %p7881_p7 = pneg %p7867_p5 }
  0x16   : > { %p7609_p8 = pnand %p7881_p7, %p7607_p6 }
  0x18   : > { %p7610_p9 = pneg %p7609_p8 }
  0x1a   : > { %p7615_p11 = pnand %p7613_p10, %p7610_p9 }
  0x1c   : > { %7618 = shalt.err (!%p7615_p11)
}
  0x1d   : > { %s7619_s1 = scalar_lea.vmem %s7855_s26, 8192  ;;  %p7627_p1 = scmp.lt.s32.totalorder %s7855_s26, %s7855_s26 }
  0x1e   : > { %p7620_p12 = scmp.ne.s32.totalorder %s7855_s26, %s7619_s1  ;;  %p7628_p4 = scmp.lt.s32.totalorder %s7619_s1, %s7619_s1 }
  0x20   : > { %p7622_p13 = pnand %p7620_p12, %p7881_p7  ;;  %p7629_p6 = por %p7628_p4, %p7627_p1 }
  0x22   : > { %p7623_p0 = pneg %p7622_p13 }
  0x24   : > { %p7630_p8 = pnand %p7629_p6, %p7623_p0 }
  0x26   : > { %7633 = shalt.err (!%p7630_p8)
}
  0x27   : > { %s7741_s20 = smov 256   ;;  %s7742_s21 = smov 16  }
  0x28   : > { %6759 = dma.hbm_to_vmem [thread:$0]  (!%p7867_p5), %s9609_s10, 8192, %s7855_s26, [#allocation5], %s7741_s20, %s7741_s20, %s7742_s21  }
  0x29   : > { %s7634_s24 = scalar_lea.hbm %s9603_s4, 6144 }
  0x2a   : > { %p7635_p9 = scmp.ne.s32.totalorder %s9603_s4, %s7634_s24  ;;  %p7641_p12 = scmp.lt.u32.totalorder %s7634_s24, %s9603_s4 }
  0x2c   : > { %p7637_p10 = pnand %p7635_p9, %p7881_p7 }
  0x2e   : > { %p7638_p11 = pneg %p7637_p10 }
  0x30   : > { %p7643_p13 = pnand %p7641_p12, %p7638_p11 }
  0x32   : > { %7646 = shalt.err (!%p7643_p13)
}
  0x33   : > { %s7647_s26 = scalar_lea.vmem %s7863_s0, 6144  ;;  %p7655_p6 = scmp.lt.s32.totalorder %s7863_s0, %s7863_s0 }
  0x34   : > { %p7648_p0 = scmp.ne.s32.totalorder %s7863_s0, %s7647_s26  ;;  %p7656_p8 = scmp.lt.s32.totalorder %s7647_s26, %s7647_s26 }
  0x36   : > { %p7650_p1 = pnand %p7648_p0, %p7881_p7  ;;  %p7657_p9 = por %p7656_p8, %p7655_p6 }
  0x38   : > { %p7651_p4 = pneg %p7650_p1 }
  0x3a   : > { %p7658_p10 = pnand %p7657_p9, %p7651_p4 }
  0x3c   : > { %7661 = shalt.err (!%p7658_p10)
}
  0x3d   : > { %s7743_s15 = smov 192   ;;  %s7744_s14 = smov 12  }
  0x3e   : > { %6756 = dma.hbm_to_vmem [thread:$0]  (!%p7867_p5), %s9603_s4, 6144, %s7863_s0, [#allocation3], %s7743_s15, %s7743_s15, %s7744_s14  }
  0x3f   : > { %s7662_s22 = scalar_lea.hbm %s9611_s12, 8192 }
  0x40   : > { %p7663_p11 = scmp.ne.s32.totalorder %s9611_s12, %s7662_s22  ;;  %p7669_p0 = scmp.lt.u32.totalorder %s7662_s22, %s9611_s12 }
  0x42   : > { %p7665_p12 = pnand %p7663_p11, %p7881_p7 }
  0x44   : > { %p7666_p13 = pneg %p7665_p12 }
  0x46   : > { %p7671_p1 = pnand %p7669_p0, %p7666_p13 }
  0x48   : > { %7674 = shalt.err (!%p7671_p1)
}
  0x49   : > { %s7675_s26 = scalar_lea.vmem %s489_s19, 8192  ;;  %p7683_p9 = scmp.lt.s32.totalorder %s489_s19, %s489_s19 }
  0x4a   : > { %p7676_p4 = scmp.ne.s32.totalorder %s489_s19, %s7675_s26  ;;  %p7684_p10 = scmp.lt.s32.totalorder %s7675_s26, %s7675_s26 }
  0x4c   : > { %p7678_p6 = pnand %p7676_p4, %p7881_p7  ;;  %p7685_p2 = por %p7684_p10, %p7683_p9 }
  0x4e   : > { %p7679_p8 = pneg %p7678_p6 }
  0x50   : > { %p7686_p3 = pnand %p7685_p2, %p7679_p8 }
  0x52   : > { %7689 = shalt.err (!%p7686_p3)
}
  0x53   : > { %s7745_s0 = smov 64   ;;  %s7746_s15 = smov 4  }
  0x54   : > { %6762 = dma.hbm_to_vmem [thread:$0]  (!%p7867_p5), %s9611_s12, 8192, %s489_s19, [#allocation5], %s7745_s0, %s7745_s0, %s7746_s15  }
  0x55   : > { %s7747_s24 = smov [#allocation7]   ;;  %s7690_s23 = scalar_lea.hbm %s9615_s16, 2048 }
  0x56   : > { %s510_s20 = sshll.u32 %s7747_s24, 4  ;;  %p7691_p2 = scmp.ne.s32.totalorder %s9615_s16, %s7690_s23  ;;  %s511_s20 = int_to_ptr.vmem [resolvable:$true] %s510_s20 }
  0x57   : > { %p7697_p12 = scmp.lt.u32.totalorder %s7690_s23, %s9615_s16 }
  0x58   : > { %p7693_p3 = pnand %p7691_p2, %p7881_p7 }
  0x5a   : > { %p7694_p11 = pneg %p7693_p3 }
  0x5c   : > { %p7699_p13 = pnand %p7697_p12, %p7694_p11 }
  0x5e   : > { %7702 = shalt.err (!%p7699_p13)
}
  0x5f   : > { %s7703_s19 = scalar_lea.vmem %s511_s20, 2048  ;;  %p7711_p6 = scmp.lt.s32.totalorder %s511_s20, %s511_s20 }
  0x60   : > { %p7704_p0 = scmp.ne.s32.totalorder %s511_s20, %s7703_s19  ;;  %p7712_p8 = scmp.lt.s32.totalorder %s7703_s19, %s7703_s19 }
  0x62   : > { %p7706_p1 = pnand %p7704_p0, %p7881_p7  ;;  %p7713_p9 = por %p7712_p8, %p7711_p6 }
  0x64   : > { %p7707_p4 = pneg %p7706_p1 }
  0x66   : > { %p7714_p10 = pnand %p7713_p9, %p7707_p4 }
  0x68   : > { %7717 = shalt.err (!%p7714_p10)
}
  0x69   : > { %s7748_s0 = smov 128   ;;  %s7749_s15 = smov 8  }
  0x6a   : > { %6765 = dma.hbm_to_vmem [thread:$0]  (!%p7867_p5), %s9615_s16, 2048, %s511_s20, [#allocation8], %s7748_s0, %s7748_s0, %s7749_s15  }
  0x6b   : > { %p9653_p2 = scmp.ne.s32.totalorder %s9650_s28, 0 }
  0x6d   : > { %534 = sbr.rel (%p9653_p2) target bundleno = 6075 (0x17bb), region = 88 }
  0x74   : > { %p9654_p3 = scmp.eq.s32.totalorder %s7850_s27, 0 }
  0x76   : > { %7723 = dma.done.wait (%p9654_p3), [#allocation3], 6144   ;;  %p9655_p7 = pmov %p9654_p3 }
  0x77   : > { %p9656_p11 = pmov %p9654_p3 }
  0x78   : > { %7725 = vsyncadd (%p9655_p7), [#allocation3], 4294961152 }
  0x79   : > { %7727 = dma.done.wait (%p9656_p11), [#allocation5], 16384   ;;  %p9657_p12 = pmov %p9654_p3 }
  0x7a   : > { %p9658_p13 = pmov %p9654_p3 }
  0x7b   : > { %7729 = vsyncadd (%p9657_p12), [#allocation5], 4294950912 }
  0x7c   : > { %7731 = dma.done.wait (%p9658_p13), [#allocation8], 2048   ;;  %p9659_p5 = pmov %p9654_p3 }
  0x7d   : > { %p598_p0 = scmp.lt.s32.totalorder %s7850_s27, 1  ;;  %s9660_s24 = sld [smem:[#allocation23_spill]]  ;;  %v7038_v4 = vld [vmem:[#allocation2 + $0x4] ss:$12 sps:$4 sm:$0xff]   ;;  %v7040_v5 = vld [vmem:[#allocation2] ss:$12 sps:$4 sm:$0xff]  }
  0x7e   : > { %7733 = vsyncadd (%p9659_p5), [#allocation8], 4294965248  ;;  %v7041_v6 = vld [vmem:[#allocation2 + $0x1c] ss:$12 sps:$4 sm:$0xff]   ;;  %863 = vmatprep.subr.bf16.mxu0 %v7038_v4  ;;  %v7044_v24 = vld [vmem:[#allocation2 + $0x18] ss:$12 sps:$4 sm:$0xff]  }
  0x7f   : > { %s9702_s27 = smov (!%p598_p0, %s7850_s27), 1  ;;  %v7043_v7 = vld [vmem:[#allocation2 + $0x8] ss:$12 sps:$4 sm:$0xff]   ;;  %864 = vmatpush1.bf16.msra.mxu0 %v7040_v5  ;;  %v7047_v26 = vld [vmem:[#allocation2 + $0x20] ss:$12 sps:$4 sm:$0xff]   ;;  %v9622_v39 = vmov 0  }
  0x80   : > { %s6295_s28 = sshll.u32 %s9702_s27, 5  ;;  %6513 = vmatprep.subr.bf16.mxu1 %v7043_v7  ;;  %865 = vmatprep.subr.bf16.mxu0 %v7041_v6  ;;  %v7045_v25 = vld [vmem:[#allocation2 + $0x34] ss:$12 sps:$4 sm:$0xff]   ;;  %v7048_v27 = vld [vmem:[#allocation2 + $0x30] ss:$12 sps:$4 sm:$0xff]   ;;  %vm1105_vm0 = vcmask 261120  }
  0x81   : > { %6514 = vmatpush3.bf16.msra.mxu1 %v7043_v7  ;;  %v7049_v28 = vld [vmem:[#allocation2 + $0x4c] ss:$12 sps:$4 sm:$0xff]   ;;  %v7052_v30 = vld [vmem:[#allocation2 + $0x48] ss:$12 sps:$4 sm:$0xff]   ;;  %v7053_v31 = vld [vmem:[#allocation2 + $0x64] ss:$12 sps:$4 sm:$0xff]   ;;  %895 = vmatprep.mubr.bf16.mxu0 %v9622_v39 }
  0x82   : > { %6515 = vmatprep.subr.bf16.mxu1 %v7047_v26  ;;  %v7051_v29 = vld [vmem:[#allocation2 + $0x38] ss:$12 sps:$4 sm:$0xff]   ;;  %v7055_v32 = vld [vmem:[#allocation2 + $0x50] ss:$12 sps:$4 sm:$0xff]   ;;  %v7056_v33 = vld [vmem:[#allocation2 + $0x60] ss:$12 sps:$4 sm:$0xff]  }
  0x83   : > { %s7984_s20 = scalar_lea.vmem %s9660_s24, %s6295_s28  ;;  %866 = vmatpush1.bf16.msra.mxu0 %v7044_v24  ;;  %v7057_v34 = vld [vmem:[#allocation2 + $0x7c] ss:$12 sps:$4 sm:$0xff]   ;;  %v7060_v36 = vld [vmem:[#allocation2 + $0x78] ss:$12 sps:$4 sm:$0xff]   ;;  %v7061_v37 = vld [vmem:[#allocation2 + $0x94] ss:$12 sps:$4 sm:$0xff]  }
  0x84   : > { %v609_v0 = vld [vmem:[%s7984_s20] sm:$0xff]  ;;  %v611_v1 = vld [vmem:[%s7984_s20 + $0x10] sm:$0xff]  ;;  %v610_v2 = vld [vmem:[%s7984_s20 + $0x8] sm:$0xff]  ;;  %867 = vmatprep.subr.bf16.mxu0 %v7045_v25  ;;  %s7751_s26 = smov 96   ;;  %s7752_s19 = smov 32   ;;  %vm1814_vm1 = vcmask 523264  }
  0x85   : > { %619 = vadd.xlane.f32.xlu0 %v609_v0  ;;  %623 = vadd.xlane.f32.xlu1 %v611_v1  ;;  %v612_v3 = vld [vmem:[%s7984_s20 + $0x18] sm:$0xff]  ;;  %v7059_v35 = vld [vmem:[#allocation2 + $0x68] ss:$12 sps:$4 sm:$0xff]   ;;  %v7063_v38 = vld [vmem:[#allocation2 + $0x80] ss:$12 sps:$4 sm:$0xff]   ;;  %s7753_s0 = smov 64  }
  0x86   : > { %6516 = vmatpush3.bf16.msra.mxu1 %v7047_v26  ;;  %v7064_v40 = vld [vmem:[#allocation2 + $0x90] ss:$12 sps:$4 sm:$0xff]   ;;  %v7065_v41 = vld [vmem:[#allocation2 + $0xac] ss:$12 sps:$4 sm:$0xff]   ;;  %v7068_v43 = vld [vmem:[#allocation2 + $0xa8] ss:$12 sps:$4 sm:$0xff]  }
  0x87   : > { %868 = vmatpush1.bf16.msra.mxu0 %v7048_v27  ;;  %6517 = vmatprep.subr.bf16.mxu1 %v7051_v29  ;;  %v7067_v42 = vld [vmem:[#allocation2 + $0x98] ss:$12 sps:$4 sm:$0xff]   ;;  %v7069_v44 = vld [vmem:[#allocation2 + $0xb0] ss:$12 sps:$4 sm:$0xff]   ;;  %v6015_v59 = vld [vmem:[%s9601_s2] ss:$0 sm:$0xff] }
  0x88   : > { %869 = vmatprep.subr.bf16.mxu0 %v7049_v28  ;;  %s9665_s17 = sld [smem:[#allocation24_spill]]  ;;  %vm1819_vm2 = vcmask 785408   ;;  %s9697_s23 = sld [smem:[#allocation25_spill]] }
  0x89   : > { %621 = vadd.xlane.f32.xlu0 %v610_v2  ;;  %625 = vadd.xlane.f32.xlu1 %v612_v3  ;;  %s9698_s18 = sld [smem:[#allocation26_spill]]  ;;  %s9699_s14 = sld [smem:[#allocation27_spill]] }
  0x8a   : > { %6518 = vmatpush3.bf16.msra.mxu1 %v7051_v29 }
  0x8b   : > { %870 = vmatpush1.bf16.msra.mxu0 %v7052_v30  ;;  %6519 = vmatprep.subr.bf16.mxu1 %v7055_v32 }
  0x8c   : > { %871 = vmatprep.subr.bf16.mxu0 %v7053_v31 }
  0x8e   : > { %6520 = vmatpush3.bf16.msra.mxu1 %v7055_v32 }
  0x8f   : > { %872 = vmatpush1.bf16.msra.mxu0 %v7056_v33  ;;  %6521 = vmatprep.subr.bf16.mxu1 %v7059_v35 }
  0x90   : > { %873 = vmatprep.subr.bf16.mxu0 %v7057_v34 }
  0x92   : > { %6522 = vmatpush3.bf16.msra.mxu1 %v7059_v35 }
  0x93   : > { %874 = vmatpush1.bf16.msra.mxu0 %v7060_v36  ;;  %6523 = vmatprep.subr.bf16.mxu1 %v7063_v38 }
  0x94   : > { %875 = vmatprep.subr.bf16.mxu0 %v7061_v37 }
  0x96   : > { %6524 = vmatpush3.bf16.msra.mxu1 %v7063_v38 }
  0x97   : > { %876 = vmatpush1.bf16.msra.mxu0 %v7064_v40  ;;  %6525 = vmatprep.subr.bf16.mxu1 %v7067_v42 }
  0x98   : > { %877 = vmatprep.subr.bf16.mxu0 %v7065_v41 }
  0x9a   : > { %6526 = vmatpush3.bf16.msra.mxu1 %v7067_v42 }
  0x9b   : > { %878 = vmatpush1.bf16.msra.mxu0 %v7068_v43  ;;  %6527 = vmatprep.subr.bf16.mxu1 %v7069_v44 }
  0x9e   : > { %6528 = vmatpush3.bf16.msra.mxu1 %v7069_v44 }
 0x112   : > { %v620_v8 = vpop.xlane.xlu0 %619  ;;  %v624_v9 = vpop.xlane.xlu1 %623 }
 0x113   : > { %v628_v10 = vmul.f32 0.0078125, %v620_v8  ;;  %v630_v11 = vmul.f32 0.0078125, %v624_v9 }
 0x115   : > { %v7990_v12 = vsub.f32 %v609_v0, %v628_v10  ;;  %v7992_v13 = vsub.f32 %v611_v1, %v630_v11  ;;  %v6016_v0 = vld [vmem:[%s9602_s3] ss:$0 sm:$0xff] }
 0x116   : > { %v622_v14 = vpop.xlane.xlu0 %621  ;;  %v626_v15 = vpop.xlane.xlu1 %625 }
 0x117   : > { %v629_v16 = vmul.f32 0.0078125, %v622_v14  ;;  %v636_v17 = vmul.f32 %v7990_v12, %v7990_v12  ;;  %v631_v18 = vmul.f32 0.0078125, %v626_v15  ;;  %v638_v19 = vmul.f32 %v7992_v13, %v7992_v13 }
 0x118   : > { %v720_v14 = vlaneseq }
 0x119   : > { %640 = vadd.xlane.f32.xlu0 %v636_v17  ;;  %v7998_v20 = vsub.f32 %v610_v2, %v629_v16  ;;  %v8000_v21 = vsub.f32 %v612_v3, %v631_v18  ;;  %v718_v16 = vld [vmem:[%s9604_s5] sm:$0x7] }
 0x11b   : > { %v637_v22 = vmul.f32 %v7998_v20, %v7998_v20  ;;  %v639_v23 = vmul.f32 %v8000_v21, %v8000_v21 }
 0x11d   : > { %644 = vadd.xlane.f32.xlu0 %v638_v19  ;;  %642 = vadd.xlane.f32.xlu1 %v637_v22 }
 0x121   : > { %646 = vadd.xlane.f32.xlu1 %v639_v23 }
 0x1a6   : > { %v641_v45 = vpop.xlane.xlu0 %640 }
 0x1a7   : > { %v648_v46 = vmul.f32 0.0078125, %v641_v45 }
 0x1a9   : > { %v652_v47 = vadd.f32 1e-05, %v648_v46 }
 0x1aa   : > { %v643_v48 = vpop.xlane.xlu1 %642  ;;  %v645_v49 = vpop.xlane.xlu0 %644 }
 0x1ab   : > { %7302 = vrsqrt.f32 %v652_v47  ;;  %v649_v50 = vmul.f32 0.0078125, %v643_v48  ;;  %v650_v51 = vmul.f32 0.0078125, %v645_v49 }
 0x1ad   : > { %v653_v52 = vadd.f32 1e-05, %v649_v50  ;;  %v654_v53 = vadd.f32 1e-05, %v650_v51 }
 0x1ae   : > { %v647_v54 = vpop.xlane.xlu1 %646 }
 0x1af   : > { %7304 = vrsqrt.f32 %v653_v52  ;;  %v651_v55 = vmul.f32 0.0078125, %v647_v54 }
 0x1b0   : > { %7306 = vrsqrt.f32 %v654_v53 }
 0x1b1   : > { %v655_v56 = vadd.f32 1e-05, %v651_v55 }
 0x1b3   : > { %7308 = vrsqrt.f32 %v655_v56 }
 0x1b5   : > { %v7303_v57 = vpop.eup %7302 }
 0x1b6   : > { %v660_v58 = vmul.f32 %v7303_v57, %v7990_v12 }
 0x1b8   : > { %v670_v63 = vmul.f32 %v6015_v59, %v660_v58 }
 0x1b9   : > { %v7305_v60 = vpop.eup %7304 }
 0x1ba   : > { %v7307_v61 = vpop.eup %7306  ;;  %v661_v62 = vmul.f32 %v7305_v60, %v7998_v20  ;;  %v680_v4 = vadd.f32 %v6016_v0, %v670_v63 }
 0x1bb   : > { %v662_v1 = vmul.f32 %v7307_v61, %v7992_v13  ;;  %v8018_v13 = vshrl.u32 %v720_v14, 7 }
 0x1bc   : > { %v671_v2 = vmul.f32 %v6015_v59, %v661_v62 }
 0x1bd   : > { %v7309_v3 = vpop.eup %7308  ;;  %v672_v7 = vmul.f32 %v6015_v59, %v662_v1  ;;  %9661 = vst [vmem:[#allocation13_spill] sm:$0xff] %v8018_v13  ;;  %v8021_v15 = vsub.s32 0, %v8018_v13  ;;  %v8027_v17 = vsub.s32 1, %v8018_v13  ;;  %v8031_v19 = vsub.s32 2, %v8018_v13 }
 0x1be   : > { %v681_v5 = vadd.f32 %v6016_v0, %v671_v2  ;;  %v663_v6 = vmul.f32 %v7309_v3, %v8000_v21 }
 0x1bf   : > { %v682_v10 = vadd.f32 %v6016_v0, %v672_v7  ;;  %9662 = vst [vmem:[#allocation14_spill] sm:$0xff] %v8021_v15  ;;  %9663 = vst [vmem:[#allocation15_spill] sm:$0xff] %v8027_v17  ;;  %v723_v18 = vrot.slane %v718_v16, %v8021_v15  ;;  %v727_v21 = vrot.slane %v718_v16, %v8027_v17 }
 0x1c0   : > { %v684_v8 = vpack.c.bf16 %v681_v5, %v680_v4  ;;  %v673_v9 = vmul.f32 %v6015_v59, %v663_v6  ;;  %9664 = vst [vmem:[#allocation16_spill] sm:$0xff] %v8031_v19  ;;  %v731_v24 = vrot.slane %v718_v16, %v8031_v19 }
 0x1c2   : > { %896 = vmatmul.mubr.bf16.vlgmr.msra.gmra.mrb[0].mxu0 %v684_v8  ;;  %6529 = vmatprep.mubr.bf16.mxu1 %v684_v8  ;;  %v683_v11 = vadd.f32 %v6016_v0, %v673_v9 }
 0x1c3   : > { %905 = vmatprep.mubr.bf16.mxu0 %v9622_v39 }
 0x1c4   : > { %v685_v12 = vpack.c.bf16 %v683_v11, %v682_v10 }
 0x1c6   : > { %6530 = vmatmul.mubr.bf16.vlgmr.msra.gmra.mrb[0].mxu1 %v685_v12 }
 0x1ca   : > { %906 = vmatmul.mubr.bf16.gmra.mrb[4].mxu0 %v685_v12 }
 0x295   : > { %v897_v20 = vpop.f32.mrb[0].mxu0 }
 0x296   : > { %v898_v22 = vadd.f32 %v897_v20, %v723_v18  ;;  %v899_v23 = vpop.f32.mrb[1].mxu0 }
 0x297   : > { %v901_v25 = vpop.f32.mrb[2].mxu0  ;;  %v900_v28 = vadd.f32 %v899_v23, %v727_v21 }
 0x298   : > { %v902_v26 = vadd.f32 %v901_v25, %v723_v18  ;;  %v903_v27 = vpop.f32.mrb[3].mxu0  ;;  %v965_v31 = vmul.f32 0.17677669, %v898_v22 }
 0x299   : > { %v904_v29 = vadd.f32 %v903_v27, %v727_v21  ;;  %v6531_v30 = vpop.f32.mrb[0].mxu1 }
 0x29a   : > { %v966_v32 = vmul.f32 0.17677669, %v902_v26  ;;  %v959_v33 = vadd.f32 %v6531_v30, %v731_v24  ;;  %v950_v34 = vpop.f32.mrb[1].mxu1 }
 0x29b   : > { %v951_v35 = vadd.f32 %v950_v34, %v731_v24  ;;  %v6532_v36 = vpop.f32.mrb[2].mxu1  ;;  %v6798_v37 = vpack.i.bf16 %v904_v29, %v900_v28  ;;  %v1097_v38 = vpack.c.bf16 %v904_v29, %v900_v28 }
 0x29c   : > { %v962_v40 = vadd.f32 %v6532_v36, %v731_v24  ;;  %v953_v41 = vpop.f32.mrb[3].mxu1  ;;  %v1089_v42 = vpack.c.bf16 %v966_v32, %v965_v31  ;;  %v6838_v43 = vpack.i.bf16 %v966_v32, %v965_v31 }
 0x29d   : > { %v954_v44 = vadd.f32 %v953_v41, %v731_v24  ;;  %6799 = vrot.lane.b32.xlu0 %v6798_v37, %s7751_s26  ;;  %v907_v45 = vpop.f32.mrb[4].mxu0  ;;  %6721 = vmatprep.subr.msk.bf16.mxu0 %vm1105_vm0, %v1097_v38  ;;  %v1113_v46 = vsel %vm1105_vm0, %v1097_v38, 0 }
 0x29e   : > { %v908_v47 = vadd.f32 %v907_v45, %v723_v18  ;;  %v909_v48 = vpop.f32.mrb[5].mxu0  ;;  %6534 = vmatpush3.bf16.xpose.msra.mxu0 %v1113_v46  ;;  %6537 = vmatprep.mubr.msk.bf16.mxu0 %vm1105_vm0, %v1089_v42  ;;  %v8039_v49 = vpack.c.bf16 %v962_v40, %v959_v33  ;;  %v8041_v50 = vpack.i.bf16 %v962_v40, %v959_v33 }
 0x29f   : > { %v911_v51 = vpop.f32.mrb[6].mxu0  ;;  %v8043_v52 = vpack.c.bf16 %v954_v44, %v951_v35  ;;  %v8045_v53 = vpack.i.bf16 %v954_v44, %v951_v35  ;;  %v910_v56 = vadd.f32 %v909_v48, %v727_v21 }
 0x2a0   : > { %v912_v54 = vadd.f32 %v911_v51, %v723_v18  ;;  %v913_v55 = vpop.f32.mrb[7].mxu0  ;;  %v967_v58 = vmul.f32 0.17677669, %v908_v47 }
 0x2a1   : > { %v914_v57 = vadd.f32 %v913_v55, %v727_v21  ;;  %6819 = vrot.lane.b32.xlu0 %v6798_v37, %s7752_s19 }
 0x2a2   : > { %v968_v59 = vmul.f32 0.17677669, %v912_v54 }
 0x2a3   : > { %v6828_v60 = vpack.i.bf16 %v914_v57, %v910_v56  ;;  %v1098_v61 = vpack.c.bf16 %v914_v57, %v910_v56 }
 0x2a4   : > { %v1090_v62 = vpack.c.bf16 %v968_v59, %v967_v58  ;;  %v6823_v63 = vpack.i.bf16 %v968_v59, %v967_v58 }
 0x2a5   : > { %6829 = vrot.lane.b32.xlu0 %v6828_v60, %s7753_s0  ;;  %6804 = vrot.lane.b32.xlu1 %v6828_v60, %s7751_s26  ;;  %v1116_v0 = vsel %vm1105_vm0, %v1098_v61, 0 }
 0x2a6   : > { %6722 = vmatprep.subr.msk.bf16.mxu0 %vm1105_vm0, %v1098_v61 }
 0x2a7   : > { %6536 = vmatpush3.bf16.xpose.msra.mxu0 %v1116_v0  ;;  %v615_v0 = vld [vmem:[%s9665_s17 + $0x10] sm:$0xff] }
 0x2a9   : > { %6839 = vrot.lane.b32.xlu0 %v6838_v43, %s7753_s0  ;;  %6809 = vrot.lane.b32.xlu1 %v6798_v37, %s7753_s0 }
 0x2ad   : > { %6844 = vrot.lane.b32.xlu0 %v6838_v43, %s7752_s19  ;;  %6814 = vrot.lane.b32.xlu1 %v6838_v43, %s7751_s26 }
 0x2ae   : > { %6538 = vmatmul.mubr.msk.bf16.vlgmr.msra.gmra.mrb[8].mxu0 %vm1105_vm0, %v1090_v62 }
 0x2b1   : > { %6824 = vrot.lane.b32.xlu1 %v6823_v63, %s7751_s26 }
 0x2b5   : > { %6834 = vrot.lane.b32.xlu1 %v6828_v60, %s7752_s19 }
 0x2b9   : > { %6849 = vrot.lane.b32.xlu1 %v6823_v63, %s7753_s0 }
 0x2bd   : > { %6854 = vrot.lane.b32.xlu1 %v6823_v63, %s7752_s19 }
 0x30f   : > { %v6800_v1 = vpop.permute.xlu0 %6799 }
 0x310   : > { %v6802_v2 = vunpack.i.h.bf16 %v6800_v1  ;;  %v6801_v3 = vunpack.i.l.bf16 %v6800_v1 }
 0x312   : > { %v1099_v4 = vpack.c.bf16 %v6802_v2, %v6801_v3  ;;  %v613_v2 = vld [vmem:[%s9665_s17] sm:$0xff] }
 0x313   : > { %v6820_v5 = vpop.permute.xlu0 %6819 }
 0x314   : > { %6723 = vmatprep.subr.msk.bf16.mxu1 %vm1105_vm0, %v1099_v4  ;;  %v1174_v6 = vsel %vm1105_vm0, %v1099_v4, 0  ;;  %v6822_v11 = vunpack.i.h.bf16 %v6820_v5  ;;  %v6821_v12 = vunpack.i.l.bf16 %v6820_v5 }
 0x315   : > { %6542 = vmatpush3.bf16.xpose.msra.mxu1 %v1174_v6 }
 0x316   : > { %v1103_v24 = vpack.c.bf16 %v6822_v11, %v6821_v12 }
 0x317   : > { %v6805_v7 = vpop.permute.xlu1 %6804  ;;  %v6830_v8 = vpop.permute.xlu0 %6829 }
 0x318   : > { %v6807_v9 = vunpack.i.h.bf16 %v6805_v7  ;;  %v6806_v10 = vunpack.i.l.bf16 %v6805_v7  ;;  %v6832_v25 = vunpack.i.h.bf16 %v6830_v8  ;;  %v6831_v26 = vunpack.i.l.bf16 %v6830_v8  ;;  %v8103_v8 = vld [vmem:[%s9665_s17 + $0x18] sm:$0xff] }
 0x319   : > { %v1296_v48 = vsel %vm1105_vm0, %v1103_v24, 0 }
 0x31a   : > { %v1100_v14 = vpack.c.bf16 %v6807_v9, %v6806_v10  ;;  %v1102_v34 = vpack.c.bf16 %v6832_v25, %v6831_v26 }
 0x31b   : > { %v6810_v16 = vpop.permute.xlu1 %6809  ;;  %v6840_v18 = vpop.permute.xlu0 %6839 }
 0x31c   : > { %v6812_v20 = vunpack.i.h.bf16 %v6810_v16  ;;  %v6811_v21 = vunpack.i.l.bf16 %v6810_v16  ;;  %v6842_v22 = vunpack.i.h.bf16 %v6840_v18  ;;  %v6841_v23 = vunpack.i.l.bf16 %v6840_v18  ;;  %6724 = vmatprep.subr.msk.bf16.mxu1 %vm1105_vm0, %v1100_v14 }
 0x31d   : > { %v1177_v27 = vsel %vm1105_vm0, %v1100_v14, 0  ;;  %v1238_v51 = vsel %vm1105_vm0, %v1102_v34, 0 }
 0x31e   : > { %v1101_v28 = vpack.c.bf16 %v6812_v20, %v6811_v21  ;;  %v1093_v29 = vpack.c.bf16 %v6842_v22, %v6841_v23  ;;  %6544 = vmatpush3.bf16.xpose.msra.mxu1 %v1177_v27 }
 0x31f   : > { %6727 = vmatprep.subr.msk.bf16.mxu1 %vm1105_vm0, %v1103_v24  ;;  %v6815_v30 = vpop.permute.xlu1 %6814  ;;  %v6845_v33 = vpop.permute.xlu0 %6844 }
 0x320   : > { %v6817_v31 = vunpack.i.h.bf16 %v6815_v30  ;;  %v6816_v32 = vunpack.i.l.bf16 %v6815_v30  ;;  %6725 = vmatprep.subr.msk.bf16.mxu0 %vm1105_vm0, %v1101_v28  ;;  %6553 = vmatprep.mubr.msk.bf16.mxu0 %vm1105_vm0, %v1093_v29  ;;  %v1235_v35 = vsel %vm1105_vm0, %v1101_v28, 0  ;;  %v6847_v37 = vunpack.i.h.bf16 %v6845_v33 }
 0x321   : > { %6550 = vmatpush3.bf16.xpose.msra.mxu0 %v1235_v35  ;;  %v6846_v38 = vunpack.i.l.bf16 %v6845_v33 }
 0x322   : > { %v1091_v36 = vpack.c.bf16 %v6817_v31, %v6816_v32  ;;  %6726 = vmatprep.subr.msk.bf16.mxu0 %vm1105_vm0, %v1102_v34 }
 0x323   : > { %v6825_v40 = vpop.permute.xlu1 %6824  ;;  %v1095_v44 = vpack.c.bf16 %v6847_v37, %v6846_v38 }
 0x324   : > { %v6827_v41 = vunpack.i.h.bf16 %v6825_v40  ;;  %v6826_v42 = vunpack.i.l.bf16 %v6825_v40  ;;  %6545 = vmatprep.mubr.msk.bf16.mxu1 %vm1105_vm0, %v1091_v36 }
 0x326   : > { %v1092_v43 = vpack.c.bf16 %v6827_v41, %v6826_v42 }
 0x327   : > { %v6835_v45 = vpop.permute.xlu1 %6834 }
 0x328   : > { %v6837_v46 = vunpack.i.h.bf16 %v6835_v45  ;;  %v6836_v47 = vunpack.i.l.bf16 %v6835_v45  ;;  %6546 = vmatmul.mubr.msk.bf16.vlgmr.msra.gmra.mrb[4].mxu1 %vm1105_vm0, %v1092_v43 }
 0x329   : > { %6558 = vmatpush3.bf16.xpose.msra.mxu1 %v1296_v48  ;;  %6561 = vmatprep.mubr.msk.bf16.mxu1 %vm1105_vm0, %v1095_v44 }
 0x32a   : > { %v1104_v54 = vpack.c.bf16 %v6837_v46, %v6836_v47  ;;  %6552 = vmatpush3.bf16.xpose.msra.mxu0 %v1238_v51 }
 0x32b   : > { %6565 = vmatprep.subr.bf16.mxu0 %v8043_v52  ;;  %v6850_v55 = vpop.permute.xlu1 %6849 }
 0x32c   : > { %v6852_v56 = vunpack.i.h.bf16 %v6850_v55  ;;  %v6851_v57 = vunpack.i.l.bf16 %v6850_v55  ;;  %6728 = vmatprep.subr.msk.bf16.mxu1 %vm1105_vm0, %v1104_v54  ;;  %v1299_v60 = vsel %vm1105_vm0, %v1104_v54, 0 }
 0x32e   : > { %v1094_v58 = vpack.c.bf16 %v6852_v56, %v6851_v57 }
 0x32f   : > { %v6855_v59 = vpop.permute.xlu1 %6854 }
 0x330   : > { %v6857_v61 = vunpack.i.h.bf16 %v6855_v59  ;;  %v6856_v62 = vunpack.i.l.bf16 %v6855_v59 }
 0x331   : > { %6554 = vmatmul.mubr.msk.bf16.vlgmr.msra.gmra.mrb[12].mxu0 %vm1105_vm0, %v1094_v58  ;;  %6560 = vmatpush3.bf16.xpose.msra.mxu1 %v1299_v60 }
 0x332   : > { %6566 = vmatpush3.bf16.msra.mxu0 %v8043_v52  ;;  %v1096_v63 = vpack.c.bf16 %v6857_v61, %v6856_v62  ;;  %v8094_v52 = vld [vmem:[%s9665_s17 + $0x8] sm:$0xff] }
 0x333   : > { %6567 = vmatprep.subr.bf16.mxu0 %v8039_v49 }
 0x336   : > { %6568 = vmatpush3.bf16.msra.mxu0 %v8039_v49 }
 0x338   : > { %6562 = vmatmul.mubr.msk.bf16.vlgmr.msra.gmra.mrb[8].mxu1 %vm1105_vm0, %v1096_v63 }
 0x381   : > { %v6539_v1 = vpop.f32.mrb[8].mxu0 }
 0x382   : > { %v8089_v3 = vadd.f32 %v6539_v1, %v615_v0  ;;  %v1152_v4 = vpop.f32.mrb[9].mxu0 }
 0x383   : > { %v6540_v49 = vpop.f32.mrb[10].mxu0  ;;  %v8096_v5 = vadd.f32 %v1152_v4, %v613_v2 }
 0x384   : > { %v1155_v6 = vpop.f32.mrb[11].mxu0  ;;  %v1356_v7 = vsel %vm1105_vm0, %v8089_v3, -inf  ;;  %v8111_v11 = vadd.f32 %v6540_v49, %v8103_v8 }
 0x385   : > { %v8106_v9 = vadd.f32 %v1155_v6, %v8094_v52  ;;  %1357 = vmax.xlane.f32.xlu0 %v1356_v7  ;;  %v1350_v12 = vsel %vm1105_vm0, %v8096_v5, -inf }
 0x386   : > { %v1359_v14 = vsel %vm1105_vm0, %v8111_v11, -inf }
 0x387   : > { %v1353_v10 = vsel %vm1105_vm0, %v8106_v9, -inf }
 0x388   : > { %1354 = vmax.xlane.f32.xlu1 %v1353_v10 }
 0x389   : > { %1351 = vmax.xlane.f32.xlu0 %v1350_v12 }
 0x38d   : > { %1360 = vmax.xlane.f32.xlu0 %v1359_v14 }
 0x3fb   : > { %v6547_v16 = vpop.f32.mrb[4].mxu1 }
 0x3fc   : > { %v8117_v18 = vadd.f32 %v6547_v16, %v615_v0  ;;  %v1213_v20 = vpop.f32.mrb[5].mxu1 }
 0x3fd   : > { %v6548_v21 = vpop.f32.mrb[6].mxu1  ;;  %v8128_v30 = vadd.f32 %v1213_v20, %v613_v2 }
 0x3fe   : > { %v8120_v22 = vadd.f32 %v6548_v21, %v8103_v8  ;;  %v1216_v23 = vpop.f32.mrb[7].mxu1  ;;  %v1368_v24 = vsel %vm1105_vm0, %v8117_v18, -inf }
 0x3ff   : > { %1369 = vmax.xlane.f32.xlu0 %v1368_v24  ;;  %v8136_v34 = vadd.f32 %v1216_v23, %v8094_v52  ;;  %v1362_v38 = vsel %vm1105_vm0, %v8128_v30, -inf }
 0x400   : > { %v1371_v25 = vsel %vm1105_vm0, %v8120_v22, -inf }
 0x401   : > { %1372 = vmax.xlane.f32.xlu1 %v1371_v25  ;;  %v1365_v43 = vsel %vm1105_vm0, %v8136_v34, -inf }
 0x404   : > { %v6555_v26 = vpop.f32.mrb[12].mxu0 }
 0x405   : > { %v8126_v27 = vadd.f32 %v6555_v26, %v615_v0  ;;  %v1274_v28 = vpop.f32.mrb[13].mxu0 }
 0x406   : > { %v6556_v29 = vpop.f32.mrb[14].mxu0  ;;  %v8140_v36 = vadd.f32 %v1274_v28, %v613_v2 }
 0x407   : > { %v8131_v31 = vadd.f32 %v6556_v29, %v8103_v8  ;;  %v1277_v32 = vpop.f32.mrb[15].mxu0  ;;  %v1380_v33 = vsel %vm1105_vm0, %v8126_v27, -inf }
 0x408   : > { %1381 = vmax.xlane.f32.xlu0 %v1380_v33  ;;  %v8145_v41 = vadd.f32 %v1277_v32, %v8094_v52  ;;  %v1374_v46 = vsel %vm1105_vm0, %v8140_v36, -inf }
 0x409   : > { %v1383_v35 = vsel %vm1105_vm0, %v8131_v31, -inf }
 0x40a   : > { %1384 = vmax.xlane.f32.xlu1 %v1383_v35  ;;  %v1377_v47 = vsel %vm1105_vm0, %v8145_v41, -inf }
 0x40b   : > { %v6563_v37 = vpop.f32.mrb[8].mxu1 }
 0x40c   : > { %v1335_v40 = vpop.f32.mrb[9].mxu1  ;;  %1363 = vmax.xlane.f32.xlu0 %v1362_v38  ;;  %v8149_v45 = vadd.f32 %v6563_v37, %v615_v0 }
 0x40d   : > { %v6564_v42 = vpop.f32.mrb[10].mxu1  ;;  %v8155_v48 = vadd.f32 %v1335_v40, %v613_v2 }
 0x40e   : > { %v1338_v44 = vpop.f32.mrb[11].mxu1  ;;  %1366 = vmax.xlane.f32.xlu1 %v1365_v43  ;;  %v1392_v51 = vsel %vm1105_vm0, %v8149_v45, -inf  ;;  %v8170_v61 = vadd.f32 %v6564_v42, %v8103_v8 }
 0x40f   : > { %v1386_v54 = vsel %vm1105_vm0, %v8155_v48, -inf  ;;  %v8175_v63 = vadd.f32 %v1338_v44, %v8094_v52 }
 0x410   : > { %1375 = vmax.xlane.f32.xlu0 %v1374_v46  ;;  %v1395_v0 = vsel %vm1105_vm0, %v8170_v61, -inf }
 0x412   : > { %1378 = vmax.xlane.f32.xlu1 %v1377_v47  ;;  %v1358_v55 = vpop.xlane.xlu0 %1357 }
 0x413   : > { %v1400_v56 = vsub.f32 %v8089_v3, %v1358_v55  ;;  %v1389_v3 = vsel %vm1105_vm0, %v8175_v63, -inf }
 0x414   : > { %1393 = vmax.xlane.f32.xlu0 %v1392_v51 }
 0x415   : > { %v1418_v58 = vmul.f32 1.442695, %v1400_v56 }
 0x416   : > { %v1352_v57 = vpop.xlane.xlu0 %1351 }
 0x417   : > { %v1398_v59 = vsub.f32 %v8096_v5, %v1352_v57  ;;  %7310 = vpow2.f32 %v1418_v58  ;;  %v1355_v5 = vpop.xlane.xlu1 %1354 }
 0x418   : > { %1387 = vmax.xlane.f32.xlu0 %v1386_v54  ;;  %v1399_v6 = vsub.f32 %v8106_v9, %v1355_v5 }
 0x419   : > { %v1414_v60 = vmul.f32 1.442695, %v1398_v59 }
 0x41a   : > { %v1361_v52 = vpop.xlane.xlu0 %1360  ;;  %v1416_v8 = vmul.f32 1.442695, %v1399_v6 }
 0x41b   : > { %7312 = vpow2.f32 %v1414_v60  ;;  %v1401_v49 = vsub.f32 %v8111_v11, %v1361_v52 }
 0x41d   : > { %v1420_v7 = vmul.f32 1.442695, %v1401_v49 }
 0x41f   : > { %7314 = vpow2.f32 %v1420_v7 }
 0x420   : > { %7316 = vpow2.f32 %v1416_v8 }
 0x421   : > { %v8172_v62 = vpop.eup %7310 }
 0x422   : > { %v1452_v1 = vsel %vm1105_vm0, %v8172_v62, 0.0 }
 0x423   : > { %6864 = vrot.lane.b32.xlu1 %v8041_v50, %s7751_s26 }
 0x425   : > { %v8181_v2 = vpop.eup %7312 }
 0x426   : > { %v1446_v4 = vsel %vm1105_vm0, %v8181_v2, 0.0 }
 0x427   : > { %6869 = vrot.lane.b32.xlu1 %v8045_v53, %s7753_s0 }
 0x429   : > { %v8191_v10 = vpop.eup %7314 }
 0x42a   : > { %v1455_v12 = vsel %vm1105_vm0, %v8191_v10, 0.0  ;;  %v8195_v14 = vpop.eup %7316 }
 0x42e   : > { %6859 = vrot.lane.b32.xlu0 %v8045_v53, %s7751_s26 }
 0x44b   : > { %1396 = vmax.xlane.f32.xlu1 %v1395_v0 }
 0x44d   : > { %1453 = vadd.xlane.f32.xlu0 %v1452_v1 }
 0x44f   : > { %1390 = vmax.xlane.f32.xlu1 %v1389_v3 }
 0x451   : > { %1447 = vadd.xlane.f32.xlu0 %v1446_v4 }
 0x460   : > { %6874 = vrot.lane.b32.xlu1 %v8045_v53, %s7752_s19  ;;  %v1449_v53 = vsel %vm1105_vm0, %v8195_v14, 0.0 }
 0x484   : > { %1456 = vadd.xlane.f32.xlu1 %v1455_v12 }
 0x488   : > { %1450 = vadd.xlane.f32.xlu1 %v1449_v53 }
 0x48c   : > { %v1370_v11 = vpop.xlane.xlu0 %1369 }
 0x48d   : > { %v1404_v16 = vsub.f32 %v8117_v18, %v1370_v11 }
 0x48e   : > { %v1373_v9 = vpop.xlane.xlu1 %1372 }
 0x48f   : > { %v1426_v20 = vmul.f32 1.442695, %v1404_v16  ;;  %v1405_v21 = vsub.f32 %v8120_v22, %v1373_v9 }
 0x491   : > { %7318 = vpow2.f32 %v1426_v20  ;;  %v1428_v23 = vmul.f32 1.442695, %v1405_v21 }
 0x493   : > { %7320 = vpow2.f32 %v1428_v23 }
 0x495   : > { %v1382_v24 = vpop.xlane.xlu0 %1381 }
 0x496   : > { %v1408_v25 = vsub.f32 %v8126_v27, %v1382_v24 }
 0x497   : > { %v1385_v26 = vpop.xlane.xlu1 %1384 }
 0x498   : > { %v1434_v28 = vmul.f32 1.442695, %v1408_v25  ;;  %v1409_v29 = vsub.f32 %v8131_v31, %v1385_v26 }
 0x499   : > { %v1364_v32 = vpop.xlane.xlu0 %1363 }
 0x49a   : > { %7322 = vpow2.f32 %v1434_v28  ;;  %v1436_v33 = vmul.f32 1.442695, %v1409_v29  ;;  %v1402_v35 = vsub.f32 %v8128_v30, %v1364_v32 }
 0x49b   : > { %v8204_v18 = vpop.eup %7318  ;;  %v1367_v37 = vpop.xlane.xlu1 %1366 }
 0x49c   : > { %7324 = vpow2.f32 %v1436_v33  ;;  %v1422_v22 = vmul.f32 1.442695, %v1402_v35  ;;  %v1403_v38 = vsub.f32 %v8136_v34, %v1367_v37  ;;  %v1464_v40 = vsel %vm1105_vm0, %v8204_v18, 0.0 }
 0x49d   : > { %v8209_v27 = vpop.eup %7320  ;;  %v1376_v42 = vpop.xlane.xlu0 %1375  ;;  %1465 = vadd.xlane.f32.xlu0 %v1464_v40 }
 0x49e   : > { %7326 = vpow2.f32 %v1422_v22  ;;  %v1424_v31 = vmul.f32 1.442695, %v1403_v38  ;;  %v1406_v43 = vsub.f32 %v8140_v36, %v1376_v42  ;;  %v1467_v30 = vsel %vm1105_vm0, %v8209_v27, 0.0 }
 0x49f   : > { %v1379_v44 = vpop.xlane.xlu1 %1378  ;;  %1468 = vadd.xlane.f32.xlu1 %v1467_v30 }
 0x4a0   : > { %7328 = vpow2.f32 %v1424_v31  ;;  %v1430_v46 = vmul.f32 1.442695, %v1406_v43  ;;  %v1407_v34 = vsub.f32 %v8145_v41, %v1379_v44 }
 0x4a1   : > { %v1394_v47 = vpop.xlane.xlu0 %1393 }
 0x4a2   : > { %7330 = vpow2.f32 %v1430_v46  ;;  %v1432_v51 = vmul.f32 1.442695, %v1407_v34  ;;  %v1412_v54 = vsub.f32 %v8149_v45, %v1394_v47 }
 0x4a3   : > { %v6865_v55 = vpop.permute.xlu1 %6864 }
 0x4a4   : > { %v8216_v56 = vpop.eup %7322  ;;  %7332 = vpow2.f32 %v1432_v51  ;;  %v1442_v57 = vmul.f32 1.442695, %v1412_v54  ;;  %v6867_v52 = vunpack.i.h.bf16 %v6865_v55  ;;  %v6866_v49 = vunpack.i.l.bf16 %v6865_v55 }
 0x4a5   : > { %v1388_v36 = vpop.xlane.xlu0 %1387  ;;  %v1476_v58 = vsel %vm1105_vm0, %v8216_v56, 0.0 }
 0x4a6   : > { %v8220_v59 = vpop.eup %7324  ;;  %7334 = vpow2.f32 %v1442_v57  ;;  %v1410_v60 = vsub.f32 %v8155_v48, %v1388_v36  ;;  %1477 = vadd.xlane.f32.xlu0 %v1476_v58  ;;  %v1537_v21 = vpack.c.bf16 %v6867_v52, %v6866_v49 }
 0x4a7   : > { %v6870_v41 = vpop.permute.xlu1 %6869  ;;  %v1479_v0 = vsel %vm1105_vm0, %v8220_v59, 0.0 }
 0x4a8   : > { %v8225_v45 = vpop.eup %7326  ;;  %v1438_v1 = vmul.f32 1.442695, %v1410_v60  ;;  %v6872_v3 = vunpack.i.h.bf16 %v6870_v41  ;;  %v6871_v4 = vunpack.i.l.bf16 %v6870_v41  ;;  %1480 = vadd.xlane.f32.xlu1 %v1479_v0 }
 0x4a9   : > { %v6860_v5 = vpop.permute.xlu0 %6859  ;;  %v1458_v6 = vsel %vm1105_vm0, %v8225_v45, 0.0 }
 0x4aa   : > { %v8229_v7 = vpop.eup %7328  ;;  %7336 = vpow2.f32 %v1438_v1  ;;  %v6862_v48 = vunpack.i.h.bf16 %v6860_v5  ;;  %v6861_v8 = vunpack.i.l.bf16 %v6860_v5  ;;  %1459 = vadd.xlane.f32.xlu0 %v1458_v6  ;;  %v8231_v12 = vpack.c.bf16 %v6872_v3, %v6871_v4 }
 0x4ab   : > { %v1461_v53 = vsel %vm1105_vm0, %v8229_v7, 0.0 }
 0x4ac   : > { %v8235_v11 = vpop.eup %7330  ;;  %1462 = vadd.xlane.f32.xlu1 %v1461_v53  ;;  %6581 = vmatprep.subr.bf16.mxu0 %v8231_v12  ;;  %v1536_v16 = vpack.c.bf16 %v6862_v48, %v6861_v8 }
 0x4ad   : > { %v1470_v9 = vsel %vm1105_vm0, %v8235_v11, 0.0 }
 0x4ae   : > { %v8240_v20 = vpop.eup %7332  ;;  %1471 = vadd.xlane.f32.xlu0 %v1470_v9  ;;  %6573 = vmatprep.subr.bf16.mxu1 %v1536_v16 }
 0x4af   : > { %6574 = vmatpush3.bf16.msra.mxu1 %v1536_v16  ;;  %v1473_v23 = vsel %vm1105_vm0, %v8240_v20, 0.0 }
 0x4b0   : > { %v8244_v24 = vpop.eup %7334  ;;  %1474 = vadd.xlane.f32.xlu1 %v1473_v23  ;;  %6575 = vmatprep.subr.bf16.mxu1 %v1537_v21 }
 0x4b1   : > { %v1488_v25 = vsel %vm1105_vm0, %v8244_v24, 0.0 }
 0x4b2   : > { %1489 = vadd.xlane.f32.xlu0 %v1488_v25 }
 0x4b3   : > { %6576 = vmatpush3.bf16.msra.mxu1 %v1537_v21 }
 0x4b4   : > { %v8248_v26 = vpop.eup %7336 }
 0x4b5   : > { %v1482_v28 = vsel %vm1105_vm0, %v8248_v26, 0.0 }
 0x4b6   : > { %1483 = vadd.xlane.f32.xlu0 %v1482_v28 }
 0x4cc   : > { %6879 = vrot.lane.b32.xlu0 %v8041_v50, %s7753_s0 }
 0x4d8   : > { %v1397_v29 = vpop.xlane.xlu1 %1396 }
 0x4d9   : > { %v1413_v32 = vsub.f32 %v8170_v61, %v1397_v29 }
 0x4da   : > { %v1454_v44 = vpop.xlane.xlu0 %1453 }
 0x4db   : > { %v1444_v33 = vmul.f32 1.442695, %v1413_v32 }
 0x4dc   : > { %v1391_v35 = vpop.xlane.xlu1 %1390 }
 0x4dd   : > { %7338 = vpow2.f32 %v1444_v33  ;;  %v1411_v37 = vsub.f32 %v8175_v63, %v1391_v35 }
 0x4de   : > { %v1448_v46 = vpop.xlane.xlu0 %1447 }
 0x4df   : > { %v1440_v22 = vmul.f32 1.442695, %v1411_v37 }
 0x4e0   : > { %v6875_v38 = vpop.permute.xlu1 %6874 }
 0x4e1   : > { %7340 = vpow2.f32 %v1440_v22  ;;  %v6877_v40 = vunpack.i.h.bf16 %v6875_v38  ;;  %v6876_v42 = vunpack.i.l.bf16 %v6875_v38 }
 0x4e3   : > { %v8256_v31 = vpack.c.bf16 %v6877_v40, %v6876_v42 }
 0x4e5   : > { %6589 = vmatprep.subr.bf16.mxu1 %v8256_v31 }
 0x4e7   : > { %v8259_v43 = vpop.eup %7338 }
 0x4e8   : > { %v1491_v30 = vsel %vm1105_vm0, %v8259_v43, 0.0 }
 0x4e9   : > { %1492 = vadd.xlane.f32.xlu1 %v1491_v30 }
 0x4eb   : > { %v8263_v61 = vpop.eup %7340 }
 0x4ec   : > { %v1485_v63 = vsel %vm1105_vm0, %v8263_v61, 0.0 }
 0x4ed   : > { %1486 = vadd.xlane.f32.xlu1 %v1485_v63 }
 0x4fe   : > { %6884 = vrot.lane.b32.xlu1 %v8041_v50, %s7752_s19 }
 0x511   : > { %v1457_v34 = vpop.xlane.xlu1 %1456 }
 0x512   : > { %7342 = vrcp.f32 %v1457_v34 }
 0x513   : > { %7344 = vrcp.f32 %v1448_v46 }
 0x514   : > { %7346 = vrcp.f32 %v1454_v44 }
 0x515   : > { %v1451_v47 = vpop.xlane.xlu1 %1450 }
 0x516   : > { %7348 = vrcp.f32 %v1451_v47 }
 0x51c   : > { %v7343_v51 = vpop.eup %7342 }
 0x51d   : > { %v7345_v54 = vpop.eup %7344  ;;  %v1513_v36 = vmul.f32 %v7343_v51, %v8191_v10 }
 0x51e   : > { %v7347_v55 = vpop.eup %7346  ;;  %v1510_v58 = vmul.f32 %v7345_v54, %v8181_v2 }
 0x51f   : > { %v1512_v50 = vmul.f32 %v7347_v55, %v8172_v62 }
 0x520   : > { %v7349_v57 = vpop.eup %7348 }
 0x521   : > { %v1511_v60 = vmul.f32 %v7349_v57, %v8195_v14  ;;  %v1527_v0 = vpack.c.bf16 %v1513_v36, %v1512_v50 }
 0x523   : > { %v1526_v41 = vpack.c.bf16 %v1511_v60, %v1510_v58 }
 0x525   : > { %6569 = vmatprep.mubr.msk.bf16.mxu0 %vm1105_vm0, %v1526_v41  ;;  %v7071_v41 = vld [vmem:[%s9605_s6 + $0x8] sm:$0xff]  }
 0x526   : > { %6570 = vmatmul.mubr.msk.bf16.vlgmr.msra.gmra.mrb[16].mxu0 %vm1105_vm0, %v1527_v0 }
 0x527   : > { %6582 = vmatpush3.bf16.msra.mxu0 %v8231_v12 }
 0x52a   : > { %v1466_v1 = vpop.xlane.xlu0 %1465 }
 0x52c   : > { %v1469_v3 = vpop.xlane.xlu1 %1468 }
 0x52d   : > { %7350 = vrcp.f32 %v1469_v3 }
 0x533   : > { %v1478_v4 = vpop.xlane.xlu0 %1477 }
 0x535   : > { %v1481_v52 = vpop.xlane.xlu1 %1480 }
 0x537   : > { %v1460_v10 = vpop.xlane.xlu0 %1459  ;;  %v7351_v5 = vpop.eup %7350 }
 0x538   : > { %7352 = vrcp.f32 %v1460_v10  ;;  %v1517_v53 = vmul.f32 %v7351_v5, %v8209_v27  ;;  %v7073_v5 = vld [vmem:[%s9605_s6 + $0x18] sm:$0xff]  }
 0x539   : > { %7354 = vrcp.f32 %v1466_v1  ;;  %v1463_v2 = vpop.xlane.xlu1 %1462 }
 0x53a   : > { %7356 = vrcp.f32 %v1463_v2 }
 0x53b   : > { %v1472_v14 = vpop.xlane.xlu0 %1471 }
 0x53c   : > { %7358 = vrcp.f32 %v1472_v14 }
 0x53d   : > { %7360 = vrcp.f32 %v1481_v52  ;;  %v1475_v62 = vpop.xlane.xlu1 %1474  ;;  %v7072_v52 = vld [vmem:[%s9605_s6 + $0x10] sm:$0xff]  }
 0x53e   : > { %7362 = vrcp.f32 %v1475_v62 }
 0x53f   : > { %7364 = vrcp.f32 %v1478_v4  ;;  %v1490_v49 = vpop.xlane.xlu0 %1489 }
 0x542   : > { %v7353_v6 = vpop.eup %7352 }
 0x543   : > { %v7355_v48 = vpop.eup %7354  ;;  %v1484_v8 = vpop.xlane.xlu0 %1483  ;;  %v1514_v16 = vmul.f32 %v7353_v6, %v8225_v45 }
 0x544   : > { %v7357_v12 = vpop.eup %7356  ;;  %v1516_v23 = vmul.f32 %v7355_v48, %v8204_v18  ;;  %v7074_v48 = vld [vmem:[%s9605_s6 + $0x20] sm:$0xff]  }
 0x545   : > { %v1515_v9 = vmul.f32 %v7357_v12, %v8229_v7  ;;  %v7076_v12 = vld [vmem:[%s9605_s6 + $0x30] sm:$0xff]  }
 0x546   : > { %v7359_v21 = vpop.eup %7358  ;;  %v1529_v37 = vpack.c.bf16 %v1517_v53, %v1516_v23  ;;  %v7077_v53 = vld [vmem:[%s9605_s6 + $0x38] sm:$0xff]  }
 0x547   : > { %v7361_v25 = vpop.eup %7360  ;;  %v6880_v28 = vpop.permute.xlu0 %6879  ;;  %v1528_v29 = vpack.c.bf16 %v1515_v9, %v1514_v16  ;;  %v1518_v38 = vmul.f32 %v7359_v21, %v8235_v11 }
 0x548   : > { %v7363_v32 = vpop.eup %7362  ;;  %v6882_v33 = vunpack.i.h.bf16 %v6880_v28  ;;  %v6881_v35 = vunpack.i.l.bf16 %v6880_v28  ;;  %v1521_v45 = vmul.f32 %v7361_v25, %v8220_v59 }
 0x549   : > { %v7365_v22 = vpop.eup %7364  ;;  %6577 = vmatprep.mubr.msk.bf16.mxu1 %vm1105_vm0, %v1528_v29  ;;  %v1519_v27 = vmul.f32 %v7363_v32, %v8240_v20 }
 0x54a   : > { %v1539_v7 = vpack.c.bf16 %v6882_v33, %v6881_v35  ;;  %6578 = vmatmul.mubr.msk.bf16.vlgmr.msra.gmra.mrb[12].mxu1 %vm1105_vm0, %v1529_v37  ;;  %v1520_v40 = vmul.f32 %v7365_v22, %v8216_v56 }
 0x54b   : > { %6590 = vmatpush3.bf16.msra.mxu1 %v8256_v31  ;;  %v1530_v18 = vpack.c.bf16 %v1519_v27, %v1518_v38 }
 0x54c   : > { %6583 = vmatprep.subr.bf16.mxu0 %v1539_v7  ;;  %v1531_v42 = vpack.c.bf16 %v1521_v45, %v1520_v40 }
 0x54d   : > { %6584 = vmatpush3.bf16.msra.mxu0 %v1539_v7  ;;  %6585 = vmatprep.mubr.msk.bf16.mxu0 %vm1105_vm0, %v1530_v18 }
 0x550   : > { %6586 = vmatmul.mubr.msk.bf16.vlgmr.msra.gmra.mrb[20].mxu0 %vm1105_vm0, %v1531_v42 }
 0x576   : > { %v1493_v11 = vpop.xlane.xlu1 %1492 }
 0x577   : > { %7366 = vrcp.f32 %v1493_v11 }
 0x578   : > { %7368 = vrcp.f32 %v1484_v8  ;;  %v7075_v8 = vld [vmem:[%s9605_s6 + $0x28] sm:$0xff]  }
 0x579   : > { %7370 = vrcp.f32 %v1490_v49 }
 0x57a   : > { %v1487_v59 = vpop.xlane.xlu1 %1486 }
 0x57b   : > { %7372 = vrcp.f32 %v1487_v59 }
 0x57e   : > { %v6885_v20 = vpop.permute.xlu1 %6884 }
 0x57f   : > { %v6887_v30 = vunpack.i.h.bf16 %v6885_v20  ;;  %v6886_v63 = vunpack.i.l.bf16 %v6885_v20 }
 0x581   : > { %v1541_v31 = vpack.c.bf16 %v6887_v30, %v6886_v63  ;;  %v7367_v44 = vpop.eup %7366 }
 0x582   : > { %v7369_v46 = vpop.eup %7368  ;;  %v1525_v47 = vmul.f32 %v7367_v44, %v8259_v43 }
 0x583   : > { %6591 = vmatprep.subr.bf16.mxu1 %v1541_v31  ;;  %v7371_v56 = vpop.eup %7370  ;;  %v1522_v51 = vmul.f32 %v7369_v46, %v8248_v26 }
 0x584   : > { %6592 = vmatpush3.bf16.msra.mxu1 %v1541_v31  ;;  %v1524_v55 = vmul.f32 %v7371_v56, %v8244_v24  ;;  %v7070_v24 = vld [vmem:[%s9605_s6] sm:$0xff]  }
 0x585   : > { %v7373_v34 = vpop.eup %7372  ;;  %6597 = vmatprep.subr.bf16.mxu0 %v7070_v24 }
 0x586   : > { %v1523_v54 = vmul.f32 %v7373_v34, %v8263_v61  ;;  %v1533_v36 = vpack.c.bf16 %v1525_v47, %v1524_v55  ;;  %6598 = vmatpush3.bf16.msra.mxu0 %v7070_v24 }
 0x587   : > { %6599 = vmatprep.subr.bf16.mxu0 %v7071_v41 }
 0x588   : > { %v1532_v57 = vpack.c.bf16 %v1523_v54, %v1522_v51 }
 0x58a   : > { %6593 = vmatprep.mubr.msk.bf16.mxu1 %vm1105_vm0, %v1532_v57  ;;  %6600 = vmatpush3.bf16.msra.mxu0 %v7071_v41 }
 0x58b   : > { %6594 = vmatmul.mubr.msk.bf16.vlgmr.msra.gmra.mrb[16].mxu1 %vm1105_vm0, %v1533_v36  ;;  %6601 = vmatprep.subr.bf16.mxu0 %v7072_v52 }
 0x58c   : > { %2264 = vmatprep.mubr.bf16.mxu1 %v9622_v39 }
 0x58e   : > { %6602 = vmatpush3.bf16.msra.mxu0 %v7072_v52 }
 0x58f   : > { %6603 = vmatprep.subr.bf16.mxu0 %v7073_v5 }
 0x592   : > { %6604 = vmatpush3.bf16.msra.mxu0 %v7073_v5  ;;  %v7601_v5 = vld [vmem:[%s7984_s20 + $0x18] sm:$0xff] }
 0x593   : > { %6605 = vmatprep.subr.bf16.mxu0 %v7074_v48 }
 0x596   : > { %6606 = vmatpush3.bf16.msra.mxu0 %v7074_v48  ;;  %v7078_v48 = vld [vmem:[#allocation4] ss:$16 sps:$4 sm:$0xff]  }
 0x597   : > { %6607 = vmatprep.subr.bf16.mxu0 %v7075_v8 }
 0x59a   : > { %6608 = vmatpush3.bf16.msra.mxu0 %v7075_v8  ;;  %v7080_v8 = vld [vmem:[#allocation4 + $0x4] ss:$16 sps:$4 sm:$0xff]  }
 0x59b   : > { %6609 = vmatprep.subr.bf16.mxu0 %v7076_v12  ;;  %2232 = vmatprep.subr.bf16.mxu1 %v7080_v8 }
 0x59c   : > { %2233 = vmatpush1.bf16.msra.mxu1 %v7078_v48 }
 0x59e   : > { %6610 = vmatpush3.bf16.msra.mxu0 %v7076_v12  ;;  %v7081_v12 = vld [vmem:[#allocation4 + $0x8] ss:$16 sps:$4 sm:$0xff]  }
 0x59f   : > { %6611 = vmatprep.subr.bf16.mxu0 %v7077_v53 }
 0x5a2   : > { %6612 = vmatpush3.bf16.msra.mxu0 %v7077_v53  ;;  %v7083_v53 = vld [vmem:[#allocation4 + $0xc] ss:$16 sps:$4 sm:$0xff]  }
 0x5a3   : > { %2285 = vmatprep.subr.bf16.mxu0 %v7083_v53 }
 0x5f9   : > { %v8296_v58 = vpop.f32.mrb[16].mxu0 }
 0x5fa   : > { %v8298_v60 = vpop.f32.mrb[17].mxu0 }
 0x5fb   : > { %v8300_v50 = vpop.f32.mrb[18].mxu0 }
 0x5fc   : > { %v8302_v43 = vpop.f32.mrb[19].mxu0 }
 0x61d   : > { %v6579_v26 = vpop.f32.mrb[12].mxu1 }
 0x61e   : > { %v1637_v61 = vpop.f32.mrb[13].mxu1 }
 0x61f   : > { %v6580_v0 = vpop.f32.mrb[14].mxu1 }
 0x620   : > { %v6888_v1 = vpack.i.bf16 %v6580_v0, %v6579_v26  ;;  %v1640_v3 = vpop.f32.mrb[15].mxu1 }
 0x621   : > { %v6898_v4 = vpack.i.bf16 %v1640_v3, %v1637_v61  ;;  %v7598_v3 = vld [vmem:[%s7984_s20] sm:$0xff] }
 0x622   : > { %6889 = vrot.lane.b32.xlu1 %v6888_v1, %s7752_s19 }
 0x623   : > { %v6587_v10 = vpop.f32.mrb[20].mxu0  ;;  %6899 = vrot.lane.b32.xlu0 %v6898_v4, %s7752_s19 }
 0x624   : > { %v1692_v2 = vpop.f32.mrb[21].mxu0 }
 0x625   : > { %v6588_v14 = vpop.f32.mrb[22].mxu0 }
 0x626   : > { %v6893_v62 = vpack.i.bf16 %v6588_v14, %v6587_v10  ;;  %v1695_v49 = vpop.f32.mrb[23].mxu0  ;;  %v7599_v10 = vld [vmem:[%s7984_s20 + $0x8] sm:$0xff]  ;;  %v7600_v14 = vld [vmem:[%s7984_s20 + $0x10] sm:$0xff] }
 0x627   : > { %v6903_v6 = vpack.i.bf16 %v1695_v49, %v1692_v2 }
 0x628   : > { %6894 = vrot.lane.b32.xlu1 %v6893_v62, %s7753_s0 }
 0x629   : > { %6904 = vrot.lane.b32.xlu0 %v6903_v6, %s7753_s0 }
 0x65e   : > { %v6595_v16 = vpop.f32.mrb[16].mxu1 }
 0x65f   : > { %v1747_v9 = vpop.f32.mrb[17].mxu1 }
 0x660   : > { %v6596_v21 = vpop.f32.mrb[18].mxu1 }
 0x661   : > { %v6913_v23 = vpack.i.bf16 %v6596_v21, %v6595_v16  ;;  %v1750_v25 = vpop.f32.mrb[19].mxu1  ;;  %v7086_v16 = vld [vmem:[#allocation4 + $0x24] ss:$16 sps:$4 sm:$0xff]   ;;  %v7084_v21 = vld [vmem:[#allocation4 + $0x20] ss:$16 sps:$4 sm:$0xff]  }
 0x662   : > { %v6908_v28 = vpack.i.bf16 %v1750_v25, %v1747_v9  ;;  %v7089_v9 = vld [vmem:[#allocation4 + $0x2c] ss:$16 sps:$4 sm:$0xff]   ;;  %2234 = vmatprep.subr.bf16.mxu1 %v7086_v16 }
 0x663   : > { %6914 = vrot.lane.b32.xlu1 %v6913_v23, %s7751_s26  ;;  %v7087_v23 = vld [vmem:[#allocation4 + $0x28] ss:$16 sps:$4 sm:$0xff]   ;;  %2235 = vmatpush1.bf16.msra.mxu1 %v7084_v21  ;;  %v6066_v21 = vld [vmem:[%s9607_s8] ss:$0 sm:$0xff] }
 0x664   : > { %6909 = vrot.lane.b32.xlu0 %v6908_v28, %s7751_s26 }
 0x694   : > { %v6890_v29 = vpop.permute.xlu1 %6889 }
 0x695   : > { %v6900_v32 = vpop.permute.xlu0 %6899  ;;  %v6892_v35 = vunpack.i.h.bf16 %v6890_v29  ;;  %v6891_v37 = vunpack.i.l.bf16 %v6890_v29 }
 0x696   : > { %v6902_v38 = vunpack.i.h.bf16 %v6900_v32  ;;  %v6901_v27 = vunpack.i.l.bf16 %v6900_v32 }
 0x697   : > { %v1813_v42 = vsel %vm1105_vm0, %v8300_v50, %v6892_v35  ;;  %v1812_v11 = vsel %vm1105_vm0, %v8296_v58, %v6891_v37 }
 0x698   : > { %v1811_v20 = vsel %vm1105_vm0, %v8302_v43, %v6902_v38  ;;  %v1810_v30 = vsel %vm1105_vm0, %v8298_v60, %v6901_v27  ;;  %v6057_v43 = vld [vmem:[%s9606_s7] ss:$0 sm:$0xff] }
 0x69a   : > { %v6895_v33 = vpop.permute.xlu1 %6894 }
 0x69b   : > { %v6905_v22 = vpop.permute.xlu0 %6904  ;;  %v6897_v45 = vunpack.i.h.bf16 %v6895_v33  ;;  %v6896_v7 = vunpack.i.l.bf16 %v6895_v33 }
 0x69c   : > { %v6907_v18 = vunpack.i.h.bf16 %v6905_v22  ;;  %v6906_v40 = vunpack.i.l.bf16 %v6905_v22 }
 0x69d   : > { %v1817_v46 = vsel %vm1814_vm1, %v1812_v11, %v6896_v7  ;;  %v1818_v56 = vsel %vm1814_vm1, %v1813_v42, %v6897_v45 }
 0x69e   : > { %v1815_v51 = vsel %vm1814_vm1, %v1810_v30, %v6906_v40  ;;  %v1816_v54 = vsel %vm1814_vm1, %v1811_v20, %v6907_v18  ;;  %v7095_v20 = vld [vmem:[#allocation4 + $0x4c] ss:$16 sps:$4 sm:$0xff]   ;;  %v7090_v30 = vld [vmem:[#allocation4 + $0x40] ss:$16 sps:$4 sm:$0xff]  }
 0x6d5   : > { %v6915_v59 = vpop.permute.xlu1 %6914 }
 0x6d6   : > { %v6917_v63 = vunpack.i.h.bf16 %v6915_v59  ;;  %v6916_v31 = vunpack.i.l.bf16 %v6915_v59  ;;  %v6910_v44 = vpop.permute.xlu0 %6909  ;;  %v7092_v59 = vld [vmem:[#allocation4 + $0x44] ss:$16 sps:$4 sm:$0xff]  }
 0x6d7   : > { %v6912_v34 = vunpack.i.h.bf16 %v6910_v44  ;;  %v6911_v47 = vunpack.i.l.bf16 %v6910_v44  ;;  %2236 = vmatprep.subr.bf16.mxu1 %v7092_v59  ;;  %v7101_v44 = vld [vmem:[#allocation4 + $0x6c] ss:$16 sps:$4 sm:$0xff]  }
 0x6d8   : > { %v1823_v55 = vsel %vm1819_vm2, %v1818_v56, %v6917_v63  ;;  %v1822_v57 = vsel %vm1819_vm2, %v1817_v46, %v6916_v31  ;;  %v7093_v63 = vld [vmem:[#allocation4 + $0x48] ss:$16 sps:$4 sm:$0xff]   ;;  %2237 = vmatpush1.bf16.msra.mxu1 %v7090_v30  ;;  %v7098_v31 = vld [vmem:[#allocation4 + $0x64] ss:$16 sps:$4 sm:$0xff]   ;;  %v7096_v46 = vld [vmem:[#allocation4 + $0x60] ss:$16 sps:$4 sm:$0xff]  }
 0x6d9   : > { %v1825_v36 = vpack.c.bf16 %v1823_v55, %v1822_v57  ;;  %v1820_v58 = vsel %vm1819_vm2, %v1815_v51, %v6911_v47  ;;  %v1821_v60 = vsel %vm1819_vm2, %v1816_v54, %v6912_v34  ;;  %v7099_v56 = vld [vmem:[#allocation4 + $0x68] ss:$16 sps:$4 sm:$0xff]   ;;  %2238 = vmatprep.subr.bf16.mxu1 %v7098_v31  ;;  %v7104_v34 = vld [vmem:[#allocation4 + $0x84] ss:$16 sps:$4 sm:$0xff]   ;;  %v7107_v47 = vld [vmem:[#allocation4 + $0x8c] ss:$16 sps:$4 sm:$0xff]  }
 0x6da   : > { %v1824_v50 = vpack.c.bf16 %v1821_v60, %v1820_v58  ;;  %v7102_v51 = vld [vmem:[#allocation4 + $0x80] ss:$16 sps:$4 sm:$0xff]   ;;  %v7105_v54 = vld [vmem:[#allocation4 + $0x88] ss:$16 sps:$4 sm:$0xff]   ;;  %v7110_v55 = vld [vmem:[#allocation4 + $0xa4] ss:$16 sps:$4 sm:$0xff]  }
 0x6db   : > { %v7113_v57 = vld [vmem:[#allocation4 + $0xac] ss:$16 sps:$4 sm:$0xff]   ;;  %v7111_v58 = vld [vmem:[#allocation4 + $0xa8] ss:$16 sps:$4 sm:$0xff]   ;;  %v7114_v60 = vld [vmem:[#allocation4 + $0xc0] ss:$16 sps:$4 sm:$0xff]  }
 0x6dc   : > { %6613 = vmatprep.mubr.bf16.mxu0 %v1824_v50  ;;  %2239 = vmatpush1.bf16.msra.mxu1 %v7096_v46  ;;  %v7116_v50 = vld [vmem:[#allocation4 + $0xc4] ss:$16 sps:$4 sm:$0xff]   ;;  %v7131_v46 = vld [vmem:[#allocation6 + $0xc8] sm:$0xff]  }
 0x6dd   : > { %6614 = vmatmul.mubr.bf16.vlgmr.msra.gmra.mrb[24].mxu0 %v1825_v36  ;;  %2240 = vmatprep.subr.bf16.mxu1 %v7104_v34  ;;  %v7108_v36 = vld [vmem:[#allocation4 + $0xa0] ss:$16 sps:$4 sm:$0xff]   ;;  %v7133_v34 = vld [vmem:[#allocation6 + $0x88] sm:$0xff]  }
 0x6de   : > { %2317 = vmatprep.mubr.bf16.mxu0 %v9622_v39  ;;  %2286 = vmatpush1.bf16.msra.mxu0 %v7081_v12  ;;  %v7127_v31 = vld [vmem:[#allocation6 + $0xc0] sm:$0xff]  }
 0x6df   : > { %2287 = vmatprep.subr.bf16.mxu0 %v7089_v9 }
 0x6e0   : > { %2241 = vmatpush1.bf16.msra.mxu1 %v7102_v51  ;;  %v7135_v51 = vld [vmem:[#allocation6 + $0xd0] sm:$0xff]  }
 0x6e1   : > { %2242 = vmatprep.subr.bf16.mxu1 %v7110_v55  ;;  %v7137_v55 = vld [vmem:[#allocation6 + $0x90] sm:$0xff]  }
 0x6e2   : > { %2288 = vmatpush1.bf16.msra.mxu0 %v7087_v23 }
 0x6e3   : > { %2289 = vmatprep.subr.bf16.mxu0 %v7095_v20 }
 0x6e4   : > { %2243 = vmatpush1.bf16.msra.mxu1 %v7108_v36  ;;  %v7139_v36 = vld [vmem:[#allocation6 + $0xd8] sm:$0xff]  }
 0x6e5   : > { %2244 = vmatprep.subr.bf16.mxu1 %v7116_v50  ;;  %v7142_v50 = vld [vmem:[#allocation6 + $0x60] sm:$0xff]  }
 0x6e6   : > { %2290 = vmatpush1.bf16.msra.mxu0 %v7093_v63  ;;  %v7126_v63 = vld [vmem:[#allocation6 + $0x40] sm:$0xff]  }
 0x6e7   : > { %2291 = vmatprep.subr.bf16.mxu0 %v7101_v44  ;;  %v7129_v44 = vld [vmem:[#allocation6 + $0x80] sm:$0xff]  }
 0x6e8   : > { %2245 = vmatpush1.bf16.msra.mxu1 %v7114_v60  ;;  %v7141_v60 = vld [vmem:[#allocation6 + $0x98] sm:$0xff]  }
 0x6ea   : > { %2292 = vmatpush1.bf16.msra.mxu0 %v7099_v56  ;;  %v7132_v56 = vld [vmem:[#allocation6 + $0x8] sm:$0xff]  }
 0x6eb   : > { %2293 = vmatprep.subr.bf16.mxu0 %v7107_v47  ;;  %v7134_v47 = vld [vmem:[#allocation6 + $0x50] sm:$0xff]  }
 0x6ee   : > { %2294 = vmatpush1.bf16.msra.mxu0 %v7105_v54  ;;  %v7136_v54 = vld [vmem:[#allocation6 + $0x10] sm:$0xff]  }
 0x6ef   : > { %2295 = vmatprep.subr.bf16.mxu0 %v7113_v57  ;;  %v7138_v57 = vld [vmem:[#allocation6 + $0x58] sm:$0xff]  }
 0x6f2   : > { %2296 = vmatpush1.bf16.msra.mxu0 %v7111_v58  ;;  %v7140_v58 = vld [vmem:[#allocation6 + $0x18] sm:$0xff]  }
 0x7b0   : > { %v6615_v26 = vpop.f32.mrb[24].mxu0 }
 0x7b1   : > { %v1931_v61 = vpop.f32.mrb[25].mxu0  ;;  %v1940_v1 = vadd.f32 %v6615_v26, %v6057_v43  ;;  %v7119_v26 = vld [vmem:[#allocation4 + $0xcc] ss:$16 sps:$4 sm:$0xff]  }
 0x7b2   : > { %v1932_v24 = vadd.f32 %v6057_v43, %v1931_v61  ;;  %v6616_v41 = vpop.f32.mrb[26].mxu0  ;;  %v7122_v61 = vld [vmem:[#allocation4 + $0xe4] ss:$16 sps:$4 sm:$0xff]   ;;  %2297 = vmatprep.subr.bf16.mxu0 %v7119_v26 }
 0x7b3   : > { %v1934_v0 = vpop.f32.mrb[27].mxu0  ;;  %v8362_v62 = vadd.f32 %v7600_v14, %v1940_v1  ;;  %v1943_v49 = vadd.f32 %v6616_v41, %v6057_v43  ;;  %v7120_v41 = vld [vmem:[#allocation4 + $0xe0] ss:$16 sps:$4 sm:$0xff]   ;;  %2246 = vmatprep.subr.bf16.mxu1 %v7122_v61 }
 0x7b4   : > { %v8355_v4 = vadd.f32 %v7598_v3, %v1932_v24  ;;  %v1935_v52 = vadd.f32 %v6057_v43, %v1934_v0  ;;  %v7117_v43 = vld [vmem:[#allocation4 + $0xc8] ss:$16 sps:$4 sm:$0xff]   ;;  %v7125_v24 = vld [vmem:[#allocation4 + $0xec] ss:$16 sps:$4 sm:$0xff]   ;;  %2247 = vmatpush1.bf16.msra.mxu1 %v7120_v41  ;;  %v7144_v26 = vld [vmem:[#allocation6 + $0x20] sm:$0xff]  }
 0x7b5   : > { %9668 = vst [vmem:[#allocation19_spill] sm:$0xff] %v8362_v62  ;;  %v8367_v6 = vadd.f32 %v7601_v5, %v1943_v49  ;;  %2298 = vmatpush1.bf16.msra.mxu0 %v7117_v43  ;;  %v7123_v0 = vld [vmem:[#allocation4 + $0xe8] ss:$16 sps:$4 sm:$0xff]   ;;  %6349 = vmatprep.subr.bf16.mxu1 %v7126_v63  ;;  %v7143_v43 = vld [vmem:[#allocation6 + $0xe0] sm:$0xff]  }
 0x7b6   : > { %9666 = vst [vmem:[#allocation17_spill] sm:$0xff] %v8355_v4  ;;  %v8358_v2 = vadd.f32 %v7599_v10, %v1935_v52  ;;  %1952 = vadd.xlane.f32.xlu0 %v8355_v4  ;;  %2299 = vmatprep.subr.bf16.mxu0 %v7125_v24  ;;  %v7145_v61 = vld [vmem:[#allocation6 + $0xa0] sm:$0xff]   ;;  %v7146_v24 = vld [vmem:[#allocation6 + $0x68] sm:$0xff]  }
 0x7b7   : > { %9669 = vst [vmem:[#allocation20_spill] sm:$0xff] %v8367_v6  ;;  %v7147_v41 = vld [vmem:[#allocation6 + $0xe8] sm:$0xff]  }
 0x7b8   : > { %9667 = vst [vmem:[#allocation18_spill] sm:$0xff] %v8358_v2  ;;  %1954 = vadd.xlane.f32.xlu1 %v8358_v2 }
 0x7b9   : > { %2300 = vmatpush1.bf16.msra.mxu0 %v7123_v0  ;;  %v7148_v0 = vld [vmem:[#allocation6 + $0x28] sm:$0xff]  }
 0x7ba   : > { %1956 = vadd.xlane.f32.xlu0 %v8362_v62  ;;  %6377 = vmatprep.subr.bf16.mxu0 %v7127_v31 }
 0x7be   : > { %1958 = vadd.xlane.f32.xlu0 %v8367_v6 }
 0x843   : > { %v1953_v25 = vpop.xlane.xlu0 %1952 }
 0x844   : > { %v1960_v28 = vmul.f32 0.0078125, %v1953_v25 }
 0x845   : > { %v1955_v29 = vpop.xlane.xlu1 %1954 }
 0x846   : > { %v8371_v32 = vsub.f32 %v8355_v4, %v1960_v28  ;;  %v1961_v33 = vmul.f32 0.0078125, %v1955_v29 }
 0x847   : > { %v1957_v35 = vpop.xlane.xlu0 %1956 }
 0x848   : > { %v8374_v37 = vsub.f32 %v8358_v2, %v1961_v33  ;;  %v1962_v22 = vmul.f32 0.0078125, %v1957_v35  ;;  %v1968_v38 = vmul.f32 %v8371_v32, %v8371_v32  ;;  %v6067_v35 = vld [vmem:[%s9608_s9] ss:$0 sm:$0xff] }
 0x84a   : > { %v8379_v27 = vsub.f32 %v8362_v62, %v1962_v22  ;;  %1972 = vadd.xlane.f32.xlu0 %v1968_v38  ;;  %v1969_v45 = vmul.f32 %v8374_v37, %v8374_v37 }
 0x84b   : > { %v1959_v7 = vpop.xlane.xlu0 %1958 }
 0x84c   : > { %v1963_v18 = vmul.f32 0.0078125, %v1959_v7  ;;  %1974 = vadd.xlane.f32.xlu1 %v1969_v45  ;;  %v1970_v40 = vmul.f32 %v8379_v27, %v8379_v27 }
 0x84e   : > { %v8386_v42 = vsub.f32 %v8367_v6, %v1963_v18  ;;  %1976 = vadd.xlane.f32.xlu0 %v1970_v40 }
 0x850   : > { %v1971_v11 = vmul.f32 %v8386_v42, %v8386_v42 }
 0x852   : > { %1978 = vadd.xlane.f32.xlu1 %v1971_v11 }
 0x8d7   : > { %v1973_v1 = vpop.xlane.xlu0 %1972 }
 0x8d8   : > { %v1980_v3 = vmul.f32 0.0078125, %v1973_v1  ;;  %v7149_v1 = vld [vmem:[#allocation6 + $0xa8] sm:$0xff]  }
 0x8d9   : > { %v1975_v52 = vpop.xlane.xlu1 %1974 }
 0x8da   : > { %v1984_v10 = vadd.f32 1e-05, %v1980_v3  ;;  %v1981_v14 = vmul.f32 0.0078125, %v1975_v52  ;;  %v7150_v3 = vld [vmem:[#allocation6 + $0x70] sm:$0xff]  }
 0x8db   : > { %v1977_v49 = vpop.xlane.xlu0 %1976  ;;  %v7151_v52 = vld [vmem:[#allocation6 + $0xf0] sm:$0xff]  }
 0x8dc   : > { %7374 = vrsqrt.f32 %v1984_v10  ;;  %v1985_v5 = vadd.f32 1e-05, %v1981_v14  ;;  %v1982_v48 = vmul.f32 0.0078125, %v1977_v49  ;;  %v7152_v10 = vld [vmem:[#allocation6 + $0x30] sm:$0xff]   ;;  %v7154_v49 = vld [vmem:[#allocation6 + $0x78] sm:$0xff]  }
 0x8dd   : > { %v7153_v14 = vld [vmem:[#allocation6 + $0xb0] sm:$0xff]  }
 0x8de   : > { %7376 = vrsqrt.f32 %v1985_v5  ;;  %v1986_v8 = vadd.f32 1e-05, %v1982_v48  ;;  %v7155_v5 = vld [vmem:[#allocation6 + $0xf8] sm:$0xff]  }
 0x8df   : > { %v1979_v12 = vpop.xlane.xlu1 %1978  ;;  %v7156_v48 = vld [vmem:[#allocation6 + $0x38] sm:$0xff]  }
 0x8e0   : > { %7378 = vrsqrt.f32 %v1986_v8  ;;  %v1983_v53 = vmul.f32 0.0078125, %v1979_v12  ;;  %v7157_v8 = vld [vmem:[#allocation6 + $0xb8] sm:$0xff]   ;;  %v2050_v12 = vld [vmem:[%s9610_s11] sm:$0xf] }
 0x8e2   : > { %v1987_v16 = vadd.f32 1e-05, %v1983_v53  ;;  %v9621_v53 = vsub.s32 3, %v8018_v13 }
 0x8e4   : > { %7380 = vrsqrt.f32 %v1987_v16  ;;  %v8407_v16 = vrot.slane %v2050_v12, %v8021_v15 }
 0x8e6   : > { %v7375_v9 = vpop.eup %7374 }
 0x8e7   : > { %v1992_v23 = vmul.f32 %v7375_v9, %v8371_v32  ;;  %v8410_v9 = vrot.slane %v2050_v12, %v8031_v19 }
 0x8e8   : > { %v7377_v25 = vpop.eup %7376 }
 0x8e9   : > { %v1993_v28 = vmul.f32 %v7377_v25, %v8374_v37  ;;  %v2002_v29 = vmul.f32 %v6066_v21, %v1992_v23  ;;  %v8417_v23 = vrot.slane %v2050_v12, %v9621_v53 }
 0x8ea   : > { %v7379_v33 = vpop.eup %7378 }
 0x8eb   : > { %v2003_v22 = vmul.f32 %v6066_v21, %v1993_v28  ;;  %v2012_v38 = vadd.f32 %v6067_v35, %v2002_v29  ;;  %v1994_v7 = vmul.f32 %v7379_v33, %v8379_v27  ;;  %v7128_v27 = vld [vmem:[#allocation6] sm:$0xff]  }
 0x8ed   : > { %v2013_v45 = vadd.f32 %v6067_v35, %v2003_v22  ;;  %v2004_v32 = vmul.f32 %v6066_v21, %v1994_v7 }
 0x8ee   : > { %v7381_v18 = vpop.eup %7380 }
 0x8ef   : > { %v2016_v40 = vpack.c.bf16 %v2013_v45, %v2012_v38  ;;  %v1995_v11 = vmul.f32 %v7381_v18, %v8386_v42  ;;  %v2014_v20 = vadd.f32 %v6067_v35, %v2004_v32  ;;  %v7130_v42 = vld [vmem:[#allocation6 + $0x48] sm:$0xff]  }
 0x8f1   : > { %2265 = vmatmul.mubr.bf16.vlgmr.msra.gmra.mrb[20].mxu1 %v2016_v40  ;;  %2318 = vmatmul.mubr.bf16.vlgmr.msra.gmra.mrb[28].mxu0 %v2016_v40  ;;  %v2005_v59 = vmul.f32 %v6066_v21, %v1995_v11  ;;  %v8413_v21 = vrot.slane %v2050_v12, %v8027_v17 }
 0x8f2   : > { %2274 = vmatprep.mubr.bf16.mxu1 %v9622_v39  ;;  %2327 = vmatprep.mubr.bf16.mxu0 %v9622_v39 }
 0x8f3   : > { %v2015_v37 = vadd.f32 %v6067_v35, %v2005_v59  ;;  %6350 = vmatpush3.bf16.msra.mxu1 %v7128_v27  ;;  %6378 = vmatpush3.bf16.msra.mxu0 %v7129_v44 }
 0x8f4   : > { %6351 = vmatprep.subr.bf16.mxu1 %v7130_v42  ;;  %6379 = vmatprep.subr.bf16.mxu0 %v7131_v46 }
 0x8f5   : > { %v2017_v30 = vpack.c.bf16 %v2015_v37, %v2014_v20 }
 0x8f7   : > { %6352 = vmatpush3.bf16.msra.mxu1 %v7132_v56  ;;  %6380 = vmatpush3.bf16.msra.mxu0 %v7133_v34 }
 0x8f8   : > { %6353 = vmatprep.subr.bf16.mxu1 %v7134_v47  ;;  %6381 = vmatprep.subr.bf16.mxu0 %v7135_v51 }
 0x8f9   : > { %2275 = vmatmul.mubr.bf16.gmra.mrb[24].mxu1 %v2017_v30  ;;  %2328 = vmatmul.mubr.bf16.gmra.mrb[32].mxu0 %v2017_v30 }
 0x8fb   : > { %6354 = vmatpush3.bf16.msra.mxu1 %v7136_v54  ;;  %6382 = vmatpush3.bf16.msra.mxu0 %v7137_v55 }
 0x8fc   : > { %6355 = vmatprep.subr.bf16.mxu1 %v7138_v57  ;;  %6383 = vmatprep.subr.bf16.mxu0 %v7139_v36 }
 0x8ff   : > { %6356 = vmatpush3.bf16.msra.mxu1 %v7140_v58  ;;  %6384 = vmatpush3.bf16.msra.mxu0 %v7141_v60 }
 0x900   : > { %6357 = vmatprep.subr.bf16.mxu1 %v7142_v50  ;;  %6385 = vmatprep.subr.bf16.mxu0 %v7143_v43 }
 0x903   : > { %6358 = vmatpush3.bf16.msra.mxu1 %v7144_v26  ;;  %6386 = vmatpush3.bf16.msra.mxu0 %v7145_v61 }
 0x904   : > { %6359 = vmatprep.subr.bf16.mxu1 %v7146_v24  ;;  %6387 = vmatprep.subr.bf16.mxu0 %v7147_v41 }
 0x907   : > { %6360 = vmatpush3.bf16.msra.mxu1 %v7148_v0  ;;  %6388 = vmatpush3.bf16.msra.mxu0 %v7149_v1 }
 0x908   : > { %6361 = vmatprep.subr.bf16.mxu1 %v7150_v3  ;;  %6389 = vmatprep.subr.bf16.mxu0 %v7151_v52 }
 0x90b   : > { %6362 = vmatpush3.bf16.msra.mxu1 %v7152_v10  ;;  %6390 = vmatpush3.bf16.msra.mxu0 %v7153_v14 }
 0x90c   : > { %6363 = vmatprep.subr.bf16.mxu1 %v7154_v49  ;;  %6391 = vmatprep.subr.bf16.mxu0 %v7155_v5 }
 0x90f   : > { %6364 = vmatpush3.bf16.msra.mxu1 %v7156_v48  ;;  %6392 = vmatpush3.bf16.msra.mxu0 %v7157_v8 }
 0x9c4   : > { %v2266_v25 = vpop.f32.mrb[20].mxu1  ;;  %v2319_v28 = vpop.f32.mrb[28].mxu0 }
 0x9c5   : > { %v8420_v29 = vadd.f32 %v2266_v25, %v8407_v16  ;;  %v8423_v33 = vadd.f32 %v2319_v28, %v8410_v9  ;;  %v2268_v35 = vpop.f32.mrb[21].mxu1  ;;  %v2321_v22 = vpop.f32.mrb[29].mxu0 }
 0x9c6   : > { %v8426_v38 = vadd.f32 %v2268_v35, %v8413_v21  ;;  %v8429_v45 = vadd.f32 %v2321_v22, %v8417_v23  ;;  %v2270_v7 = vpop.f32.mrb[22].mxu1  ;;  %v2323_v18 = vpop.f32.mrb[30].mxu0 }
 0x9c7   : > { %v8432_v40 = vmul.f32 0.70710677, %v8420_v29  ;;  %v8435_v11 = vmul.f32 0.70710677, %v8423_v33  ;;  %v2272_v34 = vpop.f32.mrb[23].mxu1  ;;  %v2325_v47 = vpop.f32.mrb[31].mxu0  ;;  %v8456_v57 = vadd.f32 %v2270_v7, %v8407_v16  ;;  %v8463_v60 = vadd.f32 %v2323_v18, %v8410_v9 }
 0x9c8   : > { %v8438_v32 = vmul.f32 0.70710677, %v8426_v38  ;;  %v8441_v59 = vmul.f32 0.70710677, %v8429_v45  ;;  %v8473_v24 = vadd.f32 %v2272_v34, %v8413_v21  ;;  %v8484_v10 = vadd.f32 %v2325_v47, %v8417_v23 }
 0x9c9   : > { %v2370_v37 = vand.u32 2147483647, %v8432_v40  ;;  %v2372_v20 = vand.u32 2147483647, %v8435_v11  ;;  %v8470_v61 = vmul.f32 0.70710677, %v8456_v57 }
 0x9ca   : > { %v8446_v30 = vand.u32 2147483647, %v8438_v32  ;;  %v8449_v63 = vand.u32 2147483647, %v8441_v59  ;;  %v8480_v3 = vmul.f32 0.70710677, %v8463_v60 }
 0x9cb   : > { %v2386_v31 = vmul.f32 0.3275911, %v2370_v37  ;;  %v2388_v27 = vmul.f32 0.3275911, %v2372_v20  ;;  %v2594_v1 = vsub.f32 0.0, %v2370_v37  ;;  %v2596_v14 = vsub.f32 0.0, %v2372_v20 }
 0x9cc   : > { %v2387_v44 = vmul.f32 0.3275911, %v8446_v30  ;;  %v2389_v56 = vmul.f32 0.3275911, %v8449_v63  ;;  %v2276_v51 = vpop.f32.mrb[24].mxu1  ;;  %v8453_v54 = vpop.f32.mrb[32].mxu0 }
 0x9cd   : > { %v2402_v42 = vadd.f32 1.0, %v2386_v31  ;;  %v2404_v46 = vadd.f32 1.0, %v2388_v27  ;;  %v8458_v36 = vpop.f32.mrb[25].mxu1  ;;  %v8460_v58 = vpop.f32.mrb[33].mxu0  ;;  %v2374_v52 = vand.u32 2147483647, %v8470_v61  ;;  %v2610_v8 = vmul.f32 %v2594_v1, %v2370_v37 }
 0x9ce   : > { %v2403_v55 = vadd.f32 1.0, %v2387_v44  ;;  %v8465_v50 = vpop.f32.mrb[26].mxu1  ;;  %v8467_v43 = vpop.f32.mrb[34].mxu0  ;;  %v2405_v26 = vadd.f32 1.0, %v2389_v56  ;;  %v2376_v49 = vand.u32 2147483647, %v8480_v3  ;;  %v2612_v22 = vmul.f32 %v2596_v14, %v2372_v20 }
 0x9cf   : > { %7382 = vrcp.f32 %v2402_v42  ;;  %v8475_v41 = vpop.f32.mrb[27].mxu1  ;;  %v8477_v0 = vpop.f32.mrb[35].mxu0  ;;  %v8488_v5 = vmul.f32 0.70710677, %v8473_v24  ;;  %v2390_v48 = vmul.f32 0.3275911, %v2374_v52  ;;  %v8508_v14 = vadd.f32 %v2276_v51, %v8407_v16 }
 0x9d0   : > { %7384 = vrcp.f32 %v2404_v46  ;;  %v2392_v12 = vmul.f32 0.3275911, %v2376_v49  ;;  %v8492_v35 = vmul.f32 0.70710677, %v8484_v10  ;;  %v2598_v27 = vsub.f32 0.0, %v2374_v52 }
 0x9d1   : > { %7386 = vrcp.f32 %v2403_v55  ;;  %v2375_v25 = vand.u32 2147483647, %v8488_v5  ;;  %v2406_v28 = vadd.f32 1.0, %v2390_v48  ;;  %v2626_v46 = vmul.f32 1.442695, %v2610_v8  ;;  %9670 = vst [vmem:[#allocation21_spill] sm:$0xff] %v8508_v14 }
 0x9d2   : > { %7388 = vrcp.f32 %v2405_v26  ;;  %v2408_v7 = vadd.f32 1.0, %v2392_v12  ;;  %v8497_v44 = vand.u32 2147483647, %v8492_v35  ;;  %v2600_v47 = vsub.f32 0.0, %v2376_v49 }
 0x9d3   : > { %v2391_v18 = vmul.f32 0.3275911, %v2375_v25  ;;  %7390 = vrcp.f32 %v2406_v28  ;;  %v8505_v55 = vmul.f32 0.5, %v8420_v29  ;;  %v2630_v1 = vmul.f32 1.442695, %v2612_v22 }
 0x9d4   : > { %7392 = vrcp.f32 %v2408_v7  ;;  %v2393_v20 = vmul.f32 0.3275911, %v8497_v44  ;;  %v2614_v28 = vmul.f32 %v2598_v27, %v2374_v52  ;;  %v2595_v29 = vsub.f32 0.0, %v8446_v30 }
 0x9d5   : > { %v2407_v56 = vadd.f32 1.0, %v2391_v18  ;;  %v8514_v18 = vmul.f32 0.5, %v8423_v33  ;;  %v2616_v22 = vmul.f32 %v2600_v47, %v2376_v49  ;;  %vm2690_vm3 = vcmp.ge.f32.partialorder %v8432_v40, 0.0 }
 0x9d6   : > { %v2409_v8 = vadd.f32 1.0, %v2393_v20  ;;  %v2634_v20 = vmul.f32 1.442695, %v2614_v28  ;;  %vm2692_vm4 = vcmp.ge.f32.partialorder %v8435_v11, 0.0  ;;  %vm2694_vm5 = vcmp.ge.f32.partialorder %v8470_v61, 0.0 }
 0x9d7   : > { %7394 = vrcp.f32 %v2407_v56  ;;  %vm2696_vm6 = vcmp.ge.f32.partialorder %v8480_v3, 0.0  ;;  %v8595_v61 = vadd.f32 %v8458_v36, %v8413_v21  ;;  %vm2695_vm7 = vcmp.ge.f32.partialorder %v8488_v5, 0.0 }
 0x9d8   : > { %7396 = vpow2.f32 %v2626_v46  ;;  %vm2691_vm8 = vcmp.ge.f32.partialorder %v8438_v32, 0.0  ;;  %vm2693_vm9 = vcmp.ge.f32.partialorder %v8441_v59, 0.0  ;;  %vm2697_vm10 = vcmp.ge.f32.partialorder %v8492_v35, 0.0 }
 0x9d9   : > { %v8494_v31 = vpop.eup %7382  ;;  %7398 = vrcp.f32 %v2409_v8  ;;  %v2597_v8 = vsub.f32 0.0, %v8449_v63 }
 0x9da   : > { %v8499_v42 = vpop.eup %7384  ;;  %v2450_v37 = vmul.f32 1.0614054, %v8494_v31  ;;  %7400 = vpow2.f32 %v2630_v1 }
 0x9db   : > { %v2452_v34 = vmul.f32 1.0614054, %v8499_v42  ;;  %v8510_v48 = vpop.eup %7386  ;;  %7402 = vpow2.f32 %v2634_v20 }
 0x9dc   : > { %v2466_v26 = vadd.f32 -1.4531521, %v2450_v37  ;;  %v2451_v53 = vmul.f32 1.0614054, %v8510_v48  ;;  %v8518_v37 = vpop.eup %7388 }
 0x9dd   : > { %v2468_v12 = vadd.f32 -1.4531521, %v2452_v34  ;;  %v8522_v34 = vmul.f32 0.70710677, %v8508_v14  ;;  %v2453_v56 = vmul.f32 1.0614054, %v8518_v37  ;;  %v8530_v49 = vpop.eup %7390 }
 0x9de   : > { %v2482_v7 = vmul.f32 %v8494_v31, %v2466_v26  ;;  %v2467_v27 = vadd.f32 -1.4531521, %v2451_v53  ;;  %v2599_v26 = vsub.f32 0.0, %v2375_v25  ;;  %v2611_v53 = vmul.f32 %v2595_v29, %v8446_v30  ;;  %v8535_v1 = vpop.eup %7392 }
 0x9df   : > { %v2484_v51 = vmul.f32 %v8499_v42, %v2468_v12  ;;  %9671 = vst [vmem:[#allocation22_spill] sm:$0xff] %v8522_v34  ;;  %v2469_v46 = vadd.f32 -1.4531521, %v2453_v56  ;;  %v8528_v12 = vand.u32 2147483647, %v8522_v34  ;;  %v2601_v30 = vsub.f32 0.0, %v8497_v44 }
 0x9e0   : > { %v2498_v52 = vadd.f32 1.4214138, %v2482_v7  ;;  %v2483_v13 = vmul.f32 %v8510_v48, %v2467_v27  ;;  %v2638_v7 = vmul.f32 1.442695, %v2616_v22  ;;  %v2454_v27 = vmul.f32 1.0614054, %v8530_v49 }
 0x9e1   : > { %v2500_v33 = vadd.f32 1.4214138, %v2484_v51  ;;  %v2456_v19 = vmul.f32 1.0614054, %v8535_v1  ;;  %v2615_v17 = vmul.f32 %v2599_v26, %v2375_v25  ;;  %v2394_v29 = vmul.f32 0.3275911, %v8528_v12  ;;  %v8543_v22 = vpop.eup %7394 }
 0x9e2   : > { %v2514_v39 = vmul.f32 %v8494_v31, %v2498_v52  ;;  %v2499_v51 = vadd.f32 1.4214138, %v2483_v13  ;;  %v2485_v52 = vmul.f32 %v8518_v37, %v2469_v46  ;;  %v2470_v15 = vadd.f32 -1.4531521, %v2454_v27  ;;  %v7397_v26 = vpop.eup %7396 }
 0x9e3   : > { %v2516_v47 = vmul.f32 %v8499_v42, %v2500_v33  ;;  %v2613_v13 = vmul.f32 %v2597_v8, %v8449_v63  ;;  %v2472_v46 = vadd.f32 -1.4531521, %v2456_v19  ;;  %7404 = vpow2.f32 %v2638_v7  ;;  %v8551_v4 = vpop.eup %7398 }
 0x9e4   : > { %v2530_v28 = vadd.f32 -0.28449672, %v2514_v39  ;;  %v2515_v20 = vmul.f32 %v8510_v48, %v2499_v51  ;;  %v2501_v6 = vadd.f32 1.4214138, %v2485_v52  ;;  %v2486_v25 = vmul.f32 %v8530_v49, %v2470_v15  ;;  %v7401_v7 = vpop.eup %7400 }
 0x9e5   : > { %v2532_v56 = vadd.f32 -0.28449672, %v2516_v47  ;;  %v2488_v27 = vmul.f32 %v8535_v1, %v2472_v46  ;;  %v2455_v62 = vmul.f32 1.0614054, %v8543_v22  ;;  %v2636_v2 = vmul.f32 1.442695, %v2615_v17 }
 0x9e6   : > { %v2546_v33 = vmul.f32 %v8494_v31, %v2530_v28  ;;  %v2502_v63 = vadd.f32 1.4214138, %v2486_v25  ;;  %v2617_v19 = vmul.f32 %v2601_v30, %v8497_v44  ;;  %v2410_v8 = vadd.f32 1.0, %v2394_v29  ;;  %v7403_v25 = vpop.eup %7402 }
 0x9e7   : > { %v2548_v39 = vmul.f32 %v8499_v42, %v2532_v56  ;;  %v2504_v52 = vadd.f32 1.4214138, %v2488_v27  ;;  %v2471_v15 = vadd.f32 -1.4531521, %v2455_v62  ;;  %v2531_v46 = vadd.f32 -0.28449672, %v2515_v20 }
 0x9e8   : > { %v2562_v47 = vadd.f32 0.2548296, %v2546_v33  ;;  %v2457_v33 = vmul.f32 1.0614054, %v8551_v4  ;;  %v2517_v34 = vmul.f32 %v8518_v37, %v2501_v6  ;;  %v2518_v17 = vmul.f32 %v8530_v49, %v2502_v63 }
 0x9e9   : > { %v2564_v28 = vadd.f32 0.2548296, %v2548_v39  ;;  %v2628_v30 = vmul.f32 1.442695, %v2611_v53  ;;  %7406 = vpow2.f32 %v2636_v2  ;;  %v2547_v27 = vmul.f32 %v8510_v48, %v2531_v46 }
 0x9ea   : > { %v2578_v56 = vmul.f32 %v8494_v31, %v2562_v47  ;;  %v2520_v31 = vmul.f32 %v8535_v1, %v2504_v52  ;;  %v2487_v47 = vmul.f32 %v8543_v22, %v2471_v15  ;;  %v2473_v44 = vadd.f32 -1.4531521, %v2457_v33 }
 0x9eb   : > { %v2580_v51 = vmul.f32 %v8499_v42, %v2564_v28  ;;  %v2534_v29 = vadd.f32 -0.28449672, %v2518_v17  ;;  %v2640_v42 = vmul.f32 1.442695, %v2617_v19  ;;  %7408 = vrcp.f32 %v2410_v8 }
 0x9ec   : > { %v2658_v39 = vmul.f32 %v7397_v26, %v2578_v56  ;;  %v2536_v62 = vadd.f32 -0.28449672, %v2520_v31  ;;  %v2503_v28 = vadd.f32 1.4214138, %v2487_v47  ;;  %v2489_v26 = vmul.f32 %v8551_v4, %v2473_v44 }
 0x9ed   : > { %v2660_v14 = vmul.f32 %v7401_v7, %v2580_v51  ;;  %v2550_v56 = vmul.f32 %v8530_v49, %v2534_v29  ;;  %v7405_v63 = vpop.eup %7404  ;;  %v2533_v7 = vadd.f32 -0.28449672, %v2517_v34  ;;  %7410 = vpow2.f32 %v2628_v30 }
 0x9ee   : > { %v2674_v20 = vsub.f32 1.0, %v2658_v39  ;;  %v2552_v51 = vmul.f32 %v8535_v1, %v2536_v62  ;;  %v2519_v53 = vmul.f32 %v8543_v22, %v2503_v28  ;;  %v2505_v2 = vadd.f32 1.4214138, %v2489_v26 }
 0x9ef   : > { %v2676_v6 = vsub.f32 1.0, %v2660_v14  ;;  %v2632_v19 = vmul.f32 1.442695, %v2613_v13  ;;  %v2566_v52 = vadd.f32 0.2548296, %v2550_v56  ;;  %7412 = vpow2.f32 %v2640_v42 }
 0x9f0   : > { %v2568_v8 = vadd.f32 0.2548296, %v2552_v51  ;;  %v2535_v14 = vadd.f32 -0.28449672, %v2519_v53  ;;  %v2706_v15 = vsub.f32 0.0, %v2674_v20  ;;  %v2549_v46 = vmul.f32 %v8518_v37, %v2533_v7 }
 0x9f1   : > { %v2708_v33 = vsub.f32 0.0, %v2676_v6  ;;  %v2563_v39 = vadd.f32 0.2548296, %v2547_v27  ;;  %v2582_v34 = vmul.f32 %v8530_v49, %v2566_v52  ;;  %v2521_v47 = vmul.f32 %v8551_v4, %v2505_v2 }
 0x9f2   : > { %v2584_v17 = vmul.f32 %v8535_v1, %v2568_v8  ;;  %v2551_v31 = vmul.f32 %v8543_v22, %v2535_v14  ;;  %7414 = vpow2.f32 %v2632_v19  ;;  %v2342_v13 = vmul.f32 0.5, %v8456_v57 }
 0x9f3   : > { %v2662_v44 = vmul.f32 %v7403_v25, %v2582_v34  ;;  %v8576_v30 = vadd.f32 %v8453_v54, %v8410_v9  ;;  %v2344_v29 = vmul.f32 0.5, %v8463_v60  ;;  %v2537_v62 = vadd.f32 -0.28449672, %v2521_v47  ;;  %v7407_v28 = vpop.eup %7406 }
 0x9f4   : > { %v2664_v42 = vmul.f32 %v7405_v63, %v2584_v17  ;;  %v2567_v49 = vadd.f32 0.2548296, %v2551_v31  ;;  %v2722_v1 = vsel %vm2690_vm3, %v2674_v20, %v2706_v15  ;;  %v2724_v26 = vsel %vm2692_vm4, %v2676_v6, %v2708_v33 }
 0x9f5   : > { %v2678_v27 = vsub.f32 1.0, %v2662_v44  ;;  %v8584_v57 = vpop.eup %7408  ;;  %v2579_v54 = vmul.f32 %v8510_v48, %v2563_v39  ;;  %v2565_v25 = vadd.f32 0.2548296, %v2549_v46  ;;  %v2553_v40 = vmul.f32 %v8551_v4, %v2537_v62 }
 0x9f6   : > { %v2680_v56 = vsub.f32 1.0, %v2664_v42  ;;  %v2583_v60 = vmul.f32 %v8543_v22, %v2567_v49  ;;  %v8591_v20 = vmul.f32 0.70710677, %v8576_v30  ;;  %v2738_v11 = vadd.f32 1.0, %v2722_v1 }
 0x9f7   : > { %v2710_v63 = vsub.f32 0.0, %v2678_v27  ;;  %v2740_v6 = vadd.f32 1.0, %v2724_v26  ;;  %v7411_v48 = vpop.eup %7410  ;;  %v2569_v2 = vadd.f32 0.2548296, %v2553_v40  ;;  %v2581_v8 = vmul.f32 %v8518_v37, %v2565_v25 }
 0x9f8   : > { %v2712_v7 = vsub.f32 0.0, %v2680_v56  ;;  %v2663_v53 = vmul.f32 %v7407_v28, %v2583_v60  ;;  %v8598_v22 = vand.u32 2147483647, %v8591_v20  ;;  %v2659_v52 = vmul.f32 %v7411_v48, %v2579_v54 }
 0x9f9   : > { %v2726_v51 = vsel %vm2694_vm5, %v2678_v27, %v2710_v63  ;;  %v7413_v19 = vpop.eup %7412  ;;  %v2585_v39 = vmul.f32 %v8551_v4, %v2569_v2  ;;  %v2458_v36 = vmul.f32 1.0614054, %v8584_v57  ;;  %v8607_v46 = vmul.f32 %v2738_v11, %v8505_v55 }
 0x9fa   : > { %v2742_v14 = vadd.f32 1.0, %v2726_v51  ;;  %v2728_v15 = vsel %vm2696_vm6, %v2680_v56, %v2712_v7  ;;  %v2396_v34 = vmul.f32 0.3275911, %v8598_v22  ;;  %v8610_v17 = vmul.f32 %v2740_v6, %v8514_v18 }
 0x9fb   : > { %v2744_v33 = vadd.f32 1.0, %v2728_v15  ;;  %v8615_v37 = vmul.f32 0.70710677, %v8595_v61  ;;  %v2679_v44 = vsub.f32 1.0, %v2663_v53  ;;  %v2665_v4 = vmul.f32 %v7413_v19, %v2585_v39 }
 0x9fc   : > { %v8612_v31 = vmul.f32 %v2742_v14, %v2342_v13  ;;  %v7415_v3 = vpop.eup %7414  ;;  %v2412_v42 = vadd.f32 1.0, %v2396_v34  ;;  %v2675_v18 = vsub.f32 1.0, %v2659_v52  ;;  %v2474_v28 = vadd.f32 -1.4531521, %v2458_v36 }
 0x9fd   : > { %v8617_v47 = vmul.f32 %v2744_v33, %v2344_v29  ;;  %v2661_v49 = vmul.f32 %v7415_v3, %v2581_v8  ;;  %v8622_v55 = vand.u32 2147483647, %v8615_v37  ;;  %v2711_v29 = vsub.f32 0.0, %v2679_v44 }
 0x9fe   : > { %v2770_v62 = vpack.c.bf16 %v8612_v31, %v8607_v46  ;;  %7416 = vrcp.f32 %v2412_v42  ;;  %v2681_v26 = vsub.f32 1.0, %v2665_v4  ;;  %v8629_v25 = vadd.f32 %v8460_v58, %v8417_v23 }
 0x9ff   : > { %v2772_v13 = vpack.c.bf16 %v8617_v47, %v8610_v17  ;;  %v2395_v1 = vmul.f32 0.3275911, %v8622_v55  ;;  %v2677_v27 = vsub.f32 1.0, %v2661_v49  ;;  %v2707_v56 = vsub.f32 0.0, %v2675_v18 }
 0xa00   : > { %v2490_v60 = vmul.f32 %v8584_v57, %v2474_v28  ;;  %v8634_v63 = vadd.f32 %v8465_v50, %v8407_v16  ;;  %v8638_v40 = vadd.f32 %v8467_v43, %v8410_v9  ;;  %v2339_v11 = vmul.f32 0.5, %v8426_v38 }
 0xa01   : > { %v2411_v54 = vadd.f32 1.0, %v2395_v1  ;;  %v2341_v6 = vmul.f32 0.5, %v8429_v45  ;;  %v2727_v58 = vsel %vm2695_vm7, %v2679_v44, %v2711_v29  ;;  %v2713_v7 = vsub.f32 0.0, %v2681_v26 }
 0xa02   : > { %v8644_v48 = vmul.f32 0.70710677, %v8629_v25  ;;  %v8647_v51 = vmul.f32 0.70710677, %v8634_v63  ;;  %v2709_v16 = vsub.f32 0.0, %v2677_v27  ;;  %v2602_v9 = vsub.f32 0.0, %v8528_v12 }
 0xa03   : > { %7418 = vrcp.f32 %v2411_v54  ;;  %v8652_v38 = vmul.f32 0.70710677, %v8638_v40  ;;  %v2723_v45 = vsel %vm2691_vm8, %v2675_v18, %v2707_v56  ;;  %v2506_v50 = vadd.f32 1.4214138, %v2490_v60 }
 0xa04   : > { %v8655_v43 = vand.u32 2147483647, %v8644_v48  ;;  %v8658_v5 = vand.u32 2147483647, %v8647_v51  ;;  %v2743_v53 = vadd.f32 1.0, %v2727_v58  ;;  %v2343_v2 = vmul.f32 0.5, %v8473_v24 }
 0xa05   : > { %v8663_v32 = vand.u32 2147483647, %v8652_v38  ;;  %v2729_v19 = vsel %vm2697_vm10, %v2681_v26, %v2713_v7  ;;  %v2739_v15 = vadd.f32 1.0, %v2723_v45  ;;  %v2725_v33 = vsel %vm2693_vm9, %v2677_v27, %v2709_v16 }
 0xa06   : > { %v2397_v52 = vmul.f32 0.3275911, %v8655_v43  ;;  %v2398_v8 = vmul.f32 0.3275911, %v8658_v5  ;;  %v2618_v39 = vmul.f32 %v2602_v9, %v8528_v12  ;;  %v2522_v35 = vmul.f32 %v8584_v57, %v2506_v50 }
 0xa07   : > { %v2400_v59 = vmul.f32 0.3275911, %v8663_v32  ;;  %v8676_v24 = vadd.f32 %v8475_v41, %v8413_v21  ;;  %v2759_v3 = vmul.f32 %v2743_v53, %v2343_v2  ;;  %v2745_v44 = vadd.f32 1.0, %v2729_v19 }
 0xa08   : > { %v8668_v14 = vpop.eup %7416  ;;  %v2413_v34 = vadd.f32 1.0, %v2397_v52  ;;  %v2604_v4 = vsub.f32 0.0, %v8598_v22  ;;  %v2414_v42 = vadd.f32 1.0, %v2398_v8  ;;  %v2345_v49 = vmul.f32 0.5, %v8484_v10 }
 0xa09   : > { %v2460_v36 = vmul.f32 1.0614054, %v8668_v14  ;;  %v2416_v12 = vadd.f32 1.0, %v2400_v59  ;;  %v2755_v1 = vmul.f32 %v2739_v15, %v2339_v11  ;;  %v2741_v29 = vadd.f32 1.0, %v2725_v33 }
 0xa0a   : > { %7420 = vrcp.f32 %v2413_v34  ;;  %v2642_v26 = vmul.f32 1.442695, %v2618_v39  ;;  %v2538_v27 = vadd.f32 -0.28449672, %v2522_v35  ;;  %v8685_v54 = vmul.f32 0.70710677, %v8676_v24 }
 0xa0b   : > { %v2476_v18 = vadd.f32 -1.4531521, %v2460_v36  ;;  %7422 = vrcp.f32 %v2414_v42  ;;  %v2761_v56 = vmul.f32 %v2745_v44, %v2345_v49  ;;  %v2620_v10 = vmul.f32 %v2604_v4, %v8598_v22 }
 0xa0c   : > { %v8690_v60 = vadd.f32 %v8477_v0, %v8417_v23  ;;  %v2771_v58 = vpack.c.bf16 %v2759_v3, %v2755_v1  ;;  %7424 = vrcp.f32 %v2416_v12  ;;  %v8693_v16 = vand.u32 2147483647, %v8685_v54 }
 0xa0d   : > { %v8680_v28 = vpop.eup %7418  ;;  %v2492_v21 = vmul.f32 %v8668_v14, %v2476_v18  ;;  %v2757_v9 = vmul.f32 %v2741_v29, %v2341_v6  ;;  %7426 = vpow2.f32 %v2642_v26  ;;  %v2603_v45 = vsub.f32 0.0, %v8622_v55 }
 0xa0e   : > { %v2459_v41 = vmul.f32 1.0614054, %v8680_v28  ;;  %v8697_v50 = vmul.f32 0.70710677, %v8690_v60  ;;  %3073 = vmatprep.mubr.bf16.mxu1 %v2771_v58  ;;  %v2554_v22 = vmul.f32 %v8584_v57, %v2538_v27  ;;  %v2399_v53 = vmul.f32 0.3275911, %v8693_v16 }
 0xa0f   : > { %v2508_v11 = vadd.f32 1.4214138, %v2492_v21  ;;  %3074 = vmatmul.mubr.bf16.vlgmr.msra.gmra.mrb[28].mxu1 %v2770_v62  ;;  %v2646_v6 = vmul.f32 1.442695, %v2620_v10  ;;  %v2606_v2 = vsub.f32 0.0, %v8658_v5  ;;  %v2773_v52 = vpack.c.bf16 %v2761_v56, %v2757_v9 }
 0xa10   : > { %v2475_v7 = vadd.f32 -1.4531521, %v2459_v41  ;;  %v8708_v19 = vand.u32 2147483647, %v8697_v50  ;;  %v2415_v33 = vadd.f32 1.0, %v2399_v53  ;;  %v2619_v39 = vmul.f32 %v2603_v45, %v8622_v55 }
 0xa11   : > { %v2524_v23 = vmul.f32 %v8668_v14, %v2508_v11  ;;  %v2605_v59 = vsub.f32 0.0, %v8655_v43  ;;  %3122 = vmatprep.mubr.bf16.mxu0 %v2773_v52  ;;  %v2570_v46 = vadd.f32 0.2548296, %v2554_v22  ;;  %v2608_v62 = vsub.f32 0.0, %v8663_v32 }
 0xa12   : > { %v2491_v0 = vmul.f32 %v8680_v28, %v2475_v7  ;;  %v2401_v35 = vmul.f32 0.3275911, %v8708_v19  ;;  %7428 = vrcp.f32 %v2415_v33  ;;  %3123 = vmatmul.mubr.bf16.vlgmr.msra.gmra.mrb[36].mxu0 %v2772_v13  ;;  %v2622_v44 = vmul.f32 %v2606_v2, %v8658_v5 }
 0xa13   : > { %v2540_v8 = vadd.f32 -0.28449672, %v2524_v23  ;;  %7430 = vpow2.f32 %v2646_v6  ;;  %v2644_v18 = vmul.f32 1.442695, %v2619_v39  ;;  %v2621_v1 = vmul.f32 %v2605_v59, %v8655_v43 }
 0xa14   : > { %v2507_v15 = vadd.f32 1.4214138, %v2491_v0  ;;  %v8713_v36 = vpop.eup %7420  ;;  %v2417_v4 = vadd.f32 1.0, %v2401_v35  ;;  %v2586_v47 = vmul.f32 %v8584_v57, %v2570_v46  ;;  %v2624_v29 = vmul.f32 %v2608_v62, %v8663_v32 }
 0xa15   : > { %v8720_v34 = vpop.eup %7422  ;;  %v2556_v55 = vmul.f32 %v8668_v14, %v2540_v8  ;;  %v2461_v3 = vmul.f32 1.0614054, %v8713_v36  ;;  %v2650_v21 = vmul.f32 1.442695, %v2622_v44  ;;  %v2607_v43 = vsub.f32 0.0, %v8693_v16 }
 0xa16   : > { %v2523_v31 = vmul.f32 %v8680_v28, %v2507_v15  ;;  %v2462_v49 = vmul.f32 1.0614054, %v8720_v34  ;;  %7432 = vrcp.f32 %v2417_v4  ;;  %v8727_v17 = vpop.eup %7424  ;;  %v2648_v11 = vmul.f32 1.442695, %v2621_v1 }
 0xa17   : > { %v2477_v12 = vadd.f32 -1.4531521, %v2461_v3  ;;  %v7427_v26 = vpop.eup %7426  ;;  %v2572_v27 = vadd.f32 0.2548296, %v2556_v55  ;;  %v2464_v41 = vmul.f32 1.0614054, %v8727_v17  ;;  %7434 = vpow2.f32 %v2644_v18 }
 0xa18   : > { %v2539_v42 = vadd.f32 -0.28449672, %v2523_v31  ;;  %v2478_v13 = vadd.f32 -1.4531521, %v2462_v49  ;;  %v2666_v7 = vmul.f32 %v7427_v26, %v2586_v47  ;;  %v2654_v32 = vmul.f32 1.442695, %v2624_v29 }
 0xa19   : > { %v2493_v5 = vmul.f32 %v8713_v36, %v2477_v12  ;;  %v2480_v57 = vadd.f32 -1.4531521, %v2464_v41  ;;  %v2609_v45 = vsub.f32 0.0, %v8708_v19  ;;  %v2588_v22 = vmul.f32 %v8668_v14, %v2572_v27 }
 0xa1a   : > { %v2555_v56 = vmul.f32 %v8680_v28, %v2539_v42  ;;  %v2494_v10 = vmul.f32 %v8720_v34, %v2478_v13  ;;  %7436 = vpow2.f32 %v2650_v21  ;;  %v2623_v52 = vmul.f32 %v2607_v43, %v8693_v16 }
 0xa1b   : > { %v2509_v58 = vadd.f32 1.4214138, %v2493_v5  ;;  %v2496_v0 = vmul.f32 %v8727_v17, %v2480_v57  ;;  %7438 = vpow2.f32 %v2648_v11  ;;  %v2682_v59 = vsub.f32 1.0, %v2666_v7  ;;  %v9672_v11 = vld [vmem:[#allocation21_spill] sm:$0xff]  ;;  %v9673_v7 = vld [vmem:[#allocation22_spill] sm:$0xff] }
 0xa1c   : > { %v2510_v9 = vadd.f32 1.4214138, %v2494_v10  ;;  %v8740_v53 = vpop.eup %7428  ;;  %v2571_v6 = vadd.f32 0.2548296, %v2555_v56  ;;  %7440 = vpow2.f32 %v2654_v32  ;;  %v2625_v35 = vmul.f32 %v2609_v45, %v8708_v19 }
 0xa1d   : > { %v2525_v23 = vmul.f32 %v8713_v36, %v2509_v58  ;;  %v2512_v15 = vadd.f32 1.4214138, %v2496_v0  ;;  %v2463_v33 = vmul.f32 1.0614054, %v8740_v53  ;;  %v7431_v39 = vpop.eup %7430  ;;  %v2652_v44 = vmul.f32 1.442695, %v2623_v52 }
 0xa1e   : > { %v2526_v2 = vmul.f32 %v8720_v34, %v2510_v9  ;;  %v2668_v31 = vmul.f32 %v7431_v39, %v2588_v22  ;;  %v2587_v42 = vmul.f32 %v8680_v28, %v2571_v6  ;;  %v2714_v19 = vsub.f32 0.0, %v2682_v59 }
 0xa1f   : > { %v2541_v8 = vadd.f32 -0.28449672, %v2525_v23  ;;  %v2528_v55 = vmul.f32 %v8727_v17, %v2512_v15  ;;  %v2479_v3 = vadd.f32 -1.4531521, %v2463_v33  ;;  %v2656_v5 = vmul.f32 1.442695, %v2625_v35 }
 0xa20   : > { %v2542_v14 = vadd.f32 -0.28449672, %v2526_v2  ;;  %v8746_v46 = vpop.eup %7432  ;;  %v2684_v29 = vsub.f32 1.0, %v2668_v31  ;;  %7442 = vpow2.f32 %v2652_v44  ;;  %v2346_v57 = vmul.f32 0.5, %v9672_v11 }
 0xa21   : > { %v2557_v62 = vmul.f32 %v8713_v36, %v2541_v8  ;;  %v2465_v4 = vmul.f32 1.0614054, %v8746_v46  ;;  %v2544_v18 = vadd.f32 -0.28449672, %v2528_v55  ;;  %v2495_v12 = vmul.f32 %v8740_v53, %v2479_v3  ;;  %v7435_v13 = vpop.eup %7434 }
 0xa22   : > { %v2558_v16 = vmul.f32 %v8720_v34, %v2542_v14  ;;  %v2667_v10 = vmul.f32 %v7435_v13, %v2587_v42  ;;  %vm2698_vm11 = vcmp.ge.f32.partialorder %v9673_v7, 0.0  ;;  %v2716_v22 = vsub.f32 0.0, %v2684_v29 }
 0xa23   : > { %v2573_v49 = vadd.f32 0.2548296, %v2557_v62  ;;  %v2481_v47 = vadd.f32 -1.4531521, %v2465_v4  ;;  %v2560_v26 = vmul.f32 %v8727_v17, %v2544_v18  ;;  %v2511_v27 = vadd.f32 1.4214138, %v2495_v12 }
 0xa24   : > { %v2574_v1 = vadd.f32 0.2548296, %v2558_v16  ;;  %v7437_v56 = vpop.eup %7436  ;;  %7444 = vpow2.f32 %v2656_v5  ;;  %v2730_v0 = vsel %vm2698_vm11, %v2682_v59, %v2714_v19  ;;  %v2348_v8 = vmul.f32 0.5, %v8576_v30 }
 0xa25   : > { %v2589_v21 = vmul.f32 %v8713_v36, %v2573_v49  ;;  %v2497_v28 = vmul.f32 %v8746_v46, %v2481_v47  ;;  %v2576_v43 = vadd.f32 0.2548296, %v2560_v26  ;;  %v2527_v58 = vmul.f32 %v8740_v53, %v2511_v27  ;;  %v7439_v45 = vpop.eup %7438 }
 0xa26   : > { %v2590_v41 = vmul.f32 %v8720_v34, %v2574_v1  ;;  %v7441_v34 = vpop.eup %7440  ;;  %v2683_v15 = vsub.f32 1.0, %v2667_v10  ;;  %vm2700_vm12 = vcmp.ge.f32.partialorder %v8591_v20, 0.0  ;;  %vm2702_vm13 = vcmp.ge.f32.partialorder %v8647_v51, 0.0 }
 0xa27   : > { %v2513_v32 = vadd.f32 1.4214138, %v2497_v28  ;;  %v2592_v36 = vmul.f32 %v8727_v17, %v2576_v43  ;;  %v2543_v23 = vadd.f32 -0.28449672, %v2527_v58  ;;  %v2669_v6 = vmul.f32 %v7439_v45, %v2589_v21 }
 0xa28   : > { %v2670_v9 = vmul.f32 %v7437_v56, %v2590_v41  ;;  %v2746_v35 = vadd.f32 1.0, %v2730_v0  ;;  %v2732_v31 = vsel %vm2700_vm12, %v2684_v29, %v2716_v22  ;;  %v2350_v3 = vmul.f32 0.5, %v8634_v63 }
 0xa29   : > { %v2529_v52 = vmul.f32 %v8746_v46, %v2513_v32  ;;  %v2672_v33 = vmul.f32 %v7441_v34, %v2592_v36  ;;  %v2559_v39 = vmul.f32 %v8740_v53, %v2543_v23  ;;  %v2685_v55 = vsub.f32 1.0, %v2669_v6 }
 0xa2a   : > { %v2686_v2 = vsub.f32 1.0, %v2670_v9  ;;  %v2715_v44 = vsub.f32 0.0, %v2683_v15  ;;  %v7443_v20 = vpop.eup %7442  ;;  %v2748_v18 = vadd.f32 1.0, %v2732_v31  ;;  %vm2699_vm14 = vcmp.ge.f32.partialorder %v8615_v37, 0.0 }
 0xa2b   : > { %v2545_v17 = vadd.f32 -0.28449672, %v2529_v52  ;;  %v2688_v62 = vsub.f32 1.0, %v2672_v33  ;;  %v2575_v59 = vadd.f32 0.2548296, %v2559_v39  ;;  %vm2704_vm15 = vcmp.ge.f32.partialorder %v8652_v38, 0.0 }
 0xa2c   : > { %v2718_v14 = vsub.f32 0.0, %v2686_v2  ;;  %v2762_v12 = vmul.f32 %v2746_v35, %v2346_v57  ;;  %v2717_v63 = vsub.f32 0.0, %v2685_v55  ;;  %v2352_v13 = vmul.f32 0.5, %v8638_v40 }
 0xa2d   : > { %v2561_v30 = vmul.f32 %v8746_v46, %v2545_v17  ;;  %v2720_v42 = vsub.f32 0.0, %v2688_v62  ;;  %v2591_v49 = vmul.f32 %v8740_v53, %v2575_v59  ;;  %v2731_v5 = vsel %vm2699_vm14, %v2683_v15, %v2715_v44 }
 0xa2e   : > { %v2734_v16 = vsel %vm2702_vm13, %v2686_v2, %v2718_v14  ;;  %v7445_v27 = vpop.eup %7444  ;;  %v2764_v41 = vmul.f32 %v2748_v18, %v2348_v8  ;;  %vm2701_vm3 = vcmp.ge.f32.partialorder %v8644_v48, 0.0  ;;  %vm2703_vm4 = vcmp.ge.f32.partialorder %v8685_v54, 0.0 }
 0xa2f   : > { %v2750_v4 = vadd.f32 1.0, %v2734_v16  ;;  %v2577_v51 = vadd.f32 0.2548296, %v2561_v30  ;;  %v2736_v1 = vsel %vm2704_vm15, %v2688_v62, %v2720_v42  ;;  %v2671_v47 = vmul.f32 %v7443_v20, %v2591_v49  ;;  %v9676_v30 = vld [vmem:[#allocation18_spill] sm:$0xff] }
 0xa30   : > { %v2752_v29 = vadd.f32 1.0, %v2736_v1  ;;  %v2747_v56 = vadd.f32 1.0, %v2731_v5  ;;  %v2733_v10 = vsel %vm2701_vm3, %v2685_v55, %v2717_v63  ;;  %v2347_v11 = vmul.f32 0.5, %v8595_v61 }
 0xa31   : > { %v2766_v19 = vmul.f32 %v2750_v4, %v2350_v3  ;;  %v2593_v26 = vmul.f32 %v8746_v46, %v2577_v51  ;;  %v2687_v53 = vsub.f32 1.0, %v2671_v47  ;;  %v2351_v46 = vmul.f32 0.5, %v8676_v24  ;;  %v9675_v3 = vld [vmem:[#allocation17_spill] sm:$0xff] }
 0xa32   : > { %v2768_v28 = vmul.f32 %v2752_v29, %v2352_v13  ;;  %v2749_v9 = vadd.f32 1.0, %v2733_v10  ;;  %vm2705_vm5 = vcmp.ge.f32.partialorder %v8697_v50, 0.0  ;;  %v2763_v32 = vmul.f32 %v2747_v56, %v2347_v11  ;;  %v6100_v50 = vld [vmem:[%s9612_s13] ss:$0 sm:$0xff]  ;;  %v7163_v56 = vld [vmem:[#allocation2 + $0xdc] ss:$12 sps:$4 sm:$0xff]  }
 0xa33   : > { %v2774_v21 = vpack.c.bf16 %v2766_v19, %v2762_v12  ;;  %v2673_v37 = vmul.f32 %v7445_v27, %v2593_v26  ;;  %v2719_v38 = vsub.f32 0.0, %v2687_v53  ;;  %v2349_v54 = vmul.f32 0.5, %v8629_v25  ;;  %v7161_v10 = vld [vmem:[#allocation2 + $0xd8] ss:$12 sps:$4 sm:$0xff]  }
 0xa34   : > { %v2776_v58 = vpack.c.bf16 %v2768_v28, %v2764_v41  ;;  %v2353_v22 = vmul.f32 0.5, %v8690_v60  ;;  %v9674_v24 = vmov 0   ;;  %v9678_v41 = vld [vmem:[#allocation20_spill] sm:$0xff] }
 0xa35   : > { %v2689_v43 = vsub.f32 1.0, %v2673_v37  ;;  %v2735_v40 = vsel %vm2703_vm4, %v2687_v53, %v2719_v38  ;;  %v2765_v34 = vmul.f32 %v2749_v9, %v2349_v54  ;;  %v9677_v53 = vld [vmem:[#allocation19_spill] sm:$0xff]  ;;  %v7158_v37 = vld [vmem:[#allocation2 + $0xc0] ss:$12 sps:$4 sm:$0xff]  }
 0xa36   : > { %v2751_v57 = vadd.f32 1.0, %v2735_v40  ;;  %v7160_v38 = vld [vmem:[#allocation2 + $0xc4] ss:$12 sps:$4 sm:$0xff]   ;;  %v7170_v54 = vld [vmem:[#allocation2 + $0x10c] ss:$12 sps:$4 sm:$0xff]  }
 0xa37   : > { %v2721_v7 = vsub.f32 0.0, %v2689_v43  ;;  %3392 = vmatprep.subr.bf16.mxu1 %v7160_v38 }
 0xa38   : > { %v2767_v45 = vmul.f32 %v2751_v57, %v2351_v46  ;;  %3393 = vmatpush1.bf16.msra.mxu1 %v7158_v37 }
 0xa39   : > { %v2737_v48 = vsel %vm2705_vm5, %v2689_v43, %v2721_v7  ;;  %3394 = vmatprep.subr.bf16.mxu1 %v7163_v56 }
 0xa3a   : > { %v2753_v36 = vadd.f32 1.0, %v2737_v48  ;;  %v2775_v23 = vpack.c.bf16 %v2767_v45, %v2763_v32  ;;  %v7164_v32 = vld [vmem:[#allocation2 + $0xf0] ss:$12 sps:$4 sm:$0xff]   ;;  %v7166_v45 = vld [vmem:[#allocation2 + $0xf4] ss:$12 sps:$4 sm:$0xff]  }
 0xa3b   : > { %v7167_v48 = vld [vmem:[#allocation2 + $0xc8] ss:$12 sps:$4 sm:$0xff]  }
 0xa3c   : > { %v2769_v0 = vmul.f32 %v2753_v36, %v2353_v22  ;;  %3081 = vmatprep.mubr.bf16.mxu1 %v2775_v23  ;;  %3395 = vmatpush1.bf16.msra.mxu1 %v7161_v10  ;;  %v7171_v22 = vld [vmem:[#allocation2 + $0xe0] ss:$12 sps:$4 sm:$0xff]   ;;  %v7168_v36 = vld [vmem:[#allocation2 + $0x108] ss:$12 sps:$4 sm:$0xff]  }
 0xa3d   : > { %3082 = vmatmul.mubr.bf16.gmra.mrb[32].mxu1 %v2774_v21  ;;  %3396 = vmatprep.subr.bf16.mxu1 %v7166_v45  ;;  %v6137_v45 = vld [vmem:[%s9604_s5 + $0x3] sm:$0x7] }
 0xa3e   : > { %v2777_v61 = vpack.c.bf16 %v2769_v0, %v2765_v34  ;;  %3424 = vmatprep.mubr.bf16.mxu1 %v9674_v24  ;;  %6617 = vmatprep.subr.bf16.mxu0 %v7167_v48 }
 0xa3f   : > { %6618 = vmatpush3.bf16.msra.mxu0 %v7167_v48  ;;  %v9679_v48 = vld [vmem:[#allocation14_spill] sm:$0xff] }
 0xa40   : > { %3130 = vmatprep.mubr.bf16.mxu0 %v2777_v61  ;;  %3397 = vmatpush1.bf16.msra.mxu1 %v7164_v32 }
 0xa41   : > { %3131 = vmatmul.mubr.bf16.gmra.mrb[40].mxu0 %v2776_v58  ;;  %3398 = vmatprep.subr.bf16.mxu1 %v7170_v54  ;;  %v3252_v54 = vrot.slane %v6137_v45, %v9679_v48 }
 0xa42   : > { %6619 = vmatprep.subr.bf16.mxu0 %v7171_v22 }
 0xa43   : > { %6620 = vmatpush3.bf16.msra.mxu0 %v7171_v22 }
 0xa44   : > { %3399 = vmatpush1.bf16.msra.mxu1 %v7168_v36  ;;  %v9680_v36 = vld [vmem:[#allocation15_spill] sm:$0xff] }
 0xae2   : > { %v6365_v6 = vpop.f32.mrb[28].mxu1 }
 0xae3   : > { %v6366_v2 = vpop.f32.mrb[29].mxu1 }
 0xae4   : > { %v6367_v25 = vadd.f32 %v6366_v2, %v6365_v6  ;;  %v6368_v52 = vpop.f32.mrb[30].mxu1 }
 0xae5   : > { %v6369_v60 = vpop.f32.mrb[31].mxu1  ;;  %v6393_v8 = vpop.f32.mrb[36].mxu0 }
 0xae6   : > { %v3076_v15 = vadd.f32 %v6367_v25, %v6100_v50  ;;  %v6370_v33 = vadd.f32 %v6369_v60, %v6368_v52  ;;  %v6394_v39 = vpop.f32.mrb[37].mxu0  ;;  %v7174_v52 = vld [vmem:[#allocation2 + $0x124] ss:$12 sps:$4 sm:$0xff]  }
 0xae7   : > { %v6395_v14 = vadd.f32 %v6394_v39, %v6393_v8  ;;  %v6396_v17 = vpop.f32.mrb[38].mxu0  ;;  %v7175_v60 = vld [vmem:[#allocation2 + $0xf8] ss:$12 sps:$4 sm:$0xff]   ;;  %v7172_v8 = vld [vmem:[#allocation2 + $0x120] ss:$12 sps:$4 sm:$0xff]   ;;  %3400 = vmatprep.subr.bf16.mxu1 %v7174_v52 }
 0xae8   : > { %v3079_v35 = vadd.f32 %v6370_v33, %v6100_v50  ;;  %v6397_v31 = vpop.f32.mrb[39].mxu0  ;;  %6621 = vmatprep.subr.bf16.mxu0 %v7175_v60  ;;  %3401 = vmatpush1.bf16.msra.mxu1 %v7172_v8  ;;  %v7179_v33 = vld [vmem:[#allocation2 + $0x110] ss:$12 sps:$4 sm:$0xff]   ;;  %v7176_v39 = vld [vmem:[#allocation2 + $0x138] ss:$12 sps:$4 sm:$0xff]  }
 0xae9   : > { %v3125_v62 = vadd.f32 %v6395_v14, %v3076_v15  ;;  %v6398_v59 = vadd.f32 %v6397_v31, %v6396_v17  ;;  %6622 = vmatpush3.bf16.msra.mxu0 %v7175_v60  ;;  %v7178_v15 = vld [vmem:[#allocation2 + $0x13c] ss:$12 sps:$4 sm:$0xff]   ;;  %v7182_v14 = vld [vmem:[#allocation2 + $0x154] ss:$12 sps:$4 sm:$0xff]   ;;  %v7186_v31 = vld [vmem:[#allocation2 + $0x16c] ss:$12 sps:$4 sm:$0xff]  }
 0xaea   : > { %3402 = vmatprep.subr.bf16.mxu1 %v7178_v15  ;;  %6623 = vmatprep.subr.bf16.mxu0 %v7179_v33  ;;  %v7183_v17 = vld [vmem:[#allocation2 + $0x128] ss:$12 sps:$4 sm:$0xff]  }
 0xaeb   : > { %v3128_v55 = vadd.f32 %v6398_v59, %v3079_v35  ;;  %v8786_v16 = vadd.f32 %v3125_v62, %v9675_v3  ;;  %v7180_v35 = vld [vmem:[#allocation2 + $0x150] ss:$12 sps:$4 sm:$0xff]   ;;  %v7187_v62 = vld [vmem:[#allocation2 + $0x140] ss:$12 sps:$4 sm:$0xff]   ;;  %v7184_v59 = vld [vmem:[#allocation2 + $0x168] ss:$12 sps:$4 sm:$0xff]  }
 0xaec   : > { %3403 = vmatpush1.bf16.msra.mxu1 %v7176_v39  ;;  %v7189_v3 = vld [vmem:[#allocation2 + $0x170] ss:$12 sps:$4 sm:$0xff]  }
 0xaed   : > { %3147 = vadd.xlane.f32.xlu0 %v8786_v16  ;;  %v8790_v44 = vadd.f32 %v3128_v55, %v9676_v30  ;;  %6624 = vmatpush3.bf16.msra.mxu0 %v7179_v33  ;;  %v7188_v55 = vld [vmem:[#allocation2 + $0x158] ss:$12 sps:$4 sm:$0xff]  }
 0xaee   : > { %3404 = vmatprep.subr.bf16.mxu1 %v7182_v14  ;;  %6625 = vmatprep.subr.bf16.mxu0 %v7183_v17 }
 0xaef   : > { %3149 = vadd.xlane.f32.xlu1 %v8790_v44 }
 0xaf0   : > { %3405 = vmatpush1.bf16.msra.mxu1 %v7180_v35 }
 0xaf1   : > { %6626 = vmatpush3.bf16.msra.mxu0 %v7183_v17  ;;  %3406 = vmatprep.subr.bf16.mxu1 %v7186_v31  ;;  %v9681_v17 = vld [vmem:[#allocation16_spill] sm:$0xff] }
 0xaf2   : > { %6627 = vmatprep.subr.bf16.mxu0 %v7187_v62  ;;  %v3260_v35 = vrot.slane %v6137_v45, %v9681_v17 }
 0xaf4   : > { %3407 = vmatpush1.bf16.msra.mxu1 %v7184_v59 }
 0xaf5   : > { %6628 = vmatpush3.bf16.msra.mxu0 %v7187_v62 }
 0xaf6   : > { %6629 = vmatprep.subr.bf16.mxu0 %v7188_v55 }
 0xaf9   : > { %6630 = vmatpush3.bf16.msra.mxu0 %v7188_v55 }
 0xafa   : > { %6631 = vmatprep.subr.bf16.mxu0 %v7189_v3 }
 0xafd   : > { %6632 = vmatpush3.bf16.msra.mxu0 %v7189_v3 }
 0xb10   : > { %v6371_v4 = vpop.f32.mrb[32].mxu1 }
 0xb11   : > { %v6372_v42 = vpop.f32.mrb[33].mxu1 }
 0xb12   : > { %v6373_v49 = vadd.f32 %v6372_v42, %v6371_v4  ;;  %v6374_v20 = vpop.f32.mrb[34].mxu1 }
 0xb13   : > { %v6375_v51 = vpop.f32.mrb[35].mxu1 }
 0xb14   : > { %v6399_v18 = vpop.f32.mrb[40].mxu0  ;;  %v3084_v12 = vadd.f32 %v6373_v49, %v6100_v50  ;;  %v6376_v1 = vadd.f32 %v6375_v51, %v6374_v20 }
 0xb15   : > { %v6400_v19 = vpop.f32.mrb[41].mxu0 }
 0xb16   : > { %v6401_v47 = vadd.f32 %v6400_v19, %v6399_v18  ;;  %v6402_v63 = vpop.f32.mrb[42].mxu0  ;;  %v3087_v13 = vadd.f32 %v6376_v1, %v6100_v50 }
 0xb17   : > { %v6403_v29 = vpop.f32.mrb[43].mxu0 }
 0xb18   : > { %v3133_v26 = vadd.f32 %v6401_v47, %v3084_v12  ;;  %v6404_v27 = vadd.f32 %v6403_v29, %v6402_v63  ;;  %v6135_v12 = vld [vmem:[%s9601_s2 + $0x1] ss:$0 sm:$0xff] }
 0xb1a   : > { %v3136_v5 = vadd.f32 %v6404_v27, %v3087_v13  ;;  %v8794_v21 = vadd.f32 %v3133_v26, %v9677_v53  ;;  %v6136_v13 = vld [vmem:[%s9602_s3 + $0x1] ss:$0 sm:$0xff] }
 0xb1c   : > { %3151 = vadd.xlane.f32.xlu0 %v8794_v21  ;;  %v8798_v28 = vadd.f32 %v3136_v5, %v9678_v41 }
 0xb1e   : > { %3153 = vadd.xlane.f32.xlu1 %v8798_v28 }
 0xb7a   : > { %v3148_v43 = vpop.xlane.xlu0 %3147 }
 0xb7b   : > { %v3155_v58 = vmul.f32 0.0078125, %v3148_v43 }
 0xb7c   : > { %v3150_v40 = vpop.xlane.xlu1 %3149 }
 0xb7d   : > { %v8802_v11 = vsub.f32 %v8786_v16, %v3155_v58  ;;  %v3156_v46 = vmul.f32 0.0078125, %v3150_v40 }
 0xb7f   : > { %v8805_v57 = vsub.f32 %v8790_v44, %v3156_v46  ;;  %v3163_v7 = vmul.f32 %v8802_v11, %v8802_v11 }
 0xb81   : > { %3167 = vadd.xlane.f32.xlu0 %v3163_v7  ;;  %v3164_v9 = vmul.f32 %v8805_v57, %v8805_v57 }
 0xb83   : > { %3169 = vadd.xlane.f32.xlu1 %v3164_v9 }
 0xba9   : > { %v3152_v23 = vpop.xlane.xlu0 %3151 }
 0xbaa   : > { %v3157_v34 = vmul.f32 0.0078125, %v3152_v23  ;;  %v3256_v23 = vrot.slane %v6137_v45, %v9680_v36 }
 0xbab   : > { %v3154_v0 = vpop.xlane.xlu1 %3153 }
 0xbac   : > { %v8812_v61 = vsub.f32 %v8794_v21, %v3157_v34  ;;  %v3158_v6 = vmul.f32 0.0078125, %v3154_v0 }
 0xbae   : > { %v8815_v50 = vsub.f32 %v8798_v28, %v3158_v6  ;;  %v3165_v2 = vmul.f32 %v8812_v61, %v8812_v61 }
 0xbb0   : > { %3171 = vadd.xlane.f32.xlu0 %v3165_v2  ;;  %v3166_v25 = vmul.f32 %v8815_v50, %v8815_v50 }
 0xbb2   : > { %3173 = vadd.xlane.f32.xlu1 %v3166_v25 }
 0xc0e   : > { %v3168_v30 = vpop.xlane.xlu0 %3167 }
 0xc0f   : > { %v3175_v4 = vmul.f32 0.0078125, %v3168_v30 }
 0xc10   : > { %v3170_v42 = vpop.xlane.xlu1 %3169 }
 0xc11   : > { %v3179_v49 = vadd.f32 1e-05, %v3175_v4  ;;  %v3176_v20 = vmul.f32 0.0078125, %v3170_v42 }
 0xc13   : > { %7446 = vrsqrt.f32 %v3179_v49  ;;  %v3180_v18 = vadd.f32 1e-05, %v3176_v20 }
 0xc15   : > { %7448 = vrsqrt.f32 %v3180_v18 }
 0xc1d   : > { %v7447_v51 = vpop.eup %7446 }
 0xc1e   : > { %v3187_v19 = vmul.f32 %v7447_v51, %v8802_v11 }
 0xc1f   : > { %v7449_v1 = vpop.eup %7448 }
 0xc20   : > { %v3197_v47 = vmul.f32 %v6135_v12, %v3187_v19  ;;  %v3188_v63 = vmul.f32 %v7449_v1, %v8805_v57 }
 0xc22   : > { %v3198_v29 = vmul.f32 %v6135_v12, %v3188_v63  ;;  %v3207_v26 = vadd.f32 %v6136_v13, %v3197_v47 }
 0xc24   : > { %v3208_v27 = vadd.f32 %v6136_v13, %v3198_v29 }
 0xc26   : > { %v3211_v5 = vpack.c.bf16 %v3208_v27, %v3207_v26 }
 0xc28   : > { %3425 = vmatmul.mubr.bf16.vlgmr.msra.gmra.mrb[36].mxu1 %v3211_v5  ;;  %6633 = vmatprep.mubr.bf16.mxu0 %v3211_v5 }
 0xc29   : > { %3434 = vmatprep.mubr.bf16.mxu1 %v9674_v24 }
 0xc3d   : > { %v3172_v53 = vpop.xlane.xlu0 %3171 }
 0xc3e   : > { %v3177_v41 = vmul.f32 0.0078125, %v3172_v53 }
 0xc3f   : > { %v3174_v37 = vpop.xlane.xlu1 %3173 }
 0xc40   : > { %v3181_v38 = vadd.f32 1e-05, %v3177_v41  ;;  %v3178_v56 = vmul.f32 0.0078125, %v3174_v37 }
 0xc42   : > { %7450 = vrsqrt.f32 %v3181_v38  ;;  %v3182_v10 = vadd.f32 1e-05, %v3178_v56 }
 0xc44   : > { %7452 = vrsqrt.f32 %v3182_v10 }
 0xc4c   : > { %v7451_v43 = vpop.eup %7450 }
 0xc4d   : > { %v3189_v58 = vmul.f32 %v7451_v43, %v8812_v61 }
 0xc4e   : > { %v7453_v40 = vpop.eup %7452 }
 0xc4f   : > { %v3190_v11 = vmul.f32 %v7453_v40, %v8815_v50  ;;  %v3199_v46 = vmul.f32 %v6135_v12, %v3189_v58 }
 0xc51   : > { %v3200_v57 = vmul.f32 %v6135_v12, %v3190_v11  ;;  %v3209_v7 = vadd.f32 %v6136_v13, %v3199_v46 }
 0xc53   : > { %v3210_v9 = vadd.f32 %v6136_v13, %v3200_v57 }
 0xc55   : > { %v3212_v32 = vpack.c.bf16 %v3210_v9, %v3209_v7 }
 0xc57   : > { %3435 = vmatmul.mubr.bf16.gmra.mrb[40].mxu1 %v3212_v32  ;;  %6634 = vmatmul.mubr.bf16.vlgmr.msra.gmra.mrb[44].mxu0 %v3212_v32 }
 0xcfb   : > { %v3426_v22 = vpop.f32.mrb[36].mxu1 }
 0xcfc   : > { %v3427_v34 = vadd.f32 %v3426_v22, %v3252_v54  ;;  %v3428_v0 = vpop.f32.mrb[37].mxu1 }
 0xcfd   : > { %v3430_v61 = vpop.f32.mrb[38].mxu1  ;;  %v3429_v2 = vadd.f32 %v3428_v0, %v3256_v23 }
 0xcfe   : > { %v3431_v6 = vadd.f32 %v3430_v61, %v3252_v54  ;;  %v3432_v50 = vpop.f32.mrb[39].mxu1  ;;  %v3494_v52 = vmul.f32 0.17677669, %v3427_v34 }
 0xcff   : > { %v3433_v25 = vadd.f32 %v3432_v50, %v3256_v23 }
 0xd00   : > { %v3495_v60 = vmul.f32 0.17677669, %v3431_v6 }
 0xd01   : > { %v6918_v8 = vpack.i.bf16 %v3433_v25, %v3429_v2  ;;  %v3626_v15 = vpack.c.bf16 %v3433_v25, %v3429_v2 }
 0xd02   : > { %v3618_v33 = vpack.c.bf16 %v3495_v60, %v3494_v52  ;;  %v6958_v39 = vpack.i.bf16 %v3495_v60, %v3494_v52 }
 0xd03   : > { %6919 = vrot.lane.b32.xlu0 %v6918_v8, %s7751_s26  ;;  %6729 = vmatprep.subr.msk.bf16.mxu1 %vm1105_vm0, %v3626_v15  ;;  %v3641_v14 = vsel %vm1105_vm0, %v3626_v15, 0 }
 0xd04   : > { %6638 = vmatpush3.bf16.xpose.msra.mxu1 %v3641_v14  ;;  %6641 = vmatprep.mubr.msk.bf16.mxu1 %vm1105_vm0, %v3618_v33 }
 0xd07   : > { %6939 = vrot.lane.b32.xlu0 %v6918_v8, %s7752_s19 }
 0xd2a   : > { %v3436_v31 = vpop.f32.mrb[40].mxu1  ;;  %v6635_v62 = vpop.f32.mrb[44].mxu0 }
 0xd2b   : > { %v3437_v59 = vadd.f32 %v3436_v31, %v3252_v54  ;;  %v3438_v55 = vpop.f32.mrb[41].mxu1  ;;  %v3479_v3 = vpop.f32.mrb[45].mxu0  ;;  %v3488_v42 = vadd.f32 %v6635_v62, %v3260_v35 }
 0xd2c   : > { %v3440_v30 = vpop.f32.mrb[42].mxu1  ;;  %v6636_v4 = vpop.f32.mrb[46].mxu0  ;;  %v3439_v49 = vadd.f32 %v3438_v55, %v3256_v23  ;;  %v3480_v1 = vadd.f32 %v3479_v3, %v3260_v35 }
 0xd2d   : > { %v3441_v20 = vadd.f32 %v3440_v30, %v3252_v54  ;;  %v3491_v18 = vadd.f32 %v6636_v4, %v3260_v35  ;;  %v3442_v51 = vpop.f32.mrb[43].mxu1  ;;  %v3482_v12 = vpop.f32.mrb[47].mxu0  ;;  %v3496_v19 = vmul.f32 0.17677669, %v3437_v59 }
 0xd2e   : > { %v3443_v47 = vadd.f32 %v3442_v51, %v3256_v23  ;;  %v3483_v63 = vadd.f32 %v3482_v12, %v3260_v35 }
 0xd2f   : > { %v3497_v13 = vmul.f32 0.17677669, %v3441_v20  ;;  %v8843_v29 = vpack.c.bf16 %v3491_v18, %v3488_v42  ;;  %v8845_v26 = vpack.i.bf16 %v3491_v18, %v3488_v42 }
 0xd30   : > { %v6948_v27 = vpack.i.bf16 %v3443_v47, %v3439_v49  ;;  %v3627_v5 = vpack.c.bf16 %v3443_v47, %v3439_v49  ;;  %v8850_v38 = vpack.c.bf16 %v3483_v63, %v3480_v1  ;;  %v8852_v56 = vpack.i.bf16 %v3483_v63, %v3480_v1 }
 0xd31   : > { %v3619_v53 = vpack.c.bf16 %v3497_v13, %v3496_v19  ;;  %v6943_v41 = vpack.i.bf16 %v3497_v13, %v3496_v19 }
 0xd32   : > { %6949 = vrot.lane.b32.xlu0 %v6948_v27, %s7753_s0  ;;  %6924 = vrot.lane.b32.xlu1 %v6948_v27, %s7751_s26  ;;  %v3644_v37 = vsel %vm1105_vm0, %v3627_v5, 0 }
 0xd33   : > { %6730 = vmatprep.subr.msk.bf16.mxu1 %vm1105_vm0, %v3627_v5 }
 0xd34   : > { %6640 = vmatpush3.bf16.xpose.msra.mxu1 %v3644_v37 }
 0xd36   : > { %6959 = vrot.lane.b32.xlu0 %v6958_v39, %s7753_s0  ;;  %6929 = vrot.lane.b32.xlu1 %v6918_v8, %s7753_s0 }
 0xd3a   : > { %6964 = vrot.lane.b32.xlu0 %v6958_v39, %s7752_s19  ;;  %6934 = vrot.lane.b32.xlu1 %v6958_v39, %s7751_s26 }
 0xd3b   : > { %6642 = vmatmul.mubr.msk.bf16.vlgmr.msra.gmra.mrb[44].mxu1 %vm1105_vm0, %v3619_v53 }
 0xd3e   : > { %6944 = vrot.lane.b32.xlu1 %v6943_v41, %s7751_s26 }
 0xd42   : > { %6954 = vrot.lane.b32.xlu1 %v6948_v27, %s7752_s19 }
 0xd46   : > { %6969 = vrot.lane.b32.xlu1 %v6943_v41, %s7753_s0 }
 0xd4a   : > { %6974 = vrot.lane.b32.xlu1 %v6943_v41, %s7752_s19 }
 0xd75   : > { %v6920_v10 = vpop.permute.xlu0 %6919 }
 0xd76   : > { %v6922_v43 = vunpack.i.h.bf16 %v6920_v10  ;;  %v6921_v58 = vunpack.i.l.bf16 %v6920_v10 }
 0xd78   : > { %v3628_v40 = vpack.c.bf16 %v6922_v43, %v6921_v58 }
 0xd79   : > { %v6940_v46 = vpop.permute.xlu0 %6939 }
 0xd7a   : > { %6731 = vmatprep.subr.msk.bf16.mxu1 %vm1105_vm0, %v3628_v40  ;;  %v3702_v11 = vsel %vm1105_vm0, %v3628_v40, 0  ;;  %v6942_v45 = vunpack.i.h.bf16 %v6940_v46  ;;  %v6941_v54 = vunpack.i.l.bf16 %v6940_v46  ;;  %v7602_v40 = vld [vmem:[%s9665_s17 + $0x10] sm:$0xff] }
 0xd7b   : > { %6646 = vmatpush3.bf16.xpose.msra.mxu1 %v3702_v11 }
 0xd7c   : > { %v3632_v2 = vpack.c.bf16 %v6942_v45, %v6941_v54 }
 0xd7e   : > { %v3824_v19 = vsel %vm1105_vm0, %v3632_v2, 0 }
 0xda4   : > { %v6925_v57 = vpop.permute.xlu1 %6924  ;;  %v6950_v7 = vpop.permute.xlu0 %6949 }
 0xda5   : > { %v6927_v9 = vunpack.i.h.bf16 %v6925_v57  ;;  %v6926_v32 = vunpack.i.l.bf16 %v6925_v57  ;;  %v6952_v25 = vunpack.i.h.bf16 %v6950_v7  ;;  %v6951_v52 = vunpack.i.l.bf16 %v6950_v7 }
 0xda7   : > { %v3629_v22 = vpack.c.bf16 %v6927_v9, %v6926_v32  ;;  %v3631_v31 = vpack.c.bf16 %v6952_v25, %v6951_v52  ;;  %v8901_v32 = vld [vmem:[%s9665_s17 + $0x8] sm:$0xff] }
 0xda8   : > { %v6930_v23 = vpop.permute.xlu1 %6929  ;;  %v6960_v34 = vpop.permute.xlu0 %6959 }
 0xda9   : > { %v6932_v0 = vunpack.i.h.bf16 %v6930_v23  ;;  %v6931_v61 = vunpack.i.l.bf16 %v6930_v23  ;;  %v6962_v6 = vunpack.i.h.bf16 %v6960_v34  ;;  %v6961_v50 = vunpack.i.l.bf16 %v6960_v34  ;;  %6732 = vmatprep.subr.msk.bf16.mxu1 %vm1105_vm0, %v3629_v22 }
 0xdaa   : > { %v3705_v60 = vsel %vm1105_vm0, %v3629_v22, 0  ;;  %v3766_v1 = vsel %vm1105_vm0, %v3631_v31, 0  ;;  %v7605_v22 = vld [vmem:[%s9665_s17 + $0x18] sm:$0xff] }
 0xdab   : > { %v3630_v8 = vpack.c.bf16 %v6932_v0, %v6931_v61  ;;  %v3622_v15 = vpack.c.bf16 %v6962_v6, %v6961_v50  ;;  %6648 = vmatpush3.bf16.xpose.msra.mxu1 %v3705_v60 }
 0xdac   : > { %6735 = vmatprep.subr.msk.bf16.mxu1 %vm1105_vm0, %v3632_v2  ;;  %v6935_v33 = vpop.permute.xlu1 %6934  ;;  %v6965_v35 = vpop.permute.xlu0 %6964 }
 0xdad   : > { %v6937_v39 = vunpack.i.h.bf16 %v6935_v33  ;;  %v6936_v14 = vunpack.i.l.bf16 %v6935_v33  ;;  %6733 = vmatprep.subr.msk.bf16.mxu0 %vm1105_vm0, %v3630_v8  ;;  %6657 = vmatprep.mubr.msk.bf16.mxu0 %vm1105_vm0, %v3622_v15  ;;  %v3763_v62 = vsel %vm1105_vm0, %v3630_v8, 0  ;;  %v6967_v55 = vunpack.i.h.bf16 %v6965_v35 }
 0xdae   : > { %6654 = vmatpush3.bf16.xpose.msra.mxu0 %v3763_v62  ;;  %v6966_v3 = vunpack.i.l.bf16 %v6965_v35 }
 0xdaf   : > { %v3620_v59 = vpack.c.bf16 %v6937_v39, %v6936_v14  ;;  %6734 = vmatprep.subr.msk.bf16.mxu0 %vm1105_vm0, %v3631_v31 }
 0xdb0   : > { %v6945_v30 = vpop.permute.xlu1 %6944  ;;  %v3624_v20 = vpack.c.bf16 %v6967_v55, %v6966_v3 }
 0xdb1   : > { %v6947_v4 = vunpack.i.h.bf16 %v6945_v30  ;;  %v6946_v42 = vunpack.i.l.bf16 %v6945_v30  ;;  %6649 = vmatprep.mubr.msk.bf16.mxu1 %vm1105_vm0, %v3620_v59 }
 0xdb3   : > { %v3621_v49 = vpack.c.bf16 %v6947_v4, %v6946_v42 }
 0xdb4   : > { %v6955_v18 = vpop.permute.xlu1 %6954 }
 0xdb5   : > { %v6957_v51 = vunpack.i.h.bf16 %v6955_v18  ;;  %v6956_v12 = vunpack.i.l.bf16 %v6955_v18  ;;  %6650 = vmatmul.mubr.msk.bf16.vlgmr.msra.gmra.mrb[48].mxu1 %vm1105_vm0, %v3621_v49 }
 0xdb6   : > { %6662 = vmatpush3.bf16.xpose.msra.mxu1 %v3824_v19  ;;  %6665 = vmatprep.mubr.msk.bf16.mxu1 %vm1105_vm0, %v3624_v20 }
 0xdb7   : > { %v3633_v47 = vpack.c.bf16 %v6957_v51, %v6956_v12  ;;  %6656 = vmatpush3.bf16.xpose.msra.mxu0 %v3766_v1 }
 0xdb8   : > { %6669 = vmatprep.subr.bf16.mxu0 %v8850_v38  ;;  %v6970_v63 = vpop.permute.xlu1 %6969 }
 0xdb9   : > { %v6972_v13 = vunpack.i.h.bf16 %v6970_v63  ;;  %v6971_v27 = vunpack.i.l.bf16 %v6970_v63  ;;  %6736 = vmatprep.subr.msk.bf16.mxu1 %vm1105_vm0, %v3633_v47  ;;  %v3827_v41 = vsel %vm1105_vm0, %v3633_v47, 0 }
 0xdbb   : > { %v3623_v5 = vpack.c.bf16 %v6972_v13, %v6971_v27 }
 0xdbc   : > { %v6975_v53 = vpop.permute.xlu1 %6974 }
 0xdbd   : > { %v6977_v37 = vunpack.i.h.bf16 %v6975_v53  ;;  %v6976_v10 = vunpack.i.l.bf16 %v6975_v53 }
 0xdbe   : > { %6658 = vmatmul.mubr.msk.bf16.vlgmr.msra.gmra.mrb[48].mxu0 %vm1105_vm0, %v3623_v5  ;;  %6664 = vmatpush3.bf16.xpose.msra.mxu1 %v3827_v41 }
 0xdbf   : > { %6670 = vmatpush3.bf16.msra.mxu0 %v8850_v38  ;;  %v3625_v43 = vpack.c.bf16 %v6977_v37, %v6976_v10  ;;  %v7603_v38 = vld [vmem:[%s9665_s17] sm:$0xff] }
 0xdc0   : > { %6671 = vmatprep.subr.bf16.mxu0 %v8843_v29 }
 0xdc3   : > { %6672 = vmatpush3.bf16.msra.mxu0 %v8843_v29 }
 0xdc5   : > { %6666 = vmatmul.mubr.msk.bf16.vlgmr.msra.gmra.mrb[52].mxu1 %vm1105_vm0, %v3625_v43 }
 0xe0e   : > { %v6643_v58 = vpop.f32.mrb[44].mxu1 }
 0xe0f   : > { %v8889_v11 = vadd.f32 %v7602_v40, %v6643_v58  ;;  %v3680_v46 = vpop.f32.mrb[45].mxu1 }
 0xe10   : > { %v6644_v57 = vpop.f32.mrb[46].mxu1  ;;  %v8894_v7 = vadd.f32 %v7603_v38, %v3680_v46 }
 0xe11   : > { %v3683_v9 = vpop.f32.mrb[47].mxu1  ;;  %v3884_v29 = vsel %vm1105_vm0, %v8889_v11, -inf  ;;  %v8911_v23 = vadd.f32 %v7605_v22, %v6644_v57 }
 0xe12   : > { %v8904_v45 = vadd.f32 %v8901_v32, %v3683_v9  ;;  %3885 = vmax.xlane.f32.xlu0 %v3884_v29  ;;  %v3878_v34 = vsel %vm1105_vm0, %v8894_v7, -inf }
 0xe13   : > { %v3887_v0 = vsel %vm1105_vm0, %v8911_v23, -inf }
 0xe14   : > { %v3881_v54 = vsel %vm1105_vm0, %v8904_v45, -inf }
 0xe15   : > { %3882 = vmax.xlane.f32.xlu1 %v3881_v54 }
 0xe16   : > { %3879 = vmax.xlane.f32.xlu0 %v3878_v34 }
 0xe1a   : > { %3888 = vmax.xlane.f32.xlu0 %v3887_v0 }
 0xe88   : > { %v6651_v61 = vpop.f32.mrb[48].mxu1 }
 0xe89   : > { %v8917_v6 = vadd.f32 %v7602_v40, %v6651_v61  ;;  %v3741_v50 = vpop.f32.mrb[49].mxu1 }
 0xe8a   : > { %v6652_v2 = vpop.f32.mrb[50].mxu1  ;;  %v8927_v35 = vadd.f32 %v7603_v38, %v3741_v50 }
 0xe8b   : > { %v8919_v25 = vadd.f32 %v7605_v22, %v6652_v2  ;;  %v3744_v52 = vpop.f32.mrb[51].mxu1  ;;  %v3896_v60 = vsel %vm1105_vm0, %v8917_v6, -inf }
 0xe8c   : > { %3897 = vmax.xlane.f32.xlu0 %v3896_v60  ;;  %v8934_v55 = vadd.f32 %v8901_v32, %v3744_v52  ;;  %v3890_v42 = vsel %vm1105_vm0, %v8927_v35, -inf }
 0xe8d   : > { %v3899_v8 = vsel %vm1105_vm0, %v8919_v25, -inf }
 0xe8e   : > { %3900 = vmax.xlane.f32.xlu1 %v3899_v8  ;;  %v3893_v51 = vsel %vm1105_vm0, %v8934_v55, -inf }
 0xe91   : > { %v6659_v15 = vpop.f32.mrb[48].mxu0 }
 0xe92   : > { %v8925_v33 = vadd.f32 %v7602_v40, %v6659_v15  ;;  %v3802_v39 = vpop.f32.mrb[49].mxu0 }
 0xe93   : > { %v6660_v14 = vpop.f32.mrb[50].mxu0  ;;  %v8938_v30 = vadd.f32 %v7603_v38, %v3802_v39 }
 0xe94   : > { %v8929_v31 = vadd.f32 %v7605_v22, %v6660_v14  ;;  %v3805_v62 = vpop.f32.mrb[51].mxu0  ;;  %v3908_v59 = vsel %vm1105_vm0, %v8925_v33, -inf }
 0xe95   : > { %3909 = vmax.xlane.f32.xlu0 %v3908_v59  ;;  %v8943_v20 = vadd.f32 %v8901_v32, %v3805_v62  ;;  %v3902_v1 = vsel %vm1105_vm0, %v8938_v30, -inf }
 0xe96   : > { %v3911_v3 = vsel %vm1105_vm0, %v8929_v31, -inf }
 0xe97   : > { %3912 = vmax.xlane.f32.xlu1 %v3911_v3  ;;  %v3905_v47 = vsel %vm1105_vm0, %v8943_v20, -inf }
 0xe98   : > { %v6667_v4 = vpop.f32.mrb[52].mxu1 }
 0xe99   : > { %v3863_v49 = vpop.f32.mrb[53].mxu1  ;;  %3891 = vmax.xlane.f32.xlu0 %v3890_v42  ;;  %v8947_v19 = vadd.f32 %v7602_v40, %v6667_v4 }
 0xe9a   : > { %v6668_v18 = vpop.f32.mrb[54].mxu1  ;;  %v8953_v63 = vadd.f32 %v7603_v38, %v3863_v49 }
 0xe9b   : > { %v3866_v12 = vpop.f32.mrb[55].mxu1  ;;  %3894 = vmax.xlane.f32.xlu1 %v3893_v51  ;;  %v3920_v13 = vsel %vm1105_vm0, %v8947_v19, -inf  ;;  %v8967_v58 = vadd.f32 %v7605_v22, %v6668_v18 }
 0xe9c   : > { %v3914_v27 = vsel %vm1105_vm0, %v8953_v63, -inf  ;;  %v8972_v46 = vadd.f32 %v8901_v32, %v3866_v12 }
 0xe9d   : > { %3903 = vmax.xlane.f32.xlu0 %v3902_v1  ;;  %v3923_v57 = vsel %vm1105_vm0, %v8967_v58, -inf }
 0xe9f   : > { %3906 = vmax.xlane.f32.xlu1 %v3905_v47  ;;  %v3886_v5 = vpop.xlane.xlu0 %3885 }
 0xea0   : > { %v3928_v53 = vsub.f32 %v8889_v11, %v3886_v5 }
 0xea1   : > { %3921 = vmax.xlane.f32.xlu0 %v3920_v13 }
 0xea2   : > { %v3946_v37 = vmul.f32 1.442695, %v3928_v53  ;;  %v3883_v54 = vpop.xlane.xlu1 %3882 }
 0xea3   : > { %v3880_v41 = vpop.xlane.xlu0 %3879  ;;  %v3927_v22 = vsub.f32 %v8904_v45, %v3883_v54 }
 0xea4   : > { %v3926_v10 = vsub.f32 %v8894_v7, %v3880_v41  ;;  %7454 = vpow2.f32 %v3946_v37  ;;  %v3917_v7 = vsel %vm1105_vm0, %v8972_v46, -inf }
 0xea5   : > { %3915 = vmax.xlane.f32.xlu0 %v3914_v27  ;;  %v3944_v0 = vmul.f32 1.442695, %v3927_v22 }
 0xea6   : > { %v3942_v43 = vmul.f32 1.442695, %v3926_v10 }
 0xea7   : > { %v3889_v29 = vpop.xlane.xlu0 %3888 }
 0xea8   : > { %7456 = vpow2.f32 %v3942_v43  ;;  %v3929_v32 = vsub.f32 %v8911_v23, %v3889_v29 }
 0xeaa   : > { %v3948_v34 = vmul.f32 1.442695, %v3929_v32 }
 0xeac   : > { %7458 = vpow2.f32 %v3948_v34 }
 0xead   : > { %7460 = vpow2.f32 %v3944_v0 }
 0xeae   : > { %v8969_v40 = vpop.eup %7454 }
 0xeaf   : > { %v3980_v11 = vsel %vm1105_vm0, %v8969_v40, 0.0 }
 0xeb0   : > { %6984 = vrot.lane.b32.xlu1 %v8845_v26, %s7751_s26 }
 0xeb2   : > { %v8978_v38 = vpop.eup %7456 }
 0xeb3   : > { %v3974_v9 = vsel %vm1105_vm0, %v8978_v38, 0.0 }
 0xeb4   : > { %6989 = vrot.lane.b32.xlu1 %v8852_v56, %s7753_s0 }
 0xeb6   : > { %v8988_v61 = vpop.eup %7458 }
 0xeb7   : > { %v3983_v50 = vsel %vm1105_vm0, %v8988_v61, 0.0  ;;  %v8992_v2 = vpop.eup %7460 }
 0xebb   : > { %6979 = vrot.lane.b32.xlu0 %v8852_v56, %s7751_s26 }
 0xed8   : > { %3924 = vmax.xlane.f32.xlu1 %v3923_v57 }
 0xeda   : > { %3981 = vadd.xlane.f32.xlu0 %v3980_v11 }
 0xedc   : > { %3918 = vmax.xlane.f32.xlu1 %v3917_v7 }
 0xede   : > { %3975 = vadd.xlane.f32.xlu0 %v3974_v9 }
 0xeed   : > { %6994 = vrot.lane.b32.xlu1 %v8852_v56, %s7752_s19  ;;  %v3977_v56 = vsel %vm1105_vm0, %v8992_v2, 0.0 }
 0xf11   : > { %3984 = vadd.xlane.f32.xlu1 %v3983_v50 }
 0xf15   : > { %3978 = vadd.xlane.f32.xlu1 %v3977_v56 }
 0xf19   : > { %v3898_v23 = vpop.xlane.xlu0 %3897 }
 0xf1a   : > { %v3932_v52 = vsub.f32 %v8917_v6, %v3898_v23 }
 0xf1b   : > { %v3901_v45 = vpop.xlane.xlu1 %3900 }
 0xf1c   : > { %v3954_v60 = vmul.f32 1.442695, %v3932_v52  ;;  %v3933_v8 = vsub.f32 %v8919_v25, %v3901_v45 }
 0xf1e   : > { %7462 = vpow2.f32 %v3954_v60  ;;  %v3956_v15 = vmul.f32 1.442695, %v3933_v8 }
 0xf20   : > { %7464 = vpow2.f32 %v3956_v15 }
 0xf22   : > { %v3910_v39 = vpop.xlane.xlu0 %3909 }
 0xf23   : > { %v3936_v14 = vsub.f32 %v8925_v33, %v3910_v39 }
 0xf24   : > { %v3913_v62 = vpop.xlane.xlu1 %3912 }
 0xf25   : > { %v3962_v59 = vmul.f32 1.442695, %v3936_v14  ;;  %v3937_v3 = vsub.f32 %v8929_v31, %v3913_v62 }
 0xf26   : > { %v3892_v4 = vpop.xlane.xlu0 %3891 }
 0xf27   : > { %7466 = vpow2.f32 %v3962_v59  ;;  %v3964_v42 = vmul.f32 1.442695, %v3937_v3  ;;  %v3930_v49 = vsub.f32 %v8927_v35, %v3892_v4 }
 0xf28   : > { %v9001_v6 = vpop.eup %7462  ;;  %v3895_v18 = vpop.xlane.xlu1 %3894 }
 0xf29   : > { %7468 = vpow2.f32 %v3964_v42  ;;  %v3950_v25 = vmul.f32 1.442695, %v3930_v49  ;;  %v3931_v51 = vsub.f32 %v8934_v55, %v3895_v18  ;;  %v3992_v12 = vsel %vm1105_vm0, %v9001_v6, 0.0 }
 0xf2a   : > { %v9006_v33 = vpop.eup %7464  ;;  %v3904_v1 = vpop.xlane.xlu0 %3903  ;;  %3993 = vadd.xlane.f32.xlu0 %v3992_v12 }
 0xf2b   : > { %7470 = vpow2.f32 %v3950_v25  ;;  %v3952_v31 = vmul.f32 1.442695, %v3931_v51  ;;  %v3934_v47 = vsub.f32 %v8938_v30, %v3904_v1  ;;  %v3995_v35 = vsel %vm1105_vm0, %v9006_v33, 0.0 }
 0xf2c   : > { %v3907_v13 = vpop.xlane.xlu1 %3906  ;;  %3996 = vadd.xlane.f32.xlu1 %v3995_v35 }
 0xf2d   : > { %7472 = vpow2.f32 %v3952_v31  ;;  %v3958_v27 = vmul.f32 1.442695, %v3934_v47  ;;  %v3935_v55 = vsub.f32 %v8943_v20, %v3907_v13 }
 0xf2e   : > { %v3922_v5 = vpop.xlane.xlu0 %3921 }
 0xf2f   : > { %7474 = vpow2.f32 %v3958_v27  ;;  %v3960_v53 = vmul.f32 1.442695, %v3935_v55  ;;  %v3940_v41 = vsub.f32 %v8947_v19, %v3922_v5 }
 0xf30   : > { %v6985_v37 = vpop.permute.xlu1 %6984 }
 0xf31   : > { %v9013_v10 = vpop.eup %7466  ;;  %7476 = vpow2.f32 %v3960_v53  ;;  %v3970_v43 = vmul.f32 1.442695, %v3940_v41  ;;  %v6987_v22 = vunpack.i.h.bf16 %v6985_v37  ;;  %v6986_v34 = vunpack.i.l.bf16 %v6985_v37 }
 0xf32   : > { %v3916_v30 = vpop.xlane.xlu0 %3915  ;;  %v4004_v57 = vsel %vm1105_vm0, %v9013_v10, 0.0 }
 0xf33   : > { %v9017_v11 = vpop.eup %7468  ;;  %7478 = vpow2.f32 %v3970_v43  ;;  %v3938_v7 = vsub.f32 %v8953_v63, %v3916_v30  ;;  %4005 = vadd.xlane.f32.xlu0 %v4004_v57  ;;  %v4065_v14 = vpack.c.bf16 %v6987_v22, %v6986_v34 }
 0xf34   : > { %v6990_v20 = vpop.permute.xlu1 %6989  ;;  %v4007_v9 = vsel %vm1105_vm0, %v9017_v11, 0.0 }
 0xf35   : > { %v9022_v19 = vpop.eup %7470  ;;  %v3966_v29 = vmul.f32 1.442695, %v3938_v7  ;;  %v6992_v32 = vunpack.i.h.bf16 %v6990_v20  ;;  %v6991_v54 = vunpack.i.l.bf16 %v6990_v20  ;;  %4008 = vadd.xlane.f32.xlu1 %v4007_v9 }
 0xf36   : > { %v6980_v0 = vpop.permute.xlu0 %6979  ;;  %v3986_v50 = vsel %vm1105_vm0, %v9022_v19, 0.0 }
 0xf37   : > { %v9026_v56 = vpop.eup %7472  ;;  %7480 = vpow2.f32 %v3966_v29  ;;  %v9028_v63 = vpack.c.bf16 %v6992_v32, %v6991_v54  ;;  %v6982_v23 = vunpack.i.h.bf16 %v6980_v0  ;;  %v6981_v52 = vunpack.i.l.bf16 %v6980_v0  ;;  %3987 = vadd.xlane.f32.xlu0 %v3986_v50 }
 0xf38   : > { %v3989_v45 = vsel %vm1105_vm0, %v9026_v56, 0.0 }
 0xf39   : > { %v9032_v60 = vpop.eup %7474  ;;  %v4064_v8 = vpack.c.bf16 %v6982_v23, %v6981_v52  ;;  %3990 = vadd.xlane.f32.xlu1 %v3989_v45  ;;  %6685 = vmatprep.subr.bf16.mxu0 %v9028_v63 }
 0xf3a   : > { %v3998_v15 = vsel %vm1105_vm0, %v9032_v60, 0.0 }
 0xf3b   : > { %v9037_v39 = vpop.eup %7476  ;;  %3999 = vadd.xlane.f32.xlu0 %v3998_v15  ;;  %6677 = vmatprep.subr.bf16.mxu1 %v4064_v8 }
 0xf3c   : > { %6678 = vmatpush3.bf16.msra.mxu1 %v4064_v8  ;;  %v4001_v62 = vsel %vm1105_vm0, %v9037_v39, 0.0 }
 0xf3d   : > { %v9041_v59 = vpop.eup %7478  ;;  %4002 = vadd.xlane.f32.xlu1 %v4001_v62  ;;  %6679 = vmatprep.subr.bf16.mxu1 %v4065_v14 }
 0xf3e   : > { %v4016_v3 = vsel %vm1105_vm0, %v9041_v59, 0.0 }
 0xf3f   : > { %4017 = vadd.xlane.f32.xlu0 %v4016_v3 }
 0xf40   : > { %6680 = vmatpush3.bf16.msra.mxu1 %v4065_v14 }
 0xf41   : > { %v9045_v4 = vpop.eup %7480 }
 0xf42   : > { %v4010_v42 = vsel %vm1105_vm0, %v9045_v4, 0.0 }
 0xf43   : > { %4011 = vadd.xlane.f32.xlu0 %v4010_v42 }
 0xf59   : > { %6999 = vrot.lane.b32.xlu0 %v8845_v26, %s7753_s0 }
 0xf65   : > { %v3925_v49 = vpop.xlane.xlu1 %3924 }
 0xf66   : > { %v3941_v18 = vsub.f32 %v8967_v58, %v3925_v49 }
 0xf67   : > { %v3982_v5 = vpop.xlane.xlu0 %3981 }
 0xf68   : > { %v3972_v25 = vmul.f32 1.442695, %v3941_v18 }
 0xf69   : > { %v3919_v51 = vpop.xlane.xlu1 %3918 }
 0xf6a   : > { %7482 = vpow2.f32 %v3972_v25  ;;  %v3939_v12 = vsub.f32 %v8972_v46, %v3919_v51 }
 0xf6b   : > { %v3976_v53 = vpop.xlane.xlu0 %3975 }
 0xf6c   : > { %v3968_v1 = vmul.f32 1.442695, %v3939_v12 }
 0xf6d   : > { %v6995_v31 = vpop.permute.xlu1 %6994 }
 0xf6e   : > { %7484 = vpow2.f32 %v3968_v1  ;;  %v6997_v47 = vunpack.i.h.bf16 %v6995_v31  ;;  %v6996_v35 = vunpack.i.l.bf16 %v6995_v31 }
 0xf70   : > { %v9053_v13 = vpack.c.bf16 %v6997_v47, %v6996_v35 }
 0xf72   : > { %6693 = vmatprep.subr.bf16.mxu1 %v9053_v13 }
 0xf74   : > { %v9056_v27 = vpop.eup %7482 }
 0xf75   : > { %v4019_v55 = vsel %vm1105_vm0, %v9056_v27, 0.0 }
 0xf76   : > { %4020 = vadd.xlane.f32.xlu1 %v4019_v55 }
 0xf78   : > { %v9060_v58 = vpop.eup %7484 }
 0xf79   : > { %v4013_v46 = vsel %vm1105_vm0, %v9060_v58, 0.0 }
 0xf7a   : > { %4014 = vadd.xlane.f32.xlu1 %v4013_v46 }
 0xf8b   : > { %7004 = vrot.lane.b32.xlu1 %v8845_v26, %s7752_s19 }
 0xf9e   : > { %v3985_v41 = vpop.xlane.xlu1 %3984 }
 0xf9f   : > { %7486 = vrcp.f32 %v3985_v41 }
 0xfa0   : > { %7488 = vrcp.f32 %v3976_v53 }
 0xfa1   : > { %7490 = vrcp.f32 %v3982_v5 }
 0xfa2   : > { %v3979_v37 = vpop.xlane.xlu1 %3978 }
 0xfa3   : > { %7492 = vrcp.f32 %v3979_v37 }
 0xfa9   : > { %v7487_v43 = vpop.eup %7486 }
 0xfaa   : > { %v7489_v30 = vpop.eup %7488  ;;  %v4041_v20 = vmul.f32 %v7487_v43, %v8988_v61 }
 0xfab   : > { %v7491_v57 = vpop.eup %7490  ;;  %v4038_v9 = vmul.f32 %v7489_v30, %v8978_v38 }
 0xfac   : > { %v4040_v26 = vmul.f32 %v7491_v57, %v8969_v40 }
 0xfad   : > { %v7493_v7 = vpop.eup %7492 }
 0xfae   : > { %v4039_v29 = vmul.f32 %v7493_v7, %v8992_v2  ;;  %v4055_v54 = vpack.c.bf16 %v4041_v20, %v4040_v26 }
 0xfb0   : > { %v4054_v32 = vpack.c.bf16 %v4039_v29, %v4038_v9 }
 0xfb2   : > { %6673 = vmatprep.mubr.msk.bf16.mxu0 %vm1105_vm0, %v4054_v32 }
 0xfb3   : > { %6674 = vmatmul.mubr.msk.bf16.vlgmr.msra.gmra.mrb[52].mxu0 %vm1105_vm0, %v4055_v54 }
 0xfb4   : > { %6686 = vmatpush3.bf16.msra.mxu0 %v9028_v63 }
 0xfb7   : > { %v3994_v22 = vpop.xlane.xlu0 %3993 }
 0xfb9   : > { %v3997_v34 = vpop.xlane.xlu1 %3996 }
 0xfba   : > { %7494 = vrcp.f32 %v3997_v34  ;;  %v7191_v34 = vld [vmem:[%s9605_s6 + $0x48] sm:$0xff]  }
 0xfc0   : > { %v4006_v0 = vpop.xlane.xlu0 %4005 }
 0xfc2   : > { %v4009_v50 = vpop.xlane.xlu1 %4008 }
 0xfc4   : > { %v3988_v61 = vpop.xlane.xlu0 %3987  ;;  %v7495_v52 = vpop.eup %7494 }
 0xfc5   : > { %7496 = vrcp.f32 %v3988_v61  ;;  %v4045_v14 = vmul.f32 %v7495_v52, %v9006_v33 }
 0xfc6   : > { %7498 = vrcp.f32 %v3994_v22  ;;  %v3991_v38 = vpop.xlane.xlu1 %3990 }
 0xfc7   : > { %7500 = vrcp.f32 %v3991_v38 }
 0xfc8   : > { %v4000_v2 = vpop.xlane.xlu0 %3999 }
 0xfc9   : > { %7502 = vrcp.f32 %v4000_v2  ;;  %v7192_v2 = vld [vmem:[%s9605_s6 + $0x50] sm:$0xff]  }
 0xfca   : > { %7504 = vrcp.f32 %v4009_v50  ;;  %v4003_v40 = vpop.xlane.xlu1 %4002 }
 0xfcb   : > { %7506 = vrcp.f32 %v4003_v40 }
 0xfcc   : > { %7508 = vrcp.f32 %v4006_v0  ;;  %v4018_v23 = vpop.xlane.xlu0 %4017 }
 0xfcf   : > { %v7497_v45 = vpop.eup %7496 }
 0xfd0   : > { %v7499_v63 = vpop.eup %7498  ;;  %v4012_v8 = vpop.xlane.xlu0 %4011  ;;  %v4042_v62 = vmul.f32 %v7497_v45, %v9022_v19 }
 0xfd1   : > { %v7501_v15 = vpop.eup %7500  ;;  %v4044_v49 = vmul.f32 %v7499_v63, %v9001_v6 }
 0xfd2   : > { %v4043_v3 = vmul.f32 %v7501_v15, %v9026_v56 }
 0xfd3   : > { %v7503_v42 = vpop.eup %7502  ;;  %v4057_v47 = vpack.c.bf16 %v4045_v14, %v4044_v49  ;;  %v7194_v14 = vld [vmem:[%s9605_s6 + $0x60] sm:$0xff]  }
 0xfd4   : > { %v7505_v18 = vpop.eup %7504  ;;  %v7000_v25 = vpop.permute.xlu0 %6999  ;;  %v4056_v51 = vpack.c.bf16 %v4043_v3, %v4042_v62  ;;  %v4046_v55 = vmul.f32 %v7503_v42, %v9032_v60  ;;  %v7195_v62 = vld [vmem:[%s9605_s6 + $0x68] sm:$0xff]   ;;  %v7196_v3 = vld [vmem:[%s9605_s6 + $0x70] sm:$0xff]   ;;  %v7197_v42 = vld [vmem:[%s9605_s6 + $0x78] sm:$0xff]  }
 0xfd5   : > { %v7507_v12 = vpop.eup %7506  ;;  %v7002_v1 = vunpack.i.h.bf16 %v7000_v25  ;;  %v7001_v31 = vunpack.i.l.bf16 %v7000_v25  ;;  %v4049_v19 = vmul.f32 %v7505_v18, %v9017_v11 }
 0xfd6   : > { %v7509_v35 = vpop.eup %7508  ;;  %6681 = vmatprep.mubr.msk.bf16.mxu1 %vm1105_vm0, %v4056_v51  ;;  %v4047_v33 = vmul.f32 %v7507_v12, %v9037_v39 }
 0xfd7   : > { %v4067_v56 = vpack.c.bf16 %v7002_v1, %v7001_v31  ;;  %6682 = vmatmul.mubr.msk.bf16.vlgmr.msra.gmra.mrb[56].mxu1 %vm1105_vm0, %v4057_v47  ;;  %v4048_v46 = vmul.f32 %v7509_v35, %v9013_v10 }
 0xfd8   : > { %6694 = vmatpush3.bf16.msra.mxu1 %v9053_v13  ;;  %v4058_v6 = vpack.c.bf16 %v4047_v33, %v4046_v55 }
 0xfd9   : > { %6687 = vmatprep.subr.bf16.mxu0 %v4067_v56  ;;  %v4059_v5 = vpack.c.bf16 %v4049_v19, %v4048_v46 }
 0xfda   : > { %6688 = vmatpush3.bf16.msra.mxu0 %v4067_v56  ;;  %6689 = vmatprep.mubr.msk.bf16.mxu0 %vm1105_vm0, %v4058_v6 }
 0xfdd   : > { %6690 = vmatmul.mubr.msk.bf16.vlgmr.msra.gmra.mrb[56].mxu0 %vm1105_vm0, %v4059_v5 }
0x1003   : > { %v4021_v60 = vpop.xlane.xlu1 %4020 }
0x1004   : > { %7510 = vrcp.f32 %v4021_v60 }
0x1005   : > { %7512 = vrcp.f32 %v4012_v8  ;;  %v7193_v8 = vld [vmem:[%s9605_s6 + $0x58] sm:$0xff]  }
0x1006   : > { %7514 = vrcp.f32 %v4018_v23 }
0x1007   : > { %v4015_v11 = vpop.xlane.xlu1 %4014 }
0x1008   : > { %7516 = vrcp.f32 %v4015_v11 }
0x100b   : > { %v7005_v39 = vpop.permute.xlu1 %7004 }
0x100c   : > { %v7007_v53 = vunpack.i.h.bf16 %v7005_v39  ;;  %v7006_v41 = vunpack.i.l.bf16 %v7005_v39 }
0x100e   : > { %v4069_v13 = vpack.c.bf16 %v7007_v53, %v7006_v41  ;;  %v7511_v37 = vpop.eup %7510 }
0x100f   : > { %v7513_v43 = vpop.eup %7512  ;;  %v4053_v57 = vmul.f32 %v7511_v37, %v9056_v27 }
0x1010   : > { %6695 = vmatprep.subr.bf16.mxu1 %v4069_v13  ;;  %v7515_v10 = vpop.eup %7514  ;;  %v4050_v7 = vmul.f32 %v7513_v43, %v9045_v4 }
0x1011   : > { %6696 = vmatpush3.bf16.msra.mxu1 %v4069_v13  ;;  %v4052_v9 = vmul.f32 %v7515_v10, %v9041_v59  ;;  %v7190_v59 = vld [vmem:[%s9605_s6 + $0x40] sm:$0xff]  }
0x1012   : > { %v7517_v30 = vpop.eup %7516  ;;  %6701 = vmatprep.subr.bf16.mxu0 %v7190_v59 }
0x1013   : > { %v4051_v20 = vmul.f32 %v7517_v30, %v9060_v58  ;;  %v4061_v26 = vpack.c.bf16 %v4053_v57, %v4052_v9  ;;  %6702 = vmatpush3.bf16.msra.mxu0 %v7190_v59  ;;  %v6195_v59 = vld [vmem:[%s9606_s7 + $0x1] ss:$0 sm:$0xff] }
0x1014   : > { %6703 = vmatprep.subr.bf16.mxu0 %v7191_v34 }
0x1015   : > { %v4060_v29 = vpack.c.bf16 %v4051_v20, %v4050_v7 }
0x1017   : > { %6697 = vmatprep.mubr.msk.bf16.mxu1 %vm1105_vm0, %v4060_v29  ;;  %6704 = vmatpush3.bf16.msra.mxu0 %v7191_v34 }
0x1018   : > { %6698 = vmatmul.mubr.msk.bf16.vlgmr.msra.gmra.mrb[60].mxu1 %vm1105_vm0, %v4061_v26  ;;  %6705 = vmatprep.subr.bf16.mxu0 %v7192_v2 }
0x1019   : > { %4796 = vmatprep.mubr.bf16.mxu1 %v9674_v24 }
0x101b   : > { %6706 = vmatpush3.bf16.msra.mxu0 %v7192_v2 }
0x101c   : > { %6707 = vmatprep.subr.bf16.mxu0 %v7193_v8 }
0x101f   : > { %6708 = vmatpush3.bf16.msra.mxu0 %v7193_v8 }
0x1020   : > { %6709 = vmatprep.subr.bf16.mxu0 %v7194_v14 }
0x1023   : > { %6710 = vmatpush3.bf16.msra.mxu0 %v7194_v14  ;;  %v7201_v14 = vld [vmem:[#allocation4 + $0x108] ss:$16 sps:$4 sm:$0xff]  }
0x1024   : > { %6711 = vmatprep.subr.bf16.mxu0 %v7195_v62 }
0x1027   : > { %6712 = vmatpush3.bf16.msra.mxu0 %v7195_v62  ;;  %v7206_v62 = vld [vmem:[#allocation4 + $0x124] ss:$16 sps:$4 sm:$0xff]  }
0x1028   : > { %6713 = vmatprep.subr.bf16.mxu0 %v7196_v3 }
0x102b   : > { %6714 = vmatpush3.bf16.msra.mxu0 %v7196_v3  ;;  %v7209_v3 = vld [vmem:[#allocation4 + $0x12c] ss:$16 sps:$4 sm:$0xff]  }
0x102c   : > { %6715 = vmatprep.subr.bf16.mxu0 %v7197_v42 }
0x102f   : > { %6716 = vmatpush3.bf16.msra.mxu0 %v7197_v42  ;;  %v7207_v42 = vld [vmem:[#allocation4 + $0x128] ss:$16 sps:$4 sm:$0xff]  }
0x1086   : > { %v9093_v32 = vpop.f32.mrb[52].mxu0 }
0x1087   : > { %v9095_v54 = vpop.f32.mrb[53].mxu0 }
0x1088   : > { %v9097_v22 = vpop.f32.mrb[54].mxu0 }
0x1089   : > { %v9099_v27 = vpop.f32.mrb[55].mxu0 }
0x10aa   : > { %v6683_v4 = vpop.f32.mrb[56].mxu1 }
0x10ab   : > { %v4165_v58 = vpop.f32.mrb[57].mxu1 }
0x10ac   : > { %v6684_v0 = vpop.f32.mrb[58].mxu1 }
0x10ad   : > { %v7008_v50 = vpack.i.bf16 %v6684_v0, %v6683_v4  ;;  %v4168_v61 = vpop.f32.mrb[59].mxu1 }
0x10ae   : > { %v7018_v38 = vpack.i.bf16 %v4168_v61, %v4165_v58 }
0x10af   : > { %7009 = vrot.lane.b32.xlu1 %v7008_v50, %s7752_s19 }
0x10b0   : > { %v6691_v40 = vpop.f32.mrb[56].mxu0  ;;  %7019 = vrot.lane.b32.xlu0 %v7018_v38, %s7752_s19 }
0x10b1   : > { %v4220_v23 = vpop.f32.mrb[57].mxu0 }
0x10b2   : > { %v6692_v52 = vpop.f32.mrb[58].mxu0 }
0x10b3   : > { %v7013_v45 = vpack.i.bf16 %v6692_v52, %v6691_v40  ;;  %v4223_v63 = vpop.f32.mrb[59].mxu0 }
0x10b4   : > { %v7023_v15 = vpack.i.bf16 %v4223_v63, %v4220_v23 }
0x10b5   : > { %7014 = vrot.lane.b32.xlu1 %v7013_v45, %s7753_s0 }
0x10b6   : > { %7024 = vrot.lane.b32.xlu0 %v7023_v15, %s7753_s0  ;;  %v7200_v15 = vld [vmem:[#allocation4 + $0x104] ss:$16 sps:$4 sm:$0xff]  }
0x10b7   : > { %4764 = vmatprep.subr.bf16.mxu1 %v7200_v15 }
0x10eb   : > { %v6699_v49 = vpop.f32.mrb[60].mxu1 }
0x10ec   : > { %v4275_v18 = vpop.f32.mrb[61].mxu1 }
0x10ed   : > { %v6700_v25 = vpop.f32.mrb[62].mxu1 }
0x10ee   : > { %v7033_v51 = vpack.i.bf16 %v6700_v25, %v6699_v49  ;;  %v4278_v12 = vpop.f32.mrb[63].mxu1 }
0x10ef   : > { %v7028_v1 = vpack.i.bf16 %v4278_v12, %v4275_v18 }
0x10f0   : > { %7034 = vrot.lane.b32.xlu1 %v7033_v51, %s7751_s26 }
0x10f1   : > { %7029 = vrot.lane.b32.xlu0 %v7028_v1, %s7751_s26  ;;  %s6296_s26 = sshll.u32 %s9702_s27, 6 }
0x10f2   : > { %s607_s20 = scalar_lea.vmem %s9699_s14, %s6296_s26 }
0x1121   : > { %v7010_v31 = vpop.permute.xlu1 %7009 }
0x1122   : > { %v7020_v47 = vpop.permute.xlu0 %7019  ;;  %v7012_v55 = vunpack.i.h.bf16 %v7010_v31  ;;  %v7011_v33 = vunpack.i.l.bf16 %v7010_v31 }
0x1123   : > { %v7022_v56 = vunpack.i.h.bf16 %v7020_v47  ;;  %v7021_v6 = vunpack.i.l.bf16 %v7020_v47 }
0x1124   : > { %v4341_v39 = vsel %vm1105_vm0, %v9097_v22, %v7012_v55  ;;  %v4340_v53 = vsel %vm1105_vm0, %v9093_v32, %v7011_v33 }
0x1125   : > { %v4339_v13 = vsel %vm1105_vm0, %v9099_v27, %v7022_v56  ;;  %v4338_v37 = vsel %vm1105_vm0, %v9095_v54, %v7021_v6 }
0x1127   : > { %v7015_v35 = vpop.permute.xlu1 %7014 }
0x1128   : > { %v7025_v19 = vpop.permute.xlu0 %7024  ;;  %v7017_v46 = vunpack.i.h.bf16 %v7015_v35  ;;  %v7016_v5 = vunpack.i.l.bf16 %v7015_v35 }
0x1129   : > { %v7027_v60 = vunpack.i.h.bf16 %v7025_v19  ;;  %v7026_v11 = vunpack.i.l.bf16 %v7025_v19 }
0x112a   : > { %v4344_v57 = vsel %vm1814_vm1, %v4340_v53, %v7016_v5  ;;  %v4345_v7 = vsel %vm1814_vm1, %v4341_v39, %v7017_v46  ;;  %v7212_v5 = vld [vmem:[#allocation4 + $0x144] ss:$16 sps:$4 sm:$0xff]   ;;  %v7213_v39 = vld [vmem:[#allocation4 + $0x148] ss:$16 sps:$4 sm:$0xff]  }
0x112b   : > { %v4342_v29 = vsel %vm1814_vm1, %v4338_v37, %v7026_v11  ;;  %v4343_v26 = vsel %vm1814_vm1, %v4339_v13, %v7027_v60  ;;  %v7215_v60 = vld [vmem:[#allocation4 + $0x14c] ss:$16 sps:$4 sm:$0xff]   ;;  %v7210_v11 = vld [vmem:[#allocation4 + $0x140] ss:$16 sps:$4 sm:$0xff]   ;;  %v7218_v53 = vld [vmem:[#allocation4 + $0x164] ss:$16 sps:$4 sm:$0xff]  }
0x112c   : > { %v7216_v13 = vld [vmem:[#allocation4 + $0x160] ss:$16 sps:$4 sm:$0xff]   ;;  %v7219_v37 = vld [vmem:[#allocation4 + $0x168] ss:$16 sps:$4 sm:$0xff]  }
0x1162   : > { %v7035_v41 = vpop.permute.xlu1 %7034 }
0x1163   : > { %v7037_v43 = vunpack.i.h.bf16 %v7035_v41  ;;  %v7036_v10 = vunpack.i.l.bf16 %v7035_v41  ;;  %v7030_v30 = vpop.permute.xlu0 %7029  ;;  %v7221_v41 = vld [vmem:[#allocation4 + $0x16c] ss:$16 sps:$4 sm:$0xff]  }
0x1164   : > { %v7032_v20 = vunpack.i.h.bf16 %v7030_v30  ;;  %v7031_v9 = vunpack.i.l.bf16 %v7030_v30  ;;  %v7222_v30 = vld [vmem:[#allocation4 + $0x180] ss:$16 sps:$4 sm:$0xff]  }
0x1165   : > { %v4349_v32 = vsel %vm1819_vm2, %v4345_v7, %v7037_v43  ;;  %v4348_v22 = vsel %vm1819_vm2, %v4344_v57, %v7036_v10  ;;  %v7224_v43 = vld [vmem:[#allocation4 + $0x184] ss:$16 sps:$4 sm:$0xff]   ;;  %v7227_v10 = vld [vmem:[#allocation4 + $0x18c] ss:$16 sps:$4 sm:$0xff]   ;;  %v7225_v57 = vld [vmem:[#allocation4 + $0x188] ss:$16 sps:$4 sm:$0xff]  }
0x1166   : > { %v4351_v27 = vpack.c.bf16 %v4349_v32, %v4348_v22  ;;  %v4346_v54 = vsel %vm1819_vm2, %v4342_v29, %v7031_v9  ;;  %v4347_v4 = vsel %vm1819_vm2, %v4343_v26, %v7032_v20  ;;  %v7230_v7 = vld [vmem:[#allocation4 + $0x1a4] ss:$16 sps:$4 sm:$0xff]   ;;  %v7233_v20 = vld [vmem:[#allocation4 + $0x1ac] ss:$16 sps:$4 sm:$0xff]   ;;  %v7228_v9 = vld [vmem:[#allocation4 + $0x1a0] ss:$16 sps:$4 sm:$0xff]  }
0x1167   : > { %v4350_v58 = vpack.c.bf16 %v4347_v4, %v4346_v54  ;;  %v7231_v29 = vld [vmem:[#allocation4 + $0x1a8] ss:$16 sps:$4 sm:$0xff]   ;;  %v7234_v26 = vld [vmem:[#allocation4 + $0x1c0] ss:$16 sps:$4 sm:$0xff]   ;;  %v7236_v32 = vld [vmem:[#allocation4 + $0x1c4] ss:$16 sps:$4 sm:$0xff]  }
0x1168   : > { %v7237_v22 = vld [vmem:[#allocation4 + $0x1c8] ss:$16 sps:$4 sm:$0xff]   ;;  %v7242_v54 = vld [vmem:[#allocation4 + $0x1e4] ss:$16 sps:$4 sm:$0xff]   ;;  %v7245_v4 = vld [vmem:[#allocation4 + $0x1ec] ss:$16 sps:$4 sm:$0xff]  }
0x1169   : > { %6717 = vmatprep.mubr.bf16.mxu0 %v4350_v58  ;;  %v7240_v58 = vld [vmem:[#allocation4 + $0x1e0] ss:$16 sps:$4 sm:$0xff]  }
0x116a   : > { %6718 = vmatmul.mubr.bf16.vlgmr.msra.gmra.mrb[60].mxu0 %v4351_v27  ;;  %v7239_v27 = vld [vmem:[#allocation4 + $0x1cc] ss:$16 sps:$4 sm:$0xff]  }
0x116b   : > { %4849 = vmatprep.mubr.bf16.mxu0 %v9674_v24 }
0x123d   : > { %v6719_v34 = vpop.f32.mrb[60].mxu0 }
0x123e   : > { %v4459_v0 = vpop.f32.mrb[61].mxu0  ;;  %v4468_v2 = vadd.f32 %v6719_v34, %v6195_v59 }
0x123f   : > { %v4460_v50 = vadd.f32 %v6195_v59, %v4459_v0  ;;  %v6720_v61 = vpop.f32.mrb[62].mxu0 }
0x1240   : > { %v4462_v38 = vpop.f32.mrb[63].mxu0  ;;  %v9159_v45 = vadd.f32 %v4468_v2, %v8794_v21  ;;  %v4471_v63 = vadd.f32 %v6720_v61, %v6195_v59  ;;  %v7204_v21 = vld [vmem:[#allocation4 + $0x120] ss:$16 sps:$4 sm:$0xff]  }
0x1241   : > { %v9152_v40 = vadd.f32 %v4460_v50, %v8786_v16  ;;  %v4463_v23 = vadd.f32 %v6195_v59, %v4462_v38  ;;  %v7198_v16 = vld [vmem:[#allocation4 + $0x100] ss:$16 sps:$4 sm:$0xff]   ;;  %v7243_v59 = vld [vmem:[#allocation4 + $0x1e8] ss:$16 sps:$4 sm:$0xff]  }
0x1242   : > { %9684 = vst [vmem:[#allocation17_spill] sm:$0xff] %v9159_v45  ;;  %v9164_v8 = vadd.f32 %v4471_v63, %v8798_v28  ;;  %4765 = vmatpush1.bf16.msra.mxu1 %v7198_v16 }
0x1243   : > { %9682 = vst [vmem:[#allocation21_spill] sm:$0xff] %v9152_v40  ;;  %v9155_v52 = vadd.f32 %v4463_v23, %v8790_v44  ;;  %4482 = vadd.xlane.f32.xlu0 %v9152_v40  ;;  %v7203_v44 = vld [vmem:[#allocation4 + $0x10c] ss:$16 sps:$4 sm:$0xff]   ;;  %4766 = vmatprep.subr.bf16.mxu1 %v7206_v62 }
0x1244   : > { %9685 = vst [vmem:[#allocation18_spill] sm:$0xff] %v9164_v8  ;;  %4817 = vmatprep.subr.bf16.mxu0 %v7203_v44 }
0x1245   : > { %9683 = vst [vmem:[#allocation22_spill] sm:$0xff] %v9155_v52  ;;  %4484 = vadd.xlane.f32.xlu1 %v9155_v52  ;;  %4818 = vmatpush1.bf16.msra.mxu0 %v7201_v14 }
0x1246   : > { %4819 = vmatprep.subr.bf16.mxu0 %v7209_v3  ;;  %4767 = vmatpush1.bf16.msra.mxu1 %v7204_v21  ;;  %v6206_v3 = vld [vmem:[%s9607_s8 + $0x1] ss:$0 sm:$0xff] }
0x1247   : > { %4486 = vadd.xlane.f32.xlu0 %v9159_v45  ;;  %4768 = vmatprep.subr.bf16.mxu1 %v7212_v5 }
0x1249   : > { %4820 = vmatpush1.bf16.msra.mxu0 %v7207_v42 }
0x124a   : > { %4821 = vmatprep.subr.bf16.mxu0 %v7215_v60  ;;  %4769 = vmatpush1.bf16.msra.mxu1 %v7210_v11  ;;  %v7246_v11 = vld [vmem:[#allocation6 + $0x140] sm:$0xff]  }
0x124b   : > { %4488 = vadd.xlane.f32.xlu0 %v9164_v8  ;;  %4770 = vmatprep.subr.bf16.mxu1 %v7218_v53  ;;  %v7249_v53 = vld [vmem:[#allocation6 + $0x180] sm:$0xff]  }
0x124d   : > { %4822 = vmatpush1.bf16.msra.mxu0 %v7213_v39  ;;  %v7247_v39 = vld [vmem:[#allocation6 + $0x1c0] sm:$0xff]  }
0x124e   : > { %4823 = vmatprep.subr.bf16.mxu0 %v7221_v41  ;;  %4771 = vmatpush1.bf16.msra.mxu1 %v7216_v13  ;;  %v7251_v41 = vld [vmem:[#allocation6 + $0x1c8] sm:$0xff]  }
0x124f   : > { %4772 = vmatprep.subr.bf16.mxu1 %v7224_v43  ;;  %v7252_v13 = vld [vmem:[#allocation6 + $0x108] sm:$0xff]   ;;  %v7254_v43 = vld [vmem:[#allocation6 + $0x150] sm:$0xff]  }
0x1251   : > { %4824 = vmatpush1.bf16.msra.mxu0 %v7219_v37  ;;  %v7253_v37 = vld [vmem:[#allocation6 + $0x188] sm:$0xff]  }
0x1252   : > { %4825 = vmatprep.subr.bf16.mxu0 %v7227_v10  ;;  %4773 = vmatpush1.bf16.msra.mxu1 %v7222_v30  ;;  %v7255_v10 = vld [vmem:[#allocation6 + $0x1d0] sm:$0xff]  }
0x1253   : > { %4774 = vmatprep.subr.bf16.mxu1 %v7230_v7  ;;  %v7256_v30 = vld [vmem:[#allocation6 + $0x110] sm:$0xff]   ;;  %v7258_v7 = vld [vmem:[#allocation6 + $0x158] sm:$0xff]  }
0x1255   : > { %4826 = vmatpush1.bf16.msra.mxu0 %v7225_v57  ;;  %v7257_v57 = vld [vmem:[#allocation6 + $0x190] sm:$0xff]  }
0x1256   : > { %4827 = vmatprep.subr.bf16.mxu0 %v7233_v20  ;;  %4775 = vmatpush1.bf16.msra.mxu1 %v7228_v9  ;;  %v7259_v20 = vld [vmem:[#allocation6 + $0x1d8] sm:$0xff]  }
0x1257   : > { %4776 = vmatprep.subr.bf16.mxu1 %v7236_v32  ;;  %v7260_v9 = vld [vmem:[#allocation6 + $0x118] sm:$0xff]   ;;  %v7263_v32 = vld [vmem:[#allocation6 + $0x1e0] sm:$0xff]  }
0x1259   : > { %4828 = vmatpush1.bf16.msra.mxu0 %v7231_v29  ;;  %v7261_v29 = vld [vmem:[#allocation6 + $0x198] sm:$0xff]  }
0x125a   : > { %4829 = vmatprep.subr.bf16.mxu0 %v7239_v27  ;;  %4777 = vmatpush1.bf16.msra.mxu1 %v7234_v26  ;;  %v7262_v26 = vld [vmem:[#allocation6 + $0x160] sm:$0xff]  }
0x125b   : > { %4778 = vmatprep.subr.bf16.mxu1 %v7242_v54  ;;  %v7265_v27 = vld [vmem:[#allocation6 + $0x1a0] sm:$0xff]   ;;  %v7266_v54 = vld [vmem:[#allocation6 + $0x168] sm:$0xff]  }
0x125d   : > { %4830 = vmatpush1.bf16.msra.mxu0 %v7237_v22  ;;  %v7264_v22 = vld [vmem:[#allocation6 + $0x120] sm:$0xff]  }
0x125e   : > { %4831 = vmatprep.subr.bf16.mxu0 %v7245_v4  ;;  %4779 = vmatpush1.bf16.msra.mxu1 %v7240_v58  ;;  %v7267_v4 = vld [vmem:[#allocation6 + $0x1e8] sm:$0xff]  }
0x125f   : > { %6457 = vmatprep.subr.bf16.mxu1 %v7246_v11  ;;  %v7268_v58 = vld [vmem:[#allocation6 + $0x128] sm:$0xff]  }
0x1261   : > { %4832 = vmatpush1.bf16.msra.mxu0 %v7243_v59  ;;  %v7269_v59 = vld [vmem:[#allocation6 + $0x1a8] sm:$0xff]  }
0x1262   : > { %6485 = vmatprep.subr.bf16.mxu0 %v7247_v39 }
0x12d0   : > { %v4483_v28 = vpop.xlane.xlu0 %4482 }
0x12d1   : > { %v4490_v49 = vmul.f32 0.0078125, %v4483_v28 }
0x12d2   : > { %v4485_v18 = vpop.xlane.xlu1 %4484 }
0x12d3   : > { %v9168_v25 = vsub.f32 %v9152_v40, %v4490_v49  ;;  %v4491_v51 = vmul.f32 0.0078125, %v4485_v18 }
0x12d4   : > { %v4487_v12 = vpop.xlane.xlu0 %4486 }
0x12d5   : > { %v9171_v1 = vsub.f32 %v9155_v52, %v4491_v51  ;;  %v4492_v31 = vmul.f32 0.0078125, %v4487_v12  ;;  %v4498_v47 = vmul.f32 %v9168_v25, %v9168_v25  ;;  %v6207_v51 = vld [vmem:[%s9608_s9 + $0x1] ss:$0 sm:$0xff] }
0x12d7   : > { %v9176_v35 = vsub.f32 %v9159_v45, %v4492_v31  ;;  %4502 = vadd.xlane.f32.xlu0 %v4498_v47  ;;  %v4499_v55 = vmul.f32 %v9171_v1, %v9171_v1 }
0x12d8   : > { %v4489_v33 = vpop.xlane.xlu0 %4488 }
0x12d9   : > { %v4493_v19 = vmul.f32 0.0078125, %v4489_v33  ;;  %4504 = vadd.xlane.f32.xlu1 %v4499_v55  ;;  %v4500_v56 = vmul.f32 %v9176_v35, %v9176_v35 }
0x12db   : > { %v9183_v6 = vsub.f32 %v9164_v8, %v4493_v19  ;;  %4506 = vadd.xlane.f32.xlu0 %v4500_v56 }
0x12dd   : > { %v4501_v46 = vmul.f32 %v9183_v6, %v9183_v6 }
0x12df   : > { %4508 = vadd.xlane.f32.xlu1 %v4501_v46 }
0x1364   : > { %v4503_v34 = vpop.xlane.xlu0 %4502 }
0x1365   : > { %v4510_v0 = vmul.f32 0.0078125, %v4503_v34  ;;  %v7270_v34 = vld [vmem:[#allocation6 + $0x170] sm:$0xff]  }
0x1366   : > { %v4505_v50 = vpop.xlane.xlu1 %4504 }
0x1367   : > { %v4514_v61 = vadd.f32 1e-05, %v4510_v0  ;;  %v4511_v38 = vmul.f32 0.0078125, %v4505_v50  ;;  %v7271_v0 = vld [vmem:[#allocation6 + $0x1f0] sm:$0xff]  }
0x1368   : > { %v4507_v2 = vpop.xlane.xlu0 %4506  ;;  %v7272_v50 = vld [vmem:[#allocation6 + $0x130] sm:$0xff]  }
0x1369   : > { %7518 = vrsqrt.f32 %v4514_v61  ;;  %v4515_v23 = vadd.f32 1e-05, %v4511_v38  ;;  %v4512_v63 = vmul.f32 0.0078125, %v4507_v2  ;;  %v7273_v61 = vld [vmem:[#allocation6 + $0x1b0] sm:$0xff]   ;;  %v7274_v38 = vld [vmem:[#allocation6 + $0x178] sm:$0xff]  }
0x136a   : > { %v7275_v2 = vld [vmem:[#allocation6 + $0x1f8] sm:$0xff]  }
0x136b   : > { %7520 = vrsqrt.f32 %v4515_v23  ;;  %v4516_v16 = vadd.f32 1e-05, %v4512_v63  ;;  %v7276_v23 = vld [vmem:[#allocation6 + $0x138] sm:$0xff]  }
0x136c   : > { %v4509_v15 = vpop.xlane.xlu1 %4508  ;;  %v7277_v63 = vld [vmem:[#allocation6 + $0x1b8] sm:$0xff]  }
0x136d   : > { %7522 = vrsqrt.f32 %v4516_v16  ;;  %v4513_v14 = vmul.f32 0.0078125, %v4509_v15  ;;  %v6208_v16 = vld [vmem:[%s9610_s11 + $0x4] sm:$0xf] }
0x136e   : > { %v9203_v15 = vrot.slane %v6208_v16, %v9679_v48 }
0x136f   : > { %v4517_v44 = vadd.f32 1e-05, %v4513_v14  ;;  %v9206_v14 = vrot.slane %v6208_v16, %v9681_v17 }
0x1371   : > { %7524 = vrsqrt.f32 %v4517_v44  ;;  %v9209_v44 = vrot.slane %v6208_v16, %v9680_v36 }
0x1373   : > { %v7519_v62 = vpop.eup %7518 }
0x1374   : > { %v4522_v21 = vmul.f32 %v7519_v62, %v9168_v25  ;;  %v9686_v62 = vld [vmem:[#allocation13_spill] sm:$0xff] }
0x1375   : > { %v7521_v42 = vpop.eup %7520 }
0x1376   : > { %v4523_v28 = vmul.f32 %v7521_v42, %v9171_v1  ;;  %v4532_v49 = vmul.f32 %v6206_v3, %v4522_v21 }
0x1377   : > { %v7523_v18 = vpop.eup %7522 }
0x1378   : > { %v4533_v12 = vmul.f32 %v6206_v3, %v4523_v28  ;;  %v4542_v31 = vadd.f32 %v6207_v51, %v4532_v49  ;;  %v4524_v55 = vmul.f32 %v7523_v18, %v9176_v35  ;;  %v7248_v35 = vld [vmem:[#allocation6 + $0x100] sm:$0xff]  }
0x137a   : > { %v4543_v47 = vadd.f32 %v6207_v51, %v4533_v12  ;;  %v4534_v25 = vmul.f32 %v6206_v3, %v4524_v55 }
0x137b   : > { %v7525_v33 = vpop.eup %7524 }
0x137c   : > { %v4546_v19 = vpack.c.bf16 %v4543_v47, %v4542_v31  ;;  %v4525_v56 = vmul.f32 %v7525_v33, %v9183_v6  ;;  %v4544_v5 = vadd.f32 %v6207_v51, %v4534_v25  ;;  %v7250_v6 = vld [vmem:[#allocation6 + $0x148] sm:$0xff]  }
0x137e   : > { %4797 = vmatmul.mubr.bf16.vlgmr.msra.gmra.mrb[64].mxu1 %v4546_v19  ;;  %4850 = vmatmul.mubr.bf16.vlgmr.msra.gmra.mrb[64].mxu0 %v4546_v19  ;;  %v4535_v46 = vmul.f32 %v6206_v3, %v4525_v56  ;;  %v9687_v3 = vsub.s32 3, %v9686_v62 }
0x137f   : > { %4806 = vmatprep.mubr.bf16.mxu1 %v9674_v24  ;;  %4859 = vmatprep.mubr.bf16.mxu0 %v9674_v24 }
0x1380   : > { %v4545_v1 = vadd.f32 %v6207_v51, %v4535_v46  ;;  %6458 = vmatpush3.bf16.msra.mxu1 %v7248_v35  ;;  %6486 = vmatpush3.bf16.msra.mxu0 %v7249_v53  ;;  %v9213_v21 = vrot.slane %v6208_v16, %v9687_v3 }
0x1381   : > { %6459 = vmatprep.subr.bf16.mxu1 %v7250_v6  ;;  %6487 = vmatprep.subr.bf16.mxu0 %v7251_v41 }
0x1382   : > { %v4547_v60 = vpack.c.bf16 %v4545_v1, %v4544_v5 }
0x1384   : > { %6460 = vmatpush3.bf16.msra.mxu1 %v7252_v13  ;;  %6488 = vmatpush3.bf16.msra.mxu0 %v7253_v37 }
0x1385   : > { %6461 = vmatprep.subr.bf16.mxu1 %v7254_v43  ;;  %6489 = vmatprep.subr.bf16.mxu0 %v7255_v10 }
0x1386   : > { %4807 = vmatmul.mubr.bf16.gmra.mrb[68].mxu1 %v4547_v60  ;;  %4860 = vmatmul.mubr.bf16.gmra.mrb[68].mxu0 %v4547_v60 }
0x1388   : > { %6462 = vmatpush3.bf16.msra.mxu1 %v7256_v30  ;;  %6490 = vmatpush3.bf16.msra.mxu0 %v7257_v57 }
0x1389   : > { %6463 = vmatprep.subr.bf16.mxu1 %v7258_v7  ;;  %6491 = vmatprep.subr.bf16.mxu0 %v7259_v20 }
0x138c   : > { %6464 = vmatpush3.bf16.msra.mxu1 %v7260_v9  ;;  %6492 = vmatpush3.bf16.msra.mxu0 %v7261_v29 }
0x138d   : > { %6465 = vmatprep.subr.bf16.mxu1 %v7262_v26  ;;  %6493 = vmatprep.subr.bf16.mxu0 %v7263_v32 }
0x1390   : > { %6466 = vmatpush3.bf16.msra.mxu1 %v7264_v22  ;;  %6494 = vmatpush3.bf16.msra.mxu0 %v7265_v27 }
0x1391   : > { %6467 = vmatprep.subr.bf16.mxu1 %v7266_v54  ;;  %6495 = vmatprep.subr.bf16.mxu0 %v7267_v4 }
0x1394   : > { %6468 = vmatpush3.bf16.msra.mxu1 %v7268_v58  ;;  %6496 = vmatpush3.bf16.msra.mxu0 %v7269_v59 }
0x1395   : > { %6469 = vmatprep.subr.bf16.mxu1 %v7270_v34  ;;  %6497 = vmatprep.subr.bf16.mxu0 %v7271_v0 }
0x1398   : > { %6470 = vmatpush3.bf16.msra.mxu1 %v7272_v50  ;;  %6498 = vmatpush3.bf16.msra.mxu0 %v7273_v61 }
0x1399   : > { %6471 = vmatprep.subr.bf16.mxu1 %v7274_v38  ;;  %6499 = vmatprep.subr.bf16.mxu0 %v7275_v2 }
0x139c   : > { %6472 = vmatpush3.bf16.msra.mxu1 %v7276_v23  ;;  %6500 = vmatpush3.bf16.msra.mxu0 %v7277_v63 }
0x1451   : > { %v4798_v42 = vpop.f32.mrb[64].mxu1  ;;  %v4851_v28 = vpop.f32.mrb[64].mxu0 }
0x1452   : > { %v9216_v49 = vadd.f32 %v4798_v42, %v9203_v15  ;;  %v9219_v18 = vadd.f32 %v4851_v28, %v9206_v14  ;;  %v4800_v48 = vpop.f32.mrb[65].mxu1  ;;  %v4853_v51 = vpop.f32.mrb[65].mxu0 }
0x1453   : > { %v9222_v17 = vadd.f32 %v4800_v48, %v9209_v44  ;;  %v9225_v36 = vadd.f32 %v4853_v51, %v9213_v21  ;;  %v4802_v12 = vpop.f32.mrb[66].mxu1  ;;  %v4855_v31 = vpop.f32.mrb[66].mxu0 }
0x1454   : > { %v9228_v47 = vmul.f32 0.70710677, %v9216_v49  ;;  %v9231_v55 = vmul.f32 0.70710677, %v9219_v18  ;;  %v4804_v6 = vpop.f32.mrb[67].mxu1  ;;  %v4857_v41 = vpop.f32.mrb[67].mxu0  ;;  %v9252_v10 = vadd.f32 %v4802_v12, %v9203_v15  ;;  %v9259_v7 = vadd.f32 %v4855_v31, %v9206_v14 }
0x1455   : > { %v9234_v33 = vmul.f32 0.70710677, %v9222_v17  ;;  %v9237_v19 = vmul.f32 0.70710677, %v9225_v36  ;;  %v9269_v32 = vadd.f32 %v4804_v6, %v9209_v44  ;;  %v9280_v59 = vadd.f32 %v4857_v41, %v9213_v21 }
0x1456   : > { %v4902_v56 = vand.u32 2147483647, %v9228_v47  ;;  %v4904_v25 = vand.u32 2147483647, %v9231_v55  ;;  %v9266_v26 = vmul.f32 0.70710677, %v9252_v10 }
0x1457   : > { %v9242_v46 = vand.u32 2147483647, %v9234_v33  ;;  %v9245_v1 = vand.u32 2147483647, %v9237_v19  ;;  %v9276_v4 = vmul.f32 0.70710677, %v9259_v7 }
0x1458   : > { %v4918_v5 = vmul.f32 0.3275911, %v4902_v56  ;;  %v4920_v60 = vmul.f32 0.3275911, %v4904_v25  ;;  %v5126_v54 = vsub.f32 0.0, %v4902_v56  ;;  %v5128_v34 = vsub.f32 0.0, %v4904_v25 }
0x1459   : > { %v4919_v11 = vmul.f32 0.3275911, %v9242_v46  ;;  %v4921_v53 = vmul.f32 0.3275911, %v9245_v1  ;;  %v4808_v13 = vpop.f32.mrb[68].mxu1  ;;  %v9249_v37 = vpop.f32.mrb[68].mxu0 }
0x145a   : > { %v4934_v39 = vadd.f32 1.0, %v4918_v5  ;;  %v4936_v35 = vadd.f32 1.0, %v4920_v60  ;;  %v9254_v30 = vpop.f32.mrb[69].mxu1  ;;  %v9256_v57 = vpop.f32.mrb[69].mxu0  ;;  %v4906_v58 = vand.u32 2147483647, %v9266_v26  ;;  %v5142_v38 = vmul.f32 %v5126_v54, %v4902_v56 }
0x145b   : > { %v4935_v43 = vadd.f32 1.0, %v4919_v11  ;;  %v9261_v20 = vpop.f32.mrb[70].mxu1  ;;  %v9263_v9 = vpop.f32.mrb[70].mxu0  ;;  %v4937_v29 = vadd.f32 1.0, %v4921_v53  ;;  %v4908_v0 = vand.u32 2147483647, %v9276_v4  ;;  %v5144_v62 = vmul.f32 %v5128_v34, %v4904_v25 }
0x145c   : > { %7526 = vrcp.f32 %v4934_v39  ;;  %v9271_v22 = vpop.f32.mrb[71].mxu1  ;;  %v9273_v27 = vpop.f32.mrb[71].mxu0  ;;  %v9284_v50 = vmul.f32 0.70710677, %v9269_v32  ;;  %v4922_v61 = vmul.f32 0.3275911, %v4906_v58  ;;  %v9304_v6 = vadd.f32 %v4808_v13, %v9203_v15 }
0x145d   : > { %7528 = vrcp.f32 %v4936_v35  ;;  %v4924_v2 = vmul.f32 0.3275911, %v4908_v0  ;;  %v9288_v16 = vmul.f32 0.70710677, %v9280_v59  ;;  %v5130_v48 = vsub.f32 0.0, %v4906_v58 }
0x145e   : > { %7530 = vrcp.f32 %v4935_v43  ;;  %v4907_v23 = vand.u32 2147483647, %v9284_v50  ;;  %v4938_v63 = vadd.f32 1.0, %v4922_v61  ;;  %v5158_v56 = vmul.f32 1.442695, %v5142_v38  ;;  %9688 = vst [vmem:[#allocation19_spill] sm:$0xff] %v9304_v6 }
0x145f   : > { %7532 = vrcp.f32 %v4937_v29  ;;  %v4940_v3 = vadd.f32 1.0, %v4924_v2  ;;  %v9293_v51 = vand.u32 2147483647, %v9288_v16  ;;  %v5132_v11 = vsub.f32 0.0, %v4908_v0 }
0x1460   : > { %v4923_v42 = vmul.f32 0.3275911, %v4907_v23  ;;  %7534 = vrcp.f32 %v4938_v63  ;;  %v9301_v39 = vmul.f32 0.5, %v9216_v49  ;;  %v5162_v53 = vmul.f32 1.442695, %v5144_v62 }
0x1461   : > { %7536 = vrcp.f32 %v4940_v3  ;;  %v4925_v25 = vmul.f32 0.3275911, %v9293_v51  ;;  %v5146_v29 = vmul.f32 %v5130_v48, %v4906_v58  ;;  %v9310_v61 = vmul.f32 0.5, %v9219_v18 }
0x1462   : > { %v4939_v5 = vadd.f32 1.0, %v4923_v42  ;;  %v5127_v49 = vsub.f32 0.0, %v9242_v46  ;;  %v5148_v63 = vmul.f32 %v5132_v11, %v4908_v0  ;;  %v9318_v62 = vmul.f32 0.70710677, %v9304_v6 }
0x1463   : > { %v4941_v54 = vadd.f32 1.0, %v4925_v25  ;;  %v5166_v48 = vmul.f32 1.442695, %v5146_v29  ;;  %vm5222_vm0 = vcmp.ge.f32.partialorder %v9228_v47, 0.0  ;;  %vm5224_vm1 = vcmp.ge.f32.partialorder %v9231_v55, 0.0 }
0x1464   : > { %7538 = vrcp.f32 %v4939_v5  ;;  %9689 = vst [vmem:[#allocation20_spill] sm:$0xff] %v9318_v62  ;;  %v9324_v25 = vand.u32 2147483647, %v9318_v62  ;;  %vm5226_vm2 = vcmp.ge.f32.partialorder %v9266_v26, 0.0  ;;  %vm5228_vm6 = vcmp.ge.f32.partialorder %v9276_v4, 0.0 }
0x1465   : > { %7540 = vpow2.f32 %v5158_v56  ;;  %v9391_v26 = vadd.f32 %v9254_v30, %v9209_v44  ;;  %vm5227_vm7 = vcmp.ge.f32.partialorder %v9284_v50, 0.0  ;;  %vm5223_vm8 = vcmp.ge.f32.partialorder %v9234_v33, 0.0 }
0x1466   : > { %v9290_v28 = vpop.eup %7526  ;;  %7542 = vrcp.f32 %v4941_v54  ;;  %v5170_v54 = vmul.f32 1.442695, %v5148_v63  ;;  %vm5225_vm9 = vcmp.ge.f32.partialorder %v9237_v19, 0.0  ;;  %vm5229_vm10 = vcmp.ge.f32.partialorder %v9288_v16, 0.0 }
0x1467   : > { %v9295_v12 = vpop.eup %7528  ;;  %v4982_v31 = vmul.f32 1.0614054, %v9290_v28  ;;  %7544 = vpow2.f32 %v5162_v53 }
0x1468   : > { %v4984_v60 = vmul.f32 1.0614054, %v9295_v12  ;;  %v9306_v41 = vpop.eup %7530  ;;  %7546 = vpow2.f32 %v5166_v48 }
0x1469   : > { %v4998_v35 = vadd.f32 -1.4531521, %v4982_v31  ;;  %v4983_v38 = vmul.f32 1.0614054, %v9306_v41  ;;  %v9314_v2 = vpop.eup %7532  ;;  %v5131_v31 = vsub.f32 0.0, %v4907_v23  ;;  %7548 = vpow2.f32 %v5170_v54 }
0x146a   : > { %v5000_v43 = vadd.f32 -1.4531521, %v4984_v60  ;;  %v4985_v42 = vmul.f32 1.0614054, %v9314_v2  ;;  %v9326_v0 = vpop.eup %7534 }
0x146b   : > { %v5014_v34 = vmul.f32 %v9290_v28, %v4998_v35  ;;  %v4999_v3 = vadd.f32 -1.4531521, %v4983_v38  ;;  %v5143_v35 = vmul.f32 %v5127_v49, %v9242_v46  ;;  %v9331_v53 = vpop.eup %7536  ;;  %v5133_v46 = vsub.f32 0.0, %v9293_v51 }
0x146c   : > { %v5016_v13 = vmul.f32 %v9295_v12, %v5000_v43  ;;  %v5001_v56 = vadd.f32 -1.4531521, %v4985_v42  ;;  %v5129_v43 = vsub.f32 0.0, %v9245_v1  ;;  %v5147_v42 = vmul.f32 %v5131_v31, %v4907_v23 }
0x146d   : > { %v5030_v58 = vadd.f32 1.4214138, %v5014_v34  ;;  %v5015_v60 = vmul.f32 %v9306_v41, %v4999_v3  ;;  %v4988_v3 = vmul.f32 1.0614054, %v9331_v53  ;;  %v4926_v49 = vmul.f32 0.3275911, %v9324_v25 }
0x146e   : > { %v5032_v18 = vadd.f32 1.4214138, %v5016_v13  ;;  %v5017_v38 = vmul.f32 %v9314_v2, %v5001_v56  ;;  %v4986_v13 = vmul.f32 1.0614054, %v9326_v0  ;;  %v9339_v63 = vpop.eup %7538  ;;  %v5168_v40 = vmul.f32 1.442695, %v5147_v42 }
0x146f   : > { %v5046_v5 = vmul.f32 %v9290_v28, %v5030_v58  ;;  %v5031_v34 = vadd.f32 1.4214138, %v5015_v60  ;;  %v5145_v60 = vmul.f32 %v5129_v43, %v9245_v1  ;;  %v5004_v56 = vadd.f32 -1.4531521, %v4988_v3  ;;  %v7541_v31 = vpop.eup %7540 }
0x1470   : > { %v5048_v11 = vmul.f32 %v9295_v12, %v5032_v18  ;;  %v5002_v8 = vadd.f32 -1.4531521, %v4986_v13  ;;  %v5033_v45 = vadd.f32 1.4214138, %v5017_v38  ;;  %v4987_v52 = vmul.f32 1.0614054, %v9339_v63  ;;  %v9347_v24 = vpop.eup %7542 }
0x1471   : > { %v5062_v29 = vadd.f32 -0.28449672, %v5046_v5  ;;  %v5047_v48 = vmul.f32 %v9306_v41, %v5031_v34  ;;  %v5020_v13 = vmul.f32 %v9331_v53, %v5004_v56  ;;  %v5149_v43 = vmul.f32 %v5133_v46, %v9293_v51  ;;  %v7545_v3 = vpop.eup %7544 }
0x1472   : > { %v5064_v58 = vadd.f32 -0.28449672, %v5048_v11  ;;  %v5018_v23 = vmul.f32 %v9326_v0, %v5002_v8  ;;  %v4942_v54 = vadd.f32 1.0, %v4926_v49  ;;  %v5003_v8 = vadd.f32 -1.4531521, %v4987_v52 }
0x1473   : > { %v5078_v18 = vmul.f32 %v9290_v28, %v5062_v29  ;;  %v5036_v38 = vadd.f32 1.4214138, %v5020_v13  ;;  %v5063_v56 = vadd.f32 -0.28449672, %v5047_v48  ;;  %v5049_v62 = vmul.f32 %v9314_v2, %v5033_v45 }
0x1474   : > { %v5080_v5 = vmul.f32 %v9295_v12, %v5064_v58  ;;  %v5034_v1 = vadd.f32 1.4214138, %v5018_v23  ;;  %v5160_v46 = vmul.f32 1.442695, %v5143_v35  ;;  %7550 = vpow2.f32 %v5168_v40  ;;  %v7547_v23 = vpop.eup %7546 }
0x1475   : > { %v5094_v11 = vadd.f32 0.2548296, %v5078_v18  ;;  %v4989_v18 = vmul.f32 1.0614054, %v9347_v24  ;;  %7552 = vrcp.f32 %v4942_v54  ;;  %v5079_v13 = vmul.f32 %v9306_v41, %v5063_v56 }
0x1476   : > { %v5096_v29 = vadd.f32 0.2548296, %v5080_v5  ;;  %v5050_v42 = vmul.f32 %v9326_v0, %v5034_v1  ;;  %v7549_v1 = vpop.eup %7548  ;;  %7554 = vpow2.f32 %v5160_v46  ;;  %v9372_v46 = vadd.f32 %v9249_v37, %v9206_v14 }
0x1477   : > { %v5110_v58 = vmul.f32 %v9290_v28, %v5094_v11  ;;  %v5052_v28 = vmul.f32 %v9331_v53, %v5036_v38  ;;  %v5019_v11 = vmul.f32 %v9339_v63, %v5003_v8  ;;  %v5005_v51 = vadd.f32 -1.4531521, %v4989_v18 }
0x1478   : > { %v5112_v34 = vmul.f32 %v9295_v12, %v5096_v29  ;;  %v5066_v49 = vadd.f32 -0.28449672, %v5050_v42  ;;  %v5172_v12 = vmul.f32 1.442695, %v5149_v43  ;;  %v5164_v43 = vmul.f32 1.442695, %v5145_v60 }
0x1479   : > { %v5190_v5 = vmul.f32 %v7541_v31, %v5110_v58  ;;  %v5068_v52 = vadd.f32 -0.28449672, %v5052_v28  ;;  %v5035_v29 = vadd.f32 1.4214138, %v5019_v11  ;;  %v5021_v31 = vmul.f32 %v9347_v24, %v5005_v51 }
0x147a   : > { %v5192_v6 = vmul.f32 %v7545_v3, %v5112_v34  ;;  %v5082_v58 = vmul.f32 %v9326_v0, %v5066_v49  ;;  %v5065_v3 = vadd.f32 -0.28449672, %v5049_v62  ;;  %7556 = vpow2.f32 %v5172_v12 }
0x147b   : > { %v5206_v48 = vsub.f32 1.0, %v5190_v5  ;;  %v5084_v34 = vmul.f32 %v9331_v53, %v5068_v52  ;;  %v5051_v35 = vmul.f32 %v9339_v63, %v5035_v29  ;;  %v5037_v40 = vadd.f32 1.4214138, %v5021_v31 }
0x147c   : > { %v5208_v45 = vsub.f32 1.0, %v5192_v6  ;;  %v5098_v38 = vadd.f32 0.2548296, %v5082_v58  ;;  %v5095_v5 = vadd.f32 0.2548296, %v5079_v13  ;;  %v5081_v56 = vmul.f32 %v9314_v2, %v5065_v3 }
0x147d   : > { %v5100_v54 = vadd.f32 0.2548296, %v5084_v34  ;;  %v5067_v6 = vadd.f32 -0.28449672, %v5051_v35  ;;  %v5238_v8 = vsub.f32 0.0, %v5206_v48  ;;  %v5053_v11 = vmul.f32 %v9347_v24, %v5037_v40 }
0x147e   : > { %v5240_v18 = vsub.f32 0.0, %v5208_v45  ;;  %v5114_v62 = vmul.f32 %v9326_v0, %v5098_v38  ;;  %7558 = vpow2.f32 %v5164_v43  ;;  %v4874_v60 = vmul.f32 0.5, %v9252_v10  ;;  %v7551_v29 = vpop.eup %7550 }
0x147f   : > { %v5116_v42 = vmul.f32 %v9331_v53, %v5100_v54  ;;  %v5083_v28 = vmul.f32 %v9339_v63, %v5067_v6  ;;  %v4876_v49 = vmul.f32 0.5, %v9259_v7  ;;  %v5069_v52 = vadd.f32 -0.28449672, %v5053_v11  ;;  %v9380_v10 = vpop.eup %7552 }
0x1480   : > { %v5194_v51 = vmul.f32 %v7547_v23, %v5114_v62  ;;  %v5254_v53 = vsel %vm5222_vm0, %v5206_v48, %v5238_v8  ;;  %v5256_v31 = vsel %vm5224_vm1, %v5208_v45, %v5240_v18  ;;  %v5111_v37 = vmul.f32 %v9306_v41, %v5095_v5  ;;  %v7555_v41 = vpop.eup %7554 }
0x1481   : > { %v5196_v12 = vmul.f32 %v7549_v1, %v5116_v42  ;;  %v5099_v0 = vadd.f32 0.2548296, %v5083_v28  ;;  %v5097_v23 = vadd.f32 0.2548296, %v5081_v56  ;;  %v5085_v47 = vmul.f32 %v9347_v24, %v5069_v52 }
0x1482   : > { %v5210_v13 = vsub.f32 1.0, %v5194_v51  ;;  %v9387_v48 = vmul.f32 0.70710677, %v9372_v46  ;;  %v5270_v55 = vadd.f32 1.0, %v5254_v53  ;;  %v5272_v45 = vadd.f32 1.0, %v5256_v31 }
0x1483   : > { %v5212_v58 = vsub.f32 1.0, %v5196_v12  ;;  %v5115_v7 = vmul.f32 %v9339_v63, %v5099_v0  ;;  %v5101_v40 = vadd.f32 0.2548296, %v5085_v47  ;;  %v5191_v38 = vmul.f32 %v7555_v41, %v5111_v37 }
0x1484   : > { %v5242_v1 = vsub.f32 0.0, %v5210_v13  ;;  %v9394_v63 = vand.u32 2147483647, %v9387_v48  ;;  %v7557_v43 = vpop.eup %7556  ;;  %v5113_v54 = vmul.f32 %v9314_v2, %v5097_v23  ;;  %v4990_v30 = vmul.f32 1.0614054, %v9380_v10 }
0x1485   : > { %v5244_v3 = vsub.f32 0.0, %v5212_v58  ;;  %v5195_v35 = vmul.f32 %v7551_v29, %v5115_v7  ;;  %v5117_v5 = vmul.f32 %v9347_v24, %v5101_v40  ;;  %v9403_v56 = vmul.f32 %v5270_v55, %v9301_v39 }
0x1486   : > { %v5258_v34 = vsel %vm5226_vm2, %v5210_v13, %v5242_v1  ;;  %v4928_v62 = vmul.f32 0.3275911, %v9394_v63  ;;  %v9406_v42 = vmul.f32 %v5272_v45, %v9310_v61  ;;  %v9411_v2 = vmul.f32 0.70710677, %v9391_v26 }
0x1487   : > { %v5274_v6 = vadd.f32 1.0, %v5258_v34  ;;  %v5260_v8 = vsel %vm5228_vm6, %v5212_v58, %v5244_v3  ;;  %v5211_v51 = vsub.f32 1.0, %v5195_v35  ;;  %v5197_v24 = vmul.f32 %v7557_v43, %v5117_v5 }
0x1488   : > { %v5276_v18 = vadd.f32 1.0, %v5260_v8  ;;  %v7559_v4 = vpop.eup %7558  ;;  %v4944_v12 = vadd.f32 1.0, %v4928_v62  ;;  %v9418_v39 = vand.u32 2147483647, %v9411_v2  ;;  %v5207_v61 = vsub.f32 1.0, %v5191_v38 }
0x1489   : > { %v9408_v28 = vmul.f32 %v5274_v6, %v4874_v60  ;;  %v5193_v0 = vmul.f32 %v7559_v4, %v5113_v54  ;;  %v5006_v29 = vadd.f32 -1.4531521, %v4990_v30  ;;  %v5213_v31 = vsub.f32 1.0, %v5197_v24 }
0x148a   : > { %v9413_v11 = vmul.f32 %v5276_v18, %v4876_v49  ;;  %7560 = vrcp.f32 %v4944_v12  ;;  %v4927_v53 = vmul.f32 0.3275911, %v9418_v39  ;;  %v5243_v49 = vsub.f32 0.0, %v5211_v51 }
0x148b   : > { %v5302_v52 = vpack.c.bf16 %v9408_v28, %v9403_v56  ;;  %v5209_v13 = vsub.f32 1.0, %v5193_v0  ;;  %v9425_v23 = vadd.f32 %v9256_v57, %v9213_v21  ;;  %v5239_v58 = vsub.f32 0.0, %v5207_v61 }
0x148c   : > { %v5304_v60 = vpack.c.bf16 %v9413_v11, %v9406_v42  ;;  %v4943_v37 = vadd.f32 1.0, %v4927_v53  ;;  %v5022_v7 = vmul.f32 %v9380_v10, %v5006_v29  ;;  %v9430_v1 = vadd.f32 %v9261_v20, %v9203_v15 }
0x148d   : > { %v9434_v47 = vadd.f32 %v9263_v9, %v9206_v14  ;;  %v4871_v55 = vmul.f32 0.5, %v9222_v17  ;;  %v4873_v45 = vmul.f32 0.5, %v9225_v36  ;;  %v5259_v57 = vsel %vm5227_vm7, %v5211_v51, %v5243_v49 }
0x148e   : > { %7562 = vrcp.f32 %v4943_v37  ;;  %v5245_v3 = vsub.f32 0.0, %v5213_v31  ;;  %v9440_v41 = vmul.f32 0.70710677, %v9425_v23  ;;  %v9443_v34 = vmul.f32 0.70710677, %v9430_v1 }
0x148f   : > { %v5241_v15 = vsub.f32 0.0, %v5209_v13  ;;  %v5134_v14 = vsub.f32 0.0, %v9324_v25  ;;  %v9448_v17 = vmul.f32 0.70710677, %v9434_v47  ;;  %v5255_v36 = vsel %vm5223_vm8, %v5207_v61, %v5239_v58 }
0x1490   : > { %v5038_v20 = vadd.f32 1.4214138, %v5022_v7  ;;  %v9451_v9 = vand.u32 2147483647, %v9440_v41  ;;  %v9454_v50 = vand.u32 2147483647, %v9443_v34  ;;  %v5261_v43 = vsel %vm5229_vm10, %v5213_v31, %v5245_v3 }
0x1491   : > { %v5275_v35 = vadd.f32 1.0, %v5259_v57  ;;  %v9459_v33 = vand.u32 2147483647, %v9448_v17  ;;  %v4875_v40 = vmul.f32 0.5, %v9269_v32  ;;  %v5271_v8 = vadd.f32 1.0, %v5255_v36 }
0x1492   : > { %v4929_v38 = vmul.f32 0.3275911, %v9451_v9  ;;  %v4930_v54 = vmul.f32 0.3275911, %v9454_v50  ;;  %v5257_v18 = vsel %vm5225_vm9, %v5209_v13, %v5241_v15  ;;  %v5150_v5 = vmul.f32 %v5134_v14, %v9324_v25 }
0x1493   : > { %v4932_v19 = vmul.f32 0.3275911, %v9459_v33  ;;  %v5054_v16 = vmul.f32 %v9380_v10, %v5038_v20  ;;  %v9472_v32 = vadd.f32 %v9271_v22, %v9209_v44  ;;  %v5291_v4 = vmul.f32 %v5275_v35, %v4875_v40 }
0x1494   : > { %v9464_v6 = vpop.eup %7560  ;;  %v4945_v62 = vadd.f32 1.0, %v4929_v38  ;;  %v5277_v51 = vadd.f32 1.0, %v5261_v43  ;;  %v5136_v24 = vsub.f32 0.0, %v9394_v63  ;;  %v4946_v12 = vadd.f32 1.0, %v4930_v54 }
0x1495   : > { %v4992_v30 = vmul.f32 1.0614054, %v9464_v6  ;;  %v4877_v0 = vmul.f32 0.5, %v9280_v59  ;;  %v4948_v25 = vadd.f32 1.0, %v4932_v19  ;;  %v5287_v53 = vmul.f32 %v5271_v8, %v4871_v55 }
0x1496   : > { %7564 = vrcp.f32 %v4945_v62  ;;  %v5273_v49 = vadd.f32 1.0, %v5257_v18  ;;  %v5174_v31 = vmul.f32 1.442695, %v5150_v5  ;;  %v5070_v13 = vadd.f32 -0.28449672, %v5054_v16 }
0x1497   : > { %v5008_v61 = vadd.f32 -1.4531521, %v4992_v30  ;;  %7566 = vrcp.f32 %v4946_v12  ;;  %v9481_v37 = vmul.f32 0.70710677, %v9472_v32  ;;  %v5293_v58 = vmul.f32 %v5277_v51, %v4877_v0 }
0x1498   : > { %v9476_v29 = vpop.eup %7562  ;;  %v5152_v59 = vmul.f32 %v5136_v24, %v9394_v63  ;;  %v9486_v7 = vadd.f32 %v9273_v27, %v9213_v21  ;;  %v5303_v57 = vpack.c.bf16 %v5291_v4, %v5287_v53  ;;  %7568 = vrcp.f32 %v4948_v25 }
0x1499   : > { %v5024_v44 = vmul.f32 %v9464_v6, %v5008_v61  ;;  %v4991_v22 = vmul.f32 1.0614054, %v9476_v29  ;;  %v9489_v15 = vand.u32 2147483647, %v9481_v37  ;;  %v5289_v14 = vmul.f32 %v5273_v49, %v4873_v45 }
0x149a   : > { %7570 = vpow2.f32 %v5174_v31  ;;  %v5135_v36 = vsub.f32 0.0, %v9418_v39  ;;  %v9493_v20 = vmul.f32 0.70710677, %v9486_v7  ;;  %5607 = vmatprep.mubr.bf16.mxu1 %v5303_v57  ;;  %v5086_v63 = vmul.f32 %v9380_v10, %v5070_v13 }
0x149b   : > { %v5040_v55 = vadd.f32 1.4214138, %v5024_v44  ;;  %v5007_v3 = vadd.f32 -1.4531521, %v4991_v22  ;;  %v4931_v35 = vmul.f32 0.3275911, %v9489_v15  ;;  %5608 = vmatmul.mubr.bf16.vlgmr.msra.gmra.mrb[72].mxu1 %v5302_v52  ;;  %v5305_v38 = vpack.c.bf16 %v5293_v58, %v5289_v14 }
0x149c   : > { %v5178_v45 = vmul.f32 1.442695, %v5152_v59  ;;  %v5138_v40 = vsub.f32 0.0, %v9454_v50  ;;  %v9504_v43 = vand.u32 2147483647, %v9493_v20  ;;  %v5151_v5 = vmul.f32 %v5135_v36, %v9418_v39 }
0x149d   : > { %v5056_v21 = vmul.f32 %v9464_v6, %v5040_v55  ;;  %v5023_v27 = vmul.f32 %v9476_v29, %v5007_v3  ;;  %v4947_v18 = vadd.f32 1.0, %v4931_v35  ;;  %v5137_v19 = vsub.f32 0.0, %v9451_v9  ;;  %5656 = vmatprep.mubr.bf16.mxu0 %v5305_v38 }
0x149e   : > { %v4933_v16 = vmul.f32 0.3275911, %v9504_v43  ;;  %v5102_v56 = vadd.f32 0.2548296, %v5086_v63  ;;  %v5140_v52 = vsub.f32 0.0, %v9459_v33  ;;  %5657 = vmatmul.mubr.bf16.vlgmr.msra.gmra.mrb[72].mxu0 %v5304_v60  ;;  %v5154_v51 = vmul.f32 %v5138_v40, %v9454_v50 }
0x149f   : > { %v5072_v54 = vadd.f32 -0.28449672, %v5056_v21  ;;  %v5039_v8 = vadd.f32 1.4214138, %v5023_v27  ;;  %7572 = vrcp.f32 %v4947_v18  ;;  %v5176_v61 = vmul.f32 1.442695, %v5151_v5 }
0x14a0   : > { %v9509_v30 = vpop.eup %7564  ;;  %v4949_v24 = vadd.f32 1.0, %v4933_v16  ;;  %7574 = vpow2.f32 %v5178_v45  ;;  %v5153_v53 = vmul.f32 %v5137_v19, %v9451_v9  ;;  %v5118_v11 = vmul.f32 %v9380_v10, %v5102_v56 }
0x14a1   : > { %v5055_v28 = vmul.f32 %v9476_v29, %v5039_v8  ;;  %v9516_v62 = vpop.eup %7566  ;;  %v5088_v39 = vmul.f32 %v9464_v6, %v5072_v54  ;;  %v4993_v4 = vmul.f32 1.0614054, %v9509_v30  ;;  %v5156_v49 = vmul.f32 %v5140_v52, %v9459_v33 }
0x14a2   : > { %v4994_v0 = vmul.f32 1.0614054, %v9516_v62  ;;  %7576 = vrcp.f32 %v4949_v24  ;;  %v9523_v42 = vpop.eup %7568  ;;  %v5182_v44 = vmul.f32 1.442695, %v5154_v51  ;;  %v5139_v9 = vsub.f32 0.0, %v9489_v15 }
0x14a3   : > { %v5071_v12 = vadd.f32 -0.28449672, %v5055_v28  ;;  %v5009_v25 = vadd.f32 -1.4531521, %v4993_v4  ;;  %v5104_v13 = vadd.f32 0.2548296, %v5088_v39  ;;  %7578 = vpow2.f32 %v5176_v61 }
0x14a4   : > { %v5010_v60 = vadd.f32 -1.4531521, %v4994_v0  ;;  %v7571_v31 = vpop.eup %7570  ;;  %v4996_v22 = vmul.f32 1.0614054, %v9523_v42  ;;  %v5180_v55 = vmul.f32 1.442695, %v5153_v53  ;;  %7580 = vpow2.f32 %v5182_v44 }
0x14a5   : > { %v5025_v50 = vmul.f32 %v9509_v30, %v5009_v25  ;;  %v5087_v58 = vmul.f32 %v9476_v29, %v5071_v12  ;;  %v5198_v3 = vmul.f32 %v7571_v31, %v5118_v11  ;;  %v5186_v33 = vmul.f32 1.442695, %v5156_v49 }
0x14a6   : > { %v5026_v59 = vmul.f32 %v9516_v62, %v5010_v60  ;;  %v5012_v10 = vadd.f32 -1.4531521, %v4996_v22  ;;  %v5141_v36 = vsub.f32 0.0, %v9504_v43  ;;  %v5120_v63 = vmul.f32 %v9464_v6, %v5104_v13 }
0x14a7   : > { %v5041_v57 = vadd.f32 1.4214138, %v5025_v50  ;;  %v5103_v45 = vadd.f32 0.2548296, %v5087_v58  ;;  %v5155_v38 = vmul.f32 %v5139_v9, %v9489_v15  ;;  %7582 = vpow2.f32 %v5180_v55  ;;  %v9690_v55 = vld [vmem:[#allocation19_spill] sm:$0xff] }
0x14a8   : > { %v5042_v14 = vadd.f32 1.4214138, %v5026_v59  ;;  %v5028_v27 = vmul.f32 %v9523_v42, %v5012_v10  ;;  %v5214_v19 = vsub.f32 1.0, %v5198_v3  ;;  %7584 = vpow2.f32 %v5186_v33  ;;  %v9691_v3 = vld [vmem:[#allocation20_spill] sm:$0xff] }
0x14a9   : > { %v5057_v21 = vmul.f32 %v9509_v30, %v5041_v57  ;;  %v9536_v35 = vpop.eup %7572  ;;  %v5157_v16 = vmul.f32 %v5141_v36, %v9504_v43  ;;  %v5184_v51 = vmul.f32 1.442695, %v5155_v38  ;;  %v5119_v12 = vmul.f32 %v9476_v29, %v5103_v45 }
0x14aa   : > { %v5058_v40 = vmul.f32 %v9516_v62, %v5042_v14  ;;  %v5044_v8 = vadd.f32 1.4214138, %v5028_v27  ;;  %v4995_v18 = vmul.f32 1.0614054, %v9536_v35  ;;  %v7575_v5 = vpop.eup %7574  ;;  %v5246_v43 = vsub.f32 0.0, %v5214_v19 }
0x14ab   : > { %v5073_v54 = vadd.f32 -0.28449672, %v5057_v21  ;;  %v5200_v28 = vmul.f32 %v7575_v5, %v5120_v63  ;;  %v5188_v50 = vmul.f32 1.442695, %v5157_v16  ;;  %7586 = vpow2.f32 %v5184_v51 }
0x14ac   : > { %v5074_v6 = vadd.f32 -0.28449672, %v5058_v40  ;;  %v9542_v56 = vpop.eup %7576  ;;  %v5060_v39 = vmul.f32 %v9523_v42, %v5044_v8  ;;  %v5011_v4 = vadd.f32 -1.4531521, %v4995_v18  ;;  %v4878_v10 = vmul.f32 0.5, %v9690_v55 }
0x14ad   : > { %v5089_v52 = vmul.f32 %v9509_v30, %v5073_v54  ;;  %v4997_v24 = vmul.f32 1.0614054, %v9542_v56  ;;  %v7579_v60 = vpop.eup %7578  ;;  %v5216_v49 = vsub.f32 1.0, %v5200_v28  ;;  %vm5230_vm11 = vcmp.ge.f32.partialorder %v9691_v3, 0.0 }
0x14ae   : > { %v5090_v15 = vmul.f32 %v9516_v62, %v5074_v6  ;;  %v5076_v61 = vadd.f32 -0.28449672, %v5060_v39  ;;  %v5027_v25 = vmul.f32 %v9536_v35, %v5011_v4  ;;  %v7581_v58 = vpop.eup %7580  ;;  %v5199_v59 = vmul.f32 %v7579_v60, %v5119_v12 }
0x14af   : > { %v5105_v0 = vadd.f32 0.2548296, %v5089_v52  ;;  %v5013_v11 = vadd.f32 -1.4531521, %v4997_v24  ;;  %v5248_v63 = vsub.f32 0.0, %v5216_v49  ;;  %7588 = vpow2.f32 %v5188_v50 }
0x14b0   : > { %v5106_v53 = vadd.f32 0.2548296, %v5090_v15  ;;  %v5092_v31 = vmul.f32 %v9523_v42, %v5076_v61  ;;  %v5043_v13 = vadd.f32 1.4214138, %v5027_v25  ;;  %v5262_v27 = vsel %vm5230_vm11, %v5214_v19, %v5246_v43 }
0x14b1   : > { %v5121_v44 = vmul.f32 %v9509_v30, %v5105_v0  ;;  %v5029_v29 = vmul.f32 %v9542_v56, %v5013_v11  ;;  %v7583_v36 = vpop.eup %7582  ;;  %v4880_v54 = vmul.f32 0.5, %v9372_v46  ;;  %v5215_v8 = vsub.f32 1.0, %v5199_v59 }
0x14b2   : > { %v5122_v22 = vmul.f32 %v9516_v62, %v5106_v53  ;;  %v5108_v9 = vadd.f32 0.2548296, %v5092_v31  ;;  %v5059_v57 = vmul.f32 %v9536_v35, %v5043_v13  ;;  %v7585_v62 = vpop.eup %7584  ;;  %vm5232_vm12 = vcmp.ge.f32.partialorder %v9387_v48, 0.0 }
0x14b3   : > { %v5045_v33 = vadd.f32 1.4214138, %v5029_v29  ;;  %v5201_v45 = vmul.f32 %v7583_v36, %v5121_v44  ;;  %vm5234_vm13 = vcmp.ge.f32.partialorder %v9443_v34, 0.0  ;;  %v5278_v16 = vadd.f32 1.0, %v5262_v27 }
0x14b4   : > { %v5202_v14 = vmul.f32 %v7581_v58, %v5122_v22  ;;  %v5124_v30 = vmul.f32 %v9523_v42, %v5108_v9  ;;  %v5075_v21 = vadd.f32 -0.28449672, %v5059_v57  ;;  %v5264_v28 = vsel %vm5232_vm12, %v5216_v49, %v5248_v63 }
0x14b5   : > { %v5061_v38 = vmul.f32 %v9542_v56, %v5045_v33  ;;  %v5217_v39 = vsub.f32 1.0, %v5201_v45  ;;  %v4882_v4 = vmul.f32 0.5, %v9430_v1  ;;  %v5247_v51 = vsub.f32 0.0, %v5215_v8  ;;  %v7587_v48 = vpop.eup %7586 }
0x14b6   : > { %v5218_v40 = vsub.f32 1.0, %v5202_v14  ;;  %v5204_v18 = vmul.f32 %v7585_v62, %v5124_v30  ;;  %v5091_v5 = vmul.f32 %v9536_v35, %v5075_v21  ;;  %v5280_v61 = vadd.f32 1.0, %v5264_v28 }
0x14b7   : > { %v5077_v42 = vadd.f32 -0.28449672, %v5061_v38  ;;  %vm5231_vm14 = vcmp.ge.f32.partialorder %v9411_v2, 0.0  ;;  %vm5236_vm15 = vcmp.ge.f32.partialorder %v9448_v17, 0.0  ;;  %v5294_v25 = vmul.f32 %v5278_v16, %v4878_v10 }
0x14b8   : > { %v5250_v6 = vsub.f32 0.0, %v5218_v40  ;;  %v5220_v52 = vsub.f32 1.0, %v5204_v18  ;;  %v5107_v19 = vadd.f32 0.2548296, %v5091_v5  ;;  %v5249_v1 = vsub.f32 0.0, %v5217_v39 }
0x14b9   : > { %v5093_v46 = vmul.f32 %v9542_v56, %v5077_v42  ;;  %v4884_v60 = vmul.f32 0.5, %v9434_v47  ;;  %v7589_v13 = vpop.eup %7588  ;;  %v5263_v50 = vsel %vm5231_vm14, %v5215_v8, %v5247_v51  ;;  %v5296_v22 = vmul.f32 %v5280_v61, %v4880_v54 }
0x14ba   : > { %v5266_v15 = vsel %vm5234_vm13, %v5218_v40, %v5250_v6  ;;  %v5252_v12 = vsub.f32 0.0, %v5220_v52  ;;  %v5123_v0 = vmul.f32 %v9536_v35, %v5107_v19  ;;  %vm5233_vm3 = vcmp.ge.f32.partialorder %v9440_v41, 0.0 }
0x14bb   : > { %v5282_v24 = vadd.f32 1.0, %v5266_v15  ;;  %v5109_v34 = vadd.f32 0.2548296, %v5093_v46  ;;  %vm5235_vm4 = vcmp.ge.f32.partialorder %v9481_v37, 0.0  ;;  %v5279_v58 = vadd.f32 1.0, %v5263_v50  ;;  %v9694_v46 = vld [vmem:[#allocation22_spill] sm:$0xff] }
0x14bc   : > { %v5268_v53 = vsel %vm5236_vm15, %v5220_v52, %v5252_v12  ;;  %v5203_v11 = vmul.f32 %v7587_v48, %v5123_v0  ;;  %v5265_v59 = vsel %vm5233_vm3, %v5217_v39, %v5249_v1  ;;  %v4879_v55 = vmul.f32 0.5, %v9391_v26 }
0x14bd   : > { %v5298_v43 = vmul.f32 %v5282_v24, %v4882_v4  ;;  %v5284_v49 = vadd.f32 1.0, %v5268_v53  ;;  %v5125_v31 = vmul.f32 %v9542_v56, %v5109_v34  ;;  %v4883_v56 = vmul.f32 0.5, %v9472_v32  ;;  %v9693_v4 = vld [vmem:[#allocation21_spill] sm:$0xff] }
0x14be   : > { %v5219_v35 = vsub.f32 1.0, %v5203_v11  ;;  %v5281_v14 = vadd.f32 1.0, %v5265_v59  ;;  %vm5237_vm5 = vcmp.ge.f32.partialorder %v9493_v20, 0.0  ;;  %v5295_v33 = vmul.f32 %v5279_v58, %v4879_v55  ;;  %v6242_v20 = vld [vmem:[%s9612_s13 + $0x1] ss:$0 sm:$0xff] }
0x14bf   : > { %v5306_v44 = vpack.c.bf16 %v5298_v43, %v5294_v25  ;;  %v5300_v29 = vmul.f32 %v5284_v49, %v4884_v60  ;;  %v5205_v2 = vmul.f32 %v7589_v13, %v5125_v31  ;;  %v4881_v37 = vmul.f32 0.5, %v9425_v23  ;;  %v7283_v58 = vld [vmem:[#allocation7 + $0x14] ss:$8 sps:$4 sm:$0xff]   ;;  %v7281_v59 = vld [vmem:[#allocation7 + $0x10] ss:$8 sps:$4 sm:$0xff]  }
0x14c0   : > { %v5251_v17 = vsub.f32 0.0, %v5219_v35  ;;  %v4885_v63 = vmul.f32 0.5, %v9486_v7  ;;  %v9692_v32 = vmov 0  }
0x14c1   : > { %v5221_v9 = vsub.f32 1.0, %v5205_v2  ;;  %v5308_v57 = vpack.c.bf16 %v5300_v29, %v5296_v22  ;;  %v5297_v62 = vmul.f32 %v5281_v14, %v4881_v37  ;;  %v9696_v22 = vld [vmem:[#allocation18_spill] sm:$0xff]  ;;  %v7287_v37 = vld [vmem:[#allocation7 + $0x30] ss:$8 sps:$4 sm:$0xff]  }
0x14c2   : > { %v5267_v47 = vsel %vm5235_vm4, %v5219_v35, %v5251_v17  ;;  %v9695_v35 = vld [vmem:[#allocation17_spill] sm:$0xff] }
0x14c3   : > { %v5283_v10 = vadd.f32 1.0, %v5267_v47  ;;  %v5253_v3 = vsub.f32 0.0, %v5221_v9  ;;  %v7278_v2 = vld [vmem:[#allocation7] ss:$8 sps:$4 sm:$0xff]   ;;  %v7280_v17 = vld [vmem:[#allocation7 + $0x4] ss:$8 sps:$4 sm:$0xff]  }
0x14c4   : > { %5841 = vmatprep.subr.bf16.mxu1 %v7280_v17 }
0x14c5   : > { %v5299_v36 = vmul.f32 %v5283_v10, %v4883_v56  ;;  %v5269_v41 = vsel %vm5237_vm5, %v5221_v9, %v5253_v3  ;;  %5842 = vmatpush1.bf16.msra.mxu1 %v7278_v2 }
0x14c6   : > { %v5285_v30 = vadd.f32 1.0, %v5269_v41  ;;  %5843 = vmatprep.subr.bf16.mxu1 %v7283_v58  ;;  %v7289_v41 = vld [vmem:[#allocation7 + $0x34] ss:$8 sps:$4 sm:$0xff]  }
0x14c7   : > { %v5307_v21 = vpack.c.bf16 %v5299_v36, %v5295_v33  ;;  %v7284_v33 = vld [vmem:[#allocation7 + $0x20] ss:$8 sps:$4 sm:$0xff]   ;;  %v7286_v36 = vld [vmem:[#allocation7 + $0x24] ss:$8 sps:$4 sm:$0xff]  }
0x14c8   : > { %v5301_v27 = vmul.f32 %v5285_v30, %v4885_v63 }
0x14c9   : > { %5615 = vmatprep.mubr.bf16.mxu1 %v5307_v21  ;;  %5844 = vmatpush1.bf16.msra.mxu1 %v7281_v59 }
0x14ca   : > { %v5309_v26 = vpack.c.bf16 %v5301_v27, %v5297_v62  ;;  %5616 = vmatmul.mubr.bf16.gmra.mrb[76].mxu1 %v5306_v44  ;;  %5845 = vmatprep.subr.bf16.mxu1 %v7286_v36 }
0x14cb   : > { %5873 = vmatprep.mubr.bf16.mxu1 %v9692_v32 }
0x14cc   : > { %5664 = vmatprep.mubr.bf16.mxu0 %v5309_v26 }
0x14cd   : > { %5665 = vmatmul.mubr.bf16.gmra.mrb[76].mxu0 %v5308_v57  ;;  %5846 = vmatpush1.bf16.msra.mxu1 %v7284_v33 }
0x14ce   : > { %5847 = vmatprep.subr.bf16.mxu1 %v7289_v41 }
0x14d1   : > { %5848 = vmatpush1.bf16.msra.mxu1 %v7287_v37 }
0x156e   : > { %v6473_v45 = vpop.f32.mrb[72].mxu1 }
0x156f   : > { %v6474_v40 = vpop.f32.mrb[73].mxu1 }
0x1570   : > { %v6475_v23 = vadd.f32 %v6474_v40, %v6473_v45  ;;  %v6476_v38 = vpop.f32.mrb[74].mxu1  ;;  %v7292_v40 = vld [vmem:[#allocation7 + $0x44] ss:$8 sps:$4 sm:$0xff]  }
0x1571   : > { %v6477_v7 = vpop.f32.mrb[75].mxu1  ;;  %v6501_v54 = vpop.f32.mrb[72].mxu0  ;;  %5849 = vmatprep.subr.bf16.mxu1 %v7292_v40 }
0x1572   : > { %v5610_v8 = vadd.f32 %v6475_v23, %v6242_v20  ;;  %v6478_v18 = vadd.f32 %v6477_v7, %v6476_v38  ;;  %v6502_v5 = vpop.f32.mrb[73].mxu0  ;;  %v7290_v23 = vld [vmem:[#allocation7 + $0x40] ss:$8 sps:$4 sm:$0xff]   ;;  %v7295_v38 = vld [vmem:[#allocation7 + $0x54] ss:$8 sps:$4 sm:$0xff]  }
0x1573   : > { %v6503_v6 = vadd.f32 %v6502_v5, %v6501_v54  ;;  %v6504_v42 = vpop.f32.mrb[74].mxu0  ;;  %5850 = vmatpush1.bf16.msra.mxu1 %v7290_v23  ;;  %v7293_v7 = vld [vmem:[#allocation7 + $0x50] ss:$8 sps:$4 sm:$0xff]   ;;  %v7298_v54 = vld [vmem:[#allocation7 + $0x64] ss:$8 sps:$4 sm:$0xff]  }
0x1574   : > { %v5613_v16 = vadd.f32 %v6478_v18, %v6242_v20  ;;  %v6505_v28 = vpop.f32.mrb[75].mxu0  ;;  %5851 = vmatprep.subr.bf16.mxu1 %v7295_v38  ;;  %v7301_v18 = vld [vmem:[#allocation7 + $0x74] ss:$8 sps:$4 sm:$0xff]   ;;  %v7299_v5 = vld [vmem:[#allocation7 + $0x70] ss:$8 sps:$4 sm:$0xff]  }
0x1575   : > { %v5659_v52 = vadd.f32 %v6503_v6, %v5610_v8  ;;  %v6506_v19 = vadd.f32 %v6505_v28, %v6504_v42  ;;  %v7296_v8 = vld [vmem:[#allocation7 + $0x60] ss:$8 sps:$4 sm:$0xff]  }
0x1577   : > { %v5662_v39 = vadd.f32 %v6506_v19, %v5613_v16  ;;  %v5673_v15 = vadd.f32 %v5659_v52, %v9693_v4  ;;  %5852 = vmatpush1.bf16.msra.mxu1 %v7293_v7  ;;  %v6275_v4 = vld [vmem:[%s9697_s23] ss:$0 sm:$0xff] }
0x1578   : > { %5853 = vmatprep.subr.bf16.mxu1 %v7298_v54 }
0x1579   : > { %5679 = vadd.xlane.f32.xlu0 %v5673_v15  ;;  %v5674_v51 = vadd.f32 %v5662_v39, %v9694_v46 }
0x157b   : > { %5681 = vadd.xlane.f32.xlu1 %v5674_v51  ;;  %5854 = vmatpush1.bf16.msra.mxu1 %v7296_v8 }
0x157c   : > { %5855 = vmatprep.subr.bf16.mxu1 %v7301_v18 }
0x157f   : > { %5856 = vmatpush1.bf16.msra.mxu1 %v7299_v5 }
0x159d   : > { %v6479_v24 = vpop.f32.mrb[76].mxu1 }
0x159e   : > { %v6480_v12 = vpop.f32.mrb[77].mxu1 }
0x159f   : > { %v6481_v0 = vadd.f32 %v6480_v12, %v6479_v24  ;;  %v6482_v48 = vpop.f32.mrb[78].mxu1  ;;  %v6276_v12 = vld [vmem:[%s9698_s18] ss:$0 sm:$0xff] }
0x15a0   : > { %v6507_v61 = vpop.f32.mrb[76].mxu0  ;;  %v6483_v34 = vpop.f32.mrb[79].mxu1 }
0x15a1   : > { %v5618_v25 = vadd.f32 %v6481_v0, %v6242_v20  ;;  %v6508_v43 = vpop.f32.mrb[77].mxu0  ;;  %v6484_v53 = vadd.f32 %v6483_v34, %v6482_v48 }
0x15a2   : > { %v6509_v11 = vadd.f32 %v6508_v43, %v6507_v61  ;;  %v6510_v1 = vpop.f32.mrb[78].mxu0 }
0x15a3   : > { %v5621_v60 = vadd.f32 %v6484_v53, %v6242_v20  ;;  %v6511_v49 = vpop.f32.mrb[79].mxu0 }
0x15a4   : > { %v5667_v31 = vadd.f32 %v6509_v11, %v5618_v25  ;;  %v6512_v13 = vadd.f32 %v6511_v49, %v6510_v1 }
0x15a6   : > { %v5670_v50 = vadd.f32 %v6512_v13, %v5621_v60  ;;  %v5675_v44 = vadd.f32 %v5667_v31, %v9695_v35 }
0x15a8   : > { %5683 = vadd.xlane.f32.xlu0 %v5675_v44  ;;  %v5676_v29 = vadd.f32 %v5670_v50, %v9696_v22 }
0x15aa   : > { %5685 = vadd.xlane.f32.xlu1 %v5676_v29 }
0x1606   : > { %v5680_v9 = vpop.xlane.xlu0 %5679 }
0x1607   : > { %v5687_v57 = vmul.f32 0.0078125, %v5680_v9 }
0x1608   : > { %v5682_v47 = vpop.xlane.xlu1 %5681 }
0x1609   : > { %v5691_v55 = vsub.f32 %v5673_v15, %v5687_v57  ;;  %v5688_v56 = vmul.f32 0.0078125, %v5682_v47 }
0x160b   : > { %v5692_v10 = vsub.f32 %v5674_v51, %v5688_v56  ;;  %v5695_v3 = vmul.f32 %v5691_v55, %v5691_v55 }
0x160d   : > { %5699 = vadd.xlane.f32.xlu0 %v5695_v3  ;;  %v5696_v14 = vmul.f32 %v5692_v10, %v5692_v10 }
0x160f   : > { %5701 = vadd.xlane.f32.xlu1 %v5696_v14 }
0x1635   : > { %v5684_v63 = vpop.xlane.xlu0 %5683 }
0x1636   : > { %v5689_v30 = vmul.f32 0.0078125, %v5684_v63 }
0x1637   : > { %v5686_v21 = vpop.xlane.xlu1 %5685 }
0x1638   : > { %v5693_v62 = vsub.f32 %v5675_v44, %v5689_v30  ;;  %v5690_v27 = vmul.f32 0.0078125, %v5686_v21 }
0x163a   : > { %v5694_v26 = vsub.f32 %v5676_v29, %v5690_v27  ;;  %v5697_v45 = vmul.f32 %v5693_v62, %v5693_v62 }
0x163c   : > { %5703 = vadd.xlane.f32.xlu0 %v5697_v45  ;;  %v5698_v20 = vmul.f32 %v5694_v26, %v5694_v26 }
0x163e   : > { %5705 = vadd.xlane.f32.xlu1 %v5698_v20 }
0x169a   : > { %v5700_v6 = vpop.xlane.xlu0 %5699 }
0x169b   : > { %v5707_v42 = vmul.f32 0.0078125, %v5700_v6 }
0x169c   : > { %v5702_v16 = vpop.xlane.xlu1 %5701 }
0x169d   : > { %v5711_v28 = vadd.f32 1e-05, %v5707_v42  ;;  %v5708_v52 = vmul.f32 0.0078125, %v5702_v16 }
0x169f   : > { %7590 = vrsqrt.f32 %v5711_v28  ;;  %v5712_v19 = vadd.f32 1e-05, %v5708_v52 }
0x16a1   : > { %7592 = vrsqrt.f32 %v5712_v19 }
0x16a9   : > { %v7591_v39 = vpop.eup %7590 }
0x16aa   : > { %v5719_v15 = vmul.f32 %v7591_v39, %v5691_v55 }
0x16ab   : > { %v7593_v46 = vpop.eup %7592 }
0x16ac   : > { %v5729_v51 = vmul.f32 %v6275_v4, %v5719_v15  ;;  %v5720_v24 = vmul.f32 %v7593_v46, %v5692_v10 }
0x16ae   : > { %v5730_v0 = vmul.f32 %v6275_v4, %v5720_v24  ;;  %v5739_v48 = vadd.f32 %v6276_v12, %v5729_v51 }
0x16b0   : > { %v5740_v61 = vadd.f32 %v6276_v12, %v5730_v0 }
0x16b2   : > { %v5743_v34 = vpack.c.bf16 %v5740_v61, %v5739_v48 }
0x16b4   : > { %5874 = vmatmul.mubr.bf16.vlgmr.msra.gmra.mrb[80].mxu1 %v5743_v34 }
0x16b5   : > { %5883 = vmatprep.mubr.bf16.mxu1 %v9692_v32 }
0x16c9   : > { %v5704_v25 = vpop.xlane.xlu0 %5703 }
0x16ca   : > { %v5709_v43 = vmul.f32 0.0078125, %v5704_v25 }
0x16cb   : > { %v5706_v53 = vpop.xlane.xlu1 %5705 }
0x16cc   : > { %v5713_v11 = vadd.f32 1e-05, %v5709_v43  ;;  %v5710_v1 = vmul.f32 0.0078125, %v5706_v53 }
0x16ce   : > { %7594 = vrsqrt.f32 %v5713_v11  ;;  %v5714_v60 = vadd.f32 1e-05, %v5710_v1 }
0x16d0   : > { %7596 = vrsqrt.f32 %v5714_v60 }
0x16d8   : > { %v7595_v49 = vpop.eup %7594 }
0x16d9   : > { %v5721_v31 = vmul.f32 %v7595_v49, %v5693_v62 }
0x16da   : > { %v7597_v13 = vpop.eup %7596 }
0x16db   : > { %v5722_v50 = vmul.f32 %v7597_v13, %v5694_v26  ;;  %v5731_v35 = vmul.f32 %v6275_v4, %v5721_v31 }
0x16dd   : > { %v5732_v44 = vmul.f32 %v6275_v4, %v5722_v50  ;;  %v5741_v22 = vadd.f32 %v6276_v12, %v5731_v35 }
0x16df   : > { %v5742_v29 = vadd.f32 %v6276_v12, %v5732_v44 }
0x16e1   : > { %v5744_v2 = vpack.c.bf16 %v5742_v29, %v5741_v22 }
0x16e3   : > { %5884 = vmatmul.mubr.bf16.gmra.mrb[84].mxu1 %v5744_v2 }
0x1787   : > { %v5875_v32 = vpop.f32.mrb[80].mxu1 }
0x1788   : > { %5894 = vst [vmem:[%s607_s20] sm:$0xff] %v5875_v32  ;;  %v5877_v17 = vpop.f32.mrb[81].mxu1 }
0x1789   : > { %5895 = vst [vmem:[%s607_s20 + $0x8] sm:$0xff] %v5877_v17  ;;  %v5879_v58 = vpop.f32.mrb[82].mxu1 }
0x178a   : > { %5896 = vst [vmem:[%s607_s20 + $0x10] sm:$0xff] %v5879_v58  ;;  %v5881_v59 = vpop.f32.mrb[83].mxu1 }
0x178b   : > { %5897 = vst [vmem:[%s607_s20 + $0x18] sm:$0xff] %v5881_v59 }
0x17b6   : > { %v5885_v9 = vpop.f32.mrb[84].mxu1 }
0x17b7   : > { %5898 = vst [vmem:[%s607_s20 + $0x20] sm:$0xff] %v5885_v9  ;;  %v5887_v57 = vpop.f32.mrb[85].mxu1 }
0x17b8   : > { %5899 = vst [vmem:[%s607_s20 + $0x28] sm:$0xff] %v5887_v57  ;;  %v5889_v47 = vpop.f32.mrb[86].mxu1 }
0x17b9   : > { %5900 = vst [vmem:[%s607_s20 + $0x30] sm:$0xff] %v5889_v47  ;;  %v5891_v55 = vpop.f32.mrb[87].mxu1 }
0x17ba   : > { %5901 = vst [vmem:[%s607_s20 + $0x38] sm:$0xff] %v5891_v55 }
0x17bb PF: > { %s9700_s27 = sld [smem:[#allocation12_spill]] }
0x17c1   : > { %s30_s24 = sadd.s32 1, %s9700_s27  }
0x17c2   : > { %p27_p1 = scmp.ge.s32.totalorder %s30_s24, 4  }
0x17c4   :  { %29 = sbr.rel (!%p27_p1) target bundleno = 9 (0x9), region = 147 }
0x17cb   :  { %5923 = vsyncpa [#allocation3], 1 }
0x17cc   :  { %5925 = vsyncpa [#allocation3 + $0x1], 1 }
0x17cd   :  { %5926 = vsyncpa [#allocation5], 1 }
0x17ce   :  { %5927 = vsyncpa [#allocation8], 1 }

</bundles_post_ra>
